<compile_context>
chip_gen: v7x
topology: tpu7x:2x2x1
jax: 0.10.0
libtpu: 0.0.40
codegen_flags: <defaults>
</compile_context>

<pallas_src>
import jax
import jax.numpy as jnp
from jax import lax
from jax.experimental import pallas as pl
from jax.experimental.pallas import tpu as pltpu

IGNORE_INDEX = -100  # PyTorch nn.CrossEntropyLoss default ignore_index


# ----------------------------------------------------------------------------
# Kernel
# ----------------------------------------------------------------------------
def _make_ce_kernel(v_total, tile_v):
    """Build the cross-entropy kernel for a given (static) vocab size / tile."""
    mask_cols = (v_total % tile_v) != 0  # last vocab tile has padding columns

    def kernel(logits_ref, labels_ref, out_ref, m_sc, l_sc, p_sc):
        j = pl.program_id(1)            # vocab-tile index (innermost, "arbitrary")
        nv = pl.num_programs(1)

        @pl.when(j == 0)
        def _init():
            m_sc[...] = jnp.full_like(m_sc, -jnp.inf)
            l_sc[...] = jnp.zeros_like(l_sc)
            p_sc[...] = jnp.zeros_like(p_sc)

        x = logits_ref[...]             # (TM, TV) native dtype (f32 or bf16)
        labels = labels_ref[...]        # (TM, 1) int32
        tv = x.shape[-1]

        # (1, TV) lane iota of *global* vocab ids; broadcasts against labels.
        col = lax.broadcasted_iota(jnp.int32, (1, tv), 1) + j * tv

        if mask_cols:
            # Padding columns of the last vocab tile: push to a large negative
            # finite value so they never affect max / lse (and exp -> 0).
            x = jnp.where(col < v_total, x, jnp.asarray(-1e30, x.dtype))

        # Target-logit pick in the native dtype (only one hit per row, so the
        # reduction is exact); cast only the reduced (TM, 1) value to f32.
        picked = jnp.sum(jnp.where(col == labels, x, jnp.zeros_like(x)),
                         axis=-1, keepdims=True).astype(jnp.float32)
        p_sc[...] = p_sc[...] + picked

        # Online (streaming) softmax statistics over the vocab tiles.
        block_max = jnp.max(x, axis=-1, keepdims=True).astype(jnp.float32)
        m_new = jnp.maximum(m_sc[...], block_max)
        l_sc[...] = (jnp.exp(m_sc[...] - m_new) * l_sc[...]
                     + jnp.sum(jnp.exp(x.astype(jnp.float32) - m_new),
                               axis=-1, keepdims=True))
        m_sc[...] = m_new

        @pl.when(j == nv - 1)
        def _finalize():
            lse = m_sc[...] + jnp.log(l_sc[...])                 # (TM, 1)
            valid = labels != IGNORE_INDEX
            # Garbage (padded / ignored) rows may hold NaN/inf stats; where()
            # selects exactly 0.0 for them, so the tile sum stays clean.
            nll = jnp.where(valid, lse - p_sc[...], 0.0)          # (TM, 1)
            tile_sum = jnp.sum(nll, axis=0, keepdims=True)        # (1, 1)
            # Lane-dense (1, 128) store; wrapper reads column 0.
            out_ref[...] = jnp.zeros_like(out_ref) + tile_sum

    return kernel


# ----------------------------------------------------------------------------
# Tiling / VMEM sizing helpers
# ----------------------------------------------------------------------------
def _round_up(x, m):
    return ((x + m - 1) // m) * m


def _vmem_capacity_bytes():
    try:
        return int(pltpu.get_tpu_info().vmem_capacity_bytes)
    except Exception:
        return 64 * 1024 * 1024  # conservative default (v7x per-TC VMEM)


def _choose_tiles(n, v, elem_budget):
    """Pick (tile_rows, tile_v) given a max element budget for one block."""
    tm_cap = min(1024, _round_up(max(n, 1), 32))
    rows_full_v = (elem_budget // max(v, 1)) // 32 * 32
    # Prefer no vocab tiling when a healthy row tile still fits the budget.
    if rows_full_v >= min(256, tm_cap):
        return min(tm_cap, max(32, rows_full_v)), v
    # Vocab-tiled (online softmax) path for large vocabularies.
    tm = min(tm_cap, 256)
    tv = max(128, (elem_budget // tm) // 128 * 128)
    if tv >= v:
        tv = v
    return tm, tv


# ----------------------------------------------------------------------------
# Wrapper: equivalent of GPTLMLoss.forward(logits, labels)
# ----------------------------------------------------------------------------
def gpt_lm_loss(logits, labels, *, tile_rows=None, tile_v=None):
    """logits: [B, S, V] (f32 or bf16); labels: [B, S] int. Returns scalar loss."""
    B, S, V = logits.shape
    n = B * S
    dtype_bytes = jnp.dtype(logits.dtype).itemsize

    # ---- generation-aware VMEM budget -------------------------------------
    vmem_cap = _vmem_capacity_bytes()
    clamp = (vmem_cap // 8) * 7           # scoped-VMEM ceiling (56 MiB on v7x, 112 MiB on v5e/v6e)
    usable = (clamp // 4) * 3             # headroom for labels/output buffers + compiler scratch
    per_elem = 2 * dtype_bytes + 8        # double-buffered block + ~2 f32 block temporaries
    elem_budget = max(usable // per_elem, 32 * 128)

    auto_tm, auto_tv = _choose_tiles(n, V, elem_budget)
    tm = auto_tm if tile_rows is None else max(32, _round_up(int(tile_rows), 32))
    tv = auto_tv if tile_v is None else int(tile_v)
    if tv != V:
        tv = V if tv >= V else max(128, _round_up(tv, 128))

    grid_rows = int(pl.cdiv(n, tm))
    grid_v = int(pl.cdiv(V, tv))
    n_pad = grid_rows * tm

    # ---- GPT shift applied to LABELS only (cheap), never to the logits ----
    shifted_labels = jnp.concatenate(
        [labels[:, 1:].astype(jnp.int32),
         jnp.full((B, 1), IGNORE_INDEX, jnp.int32)], axis=1).reshape(-1)      # (n,)
    shifted_labels = jnp.pad(shifted_labels, (0, n_pad - n),
                             constant_values=IGNORE_INDEX)                    # (n_pad,)
    labels_2d = shifted_labels.reshape(n_pad, 1)

    flat_logits = logits.reshape(n, V)    # free, contiguous reshape

    # ---- scoped VMEM limit: actual peak + headroom, clamped to physical ----
    peak = 2 * tm * tv * dtype_bytes + 2 * tm * tv * 4 + (1 << 20)
    vmem_limit = int(min(clamp, max(32 << 20, peak + (8 << 20))))

    cost = pl.CostEstimate(
        flops=int(5 * n_pad * V),
        transcendentals=int(n_pad * V),
        bytes_accessed=int(n_pad * V * dtype_bytes + n_pad * 4
                           + grid_rows * 128 * 4),
    )

    partial = pl.pallas_call(
        _make_ce_kernel(V, tv),
        out_shape=jax.ShapeDtypeStruct((grid_rows, 128), jnp.float32),
        grid_spec=pltpu.PrefetchScalarGridSpec(
            num_scalar_prefetch=0,
            grid=(grid_rows, grid_v),
            in_specs=[
                pl.BlockSpec((tm, tv), lambda i, j: (i, j)),
                pl.BlockSpec((tm, 1), lambda i, j: (i, 0)),
            ],
            out_specs=pl.BlockSpec((1, 128), lambda i, j: (i, 0)),
            scratch_shapes=[
                pltpu.VMEM((tm, 1), jnp.float32),   # running max m
                pltpu.VMEM((tm, 1), jnp.float32),   # running sum-exp l
                pltpu.VMEM((tm, 1), jnp.float32),   # picked target logit
            ],
        ),
        compiler_params=pltpu.CompilerParams(
            # Each row tile writes its own disjoint output block -> row axis
            # is parallel (megacore-friendly); vocab axis is a reduction.
            dimension_semantics=("parallel", "arbitrary"),
            vmem_limit_bytes=vmem_limit,
        ),
        cost_estimate=cost,
    )(flat_logits, labels_2d)

    total_nll = jnp.sum(partial[:, 0])
    count = jnp.sum((shifted_labels != IGNORE_INDEX).astype(jnp.float32))
    return total_nll / count


# ----------------------------------------------------------------------------
# Pure-JAX reference of GPTLMLoss for validation
# ----------------------------------------------------------------------------
def _reference_loss(logits, labels):
    V = logits.shape[-1]
    sl = logits[:, :-1, :].reshape(-1, V).astype(jnp.float32)
    tl = labels[:, 1:].reshape(-1)
    logp = jax.nn.log_softmax(sl, axis=-1)
    valid = tl != IGNORE_INDEX
    safe_tl = jnp.where(valid, tl, 0)
    nll = -jnp.take_along_axis(logp, safe_tl[:, None], axis=-1)[:, 0]
    nll = jnp.where(valid, nll, 0.0)
    return jnp.sum(nll) / jnp.sum(valid.astype(jnp.float32))


if __name__ == "__main__":
    key = jax.random.PRNGKey(0)
    k1, k2, k3 = jax.random.split(key, 3)

    # Small GPT-like shapes: batch=2, seq=128, vocab=256.
    B, S, V = 2, 128, 256
    logits = jax.random.normal(k1, (B, S, V), dtype=jnp.float32)
    labels = jax.random.randint(k2, (B, S), 0, V, dtype=jnp.int32)
    # Sprinkle some ignore_index tokens (e.g. padding) to exercise masking.
    drop = jax.random.bernoulli(k3, 0.2, (B, S))
    labels = jnp.where(drop, IGNORE_INDEX, labels)

    ref = jax.block_until_ready(_reference_loss(logits, labels))

    # 1) Auto-sized tiles (single block, no vocab tiling at this size).
    loss = jax.block_until_ready(gpt_lm_loss(logits, labels))
    assert jnp.allclose(loss, ref, rtol=1e-5, atol=1e-5), (loss, ref)

    # 2) Explicit row + vocab tiling -> exercises the online-softmax path
    #    (4 row tiles x 2 vocab tiles) with the parallel/arbitrary 2-D grid.
    loss_tiled = jax.block_until_ready(
        gpt_lm_loss(logits, labels, tile_rows=64, tile_v=128))
    assert jnp.allclose(loss_tiled, ref, rtol=1e-5, atol=1e-5), (loss_tiled, ref)

    # 3) bf16 logits path (no stored f32 block copy; f32 accumulation).
    logits_bf16 = logits.astype(jnp.bfloat16)
    ref_bf16 = jax.block_until_ready(_reference_loss(logits_bf16, labels))
    loss_bf16 = jax.block_until_ready(
        gpt_lm_loss(logits_bf16, labels, tile_rows=64, tile_v=128))
    assert jnp.allclose(loss_bf16, ref_bf16, rtol=1e-2, atol=1e-2), (loss_bf16, ref_bf16)

    print("KERNEL_OK")
</pallas_src>

<mosaic_0001>
module attributes {stable_mosaic.version = 11 : i64} {
  func.func @kernel(%arg0: i32, %arg1: i32, %arg2: memref<256x256xf32, #tpu.memory_space<vmem>>, %arg3: memref<256x1xi32, #tpu.memory_space<vmem>>, %arg4: memref<1x128xf32, #tpu.memory_space<vmem>>, %arg5: memref<256x1xf32, #tpu.memory_space<vmem>>, %arg6: memref<256x1xf32, #tpu.memory_space<vmem>>, %arg7: memref<256x1xf32, #tpu.memory_space<vmem>>) attributes {dimension_semantics = [#tpu.dimension_semantics<parallel>, #tpu.dimension_semantics<arbitrary>], iteration_bounds = array<i64: 1, 1>, scalar_prefetch = 0 : i64, scratch_operands = 3 : i64, tpu.core_type = #tpu.core_type<tc>, window_params = [{transform_indices = @transform_0, window_bounds = array<i64: 256, 256>}, {transform_indices = @transform_1, window_bounds = array<i64: 256, 1>}, {transform_indices = @transform_2, window_bounds = array<i64: 1, 128>}]} {
    %c0_i32 = arith.constant 0 : i32
    %0 = arith.cmpi eq, %arg1, %c0_i32 : i32
    %1 = arith.extui %0 : i1 to i32
    %c0_i32_0 = arith.constant 0 : i32
    %2 = arith.cmpi ne, %1, %c0_i32_0 : i32
    scf.if %2 {
      %cst_23 = arith.constant 0xFF800000 : f32
      %39 = vector.broadcast %cst_23 : f32 to vector<256x1xf32>
      %c0_24 = arith.constant 0 : index
      %c0_25 = arith.constant 0 : index
      %40 = vector.load %arg5[%c0_24, %c0_25] : memref<256x1xf32, #tpu.memory_space<vmem>>, vector<256x1xf32>
      tpu.vector_store %arg5[%c0_24, %c0_25], %39 {strides = array<i32>} : memref<256x1xf32, #tpu.memory_space<vmem>>, vector<256x1xf32>,
      %cst_26 = arith.constant 0.000000e+00 : f32
      %41 = vector.broadcast %cst_26 : f32 to vector<256x1xf32>
      %c0_27 = arith.constant 0 : index
      %c0_28 = arith.constant 0 : index
      %42 = vector.load %arg6[%c0_27, %c0_28] : memref<256x1xf32, #tpu.memory_space<vmem>>, vector<256x1xf32>
      tpu.vector_store %arg6[%c0_27, %c0_28], %41 {strides = array<i32>} : memref<256x1xf32, #tpu.memory_space<vmem>>, vector<256x1xf32>,
      %cst_29 = arith.constant 0.000000e+00 : f32
      %43 = vector.broadcast %cst_29 : f32 to vector<256x1xf32>
      %c0_30 = arith.constant 0 : index
      %c0_31 = arith.constant 0 : index
      %44 = vector.load %arg7[%c0_30, %c0_31] : memref<256x1xf32, #tpu.memory_space<vmem>>, vector<256x1xf32>
      tpu.vector_store %arg7[%c0_30, %c0_31], %43 {strides = array<i32>} : memref<256x1xf32, #tpu.memory_space<vmem>>, vector<256x1xf32>,
    } else {
    }
    %c0 = arith.constant 0 : index
    %c0_1 = arith.constant 0 : index
    %3 = vector.load %arg2[%c0, %c0_1] : memref<256x256xf32, #tpu.memory_space<vmem>>, vector<256x256xf32>
    %c0_2 = arith.constant 0 : index
    %c0_3 = arith.constant 0 : index
    %4 = vector.load %arg3[%c0_2, %c0_3] : memref<256x1xi32, #tpu.memory_space<vmem>>, vector<256x1xi32>
    %5 = tpu.iota {dimensions = array<i32: 1>} : vector<1x256xi32>
    %c256_i32 = arith.constant 256 : i32
    %6 = arith.muli %arg1, %c256_i32 : i32
    %7 = vector.broadcast %6 : i32 to vector<1x256xi32>
    %8 = arith.addi %5, %7 : vector<1x256xi32>
    %9 = vector.broadcast %8 : vector<1x256xi32> to vector<256x256xi32>
    %10 = vector.broadcast %4 : vector<256x1xi32> to vector<256x256xi32>
    %11 = arith.cmpi eq, %9, %10 : vector<256x256xi32>
    %cst = arith.constant 0.000000e+00 : f32
    %12 = vector.broadcast %cst : f32 to vector<256x256xf32>
    %13 = arith.select %11, %3, %12 : vector<256x256xi1>, vector<256x256xf32>
    %cst_4 = arith.constant dense<0.000000e+00> : vector<256xf32>
    %14 = vector.multi_reduction <add>, %13, %cst_4 [1] : vector<256x256xf32> to vector<256xf32>
    %15 = vector.shape_cast %14 : vector<256xf32> to vector<256x1xf32>
    %c0_5 = arith.constant 0 : index
    %c0_6 = arith.constant 0 : index
    %16 = vector.load %arg7[%c0_5, %c0_6] : memref<256x1xf32, #tpu.memory_space<vmem>>, vector<256x1xf32>
    %17 = arith.addf %16, %15 : vector<256x1xf32>
    %c0_7 = arith.constant 0 : index
    %c0_8 = arith.constant 0 : index
    %18 = vector.load %arg7[%c0_7, %c0_8] : memref<256x1xf32, #tpu.memory_space<vmem>>, vector<256x1xf32>
    tpu.vector_store %arg7[%c0_7, %c0_8], %17 {strides = array<i32>} : memref<256x1xf32, #tpu.memory_space<vmem>>, vector<256x1xf32>,
    %cst_9 = arith.constant dense<0xFF800000> : vector<256xf32>
    %19 = vector.multi_reduction <maximumf>, %3, %cst_9 [1] : vector<256x256xf32> to vector<256xf32>
    %20 = vector.shape_cast %19 : vector<256xf32> to vector<256x1xf32>
    %c0_10 = arith.constant 0 : index
    %c0_11 = arith.constant 0 : index
    %21 = vector.load %arg5[%c0_10, %c0_11] : memref<256x1xf32, #tpu.memory_space<vmem>>, vector<256x1xf32>
    %22 = arith.maximumf %21, %20 : vector<256x1xf32>
    %c0_12 = arith.constant 0 : index
    %c0_13 = arith.constant 0 : index
    %23 = vector.load %arg5[%c0_12, %c0_13] : memref<256x1xf32, #tpu.memory_space<vmem>>, vector<256x1xf32>
    %24 = arith.subf %23, %22 : vector<256x1xf32>
    %25 = math.exp %24 : vector<256x1xf32>
    %c0_14 = arith.constant 0 : index
    %c0_15 = arith.constant 0 : index
    %26 = vector.load %arg6[%c0_14, %c0_15] : memref<256x1xf32, #tpu.memory_space<vmem>>, vector<256x1xf32>
    %27 = arith.mulf %25, %26 : vector<256x1xf32>
    %28 = vector.broadcast %22 : vector<256x1xf32> to vector<256x256xf32>
    %29 = arith.subf %3, %28 : vector<256x256xf32>
    %30 = math.exp %29 : vector<256x256xf32>
    %cst_16 = arith.constant dense<0.000000e+00> : vector<256xf32>
    %31 = vector.multi_reduction <add>, %30, %cst_16 [1] : vector<256x256xf32> to vector<256xf32>
    %32 = vector.shape_cast %31 : vector<256xf32> to vector<256x1xf32>
    %33 = arith.addf %27, %32 : vector<256x1xf32>
    %c0_17 = arith.constant 0 : index
    %c0_18 = arith.constant 0 : index
    %34 = vector.load %arg6[%c0_17, %c0_18] : memref<256x1xf32, #tpu.memory_space<vmem>>, vector<256x1xf32>
    tpu.vector_store %arg6[%c0_17, %c0_18], %33 {strides = array<i32>} : memref<256x1xf32, #tpu.memory_space<vmem>>, vector<256x1xf32>,
    %c0_19 = arith.constant 0 : index
    %c0_20 = arith.constant 0 : index
    %35 = vector.load %arg5[%c0_19, %c0_20] : memref<256x1xf32, #tpu.memory_space<vmem>>, vector<256x1xf32>
    tpu.vector_store %arg5[%c0_19, %c0_20], %22 {strides = array<i32>} : memref<256x1xf32, #tpu.memory_space<vmem>>, vector<256x1xf32>,
    %c0_i32_21 = arith.constant 0 : i32
    %36 = arith.cmpi eq, %arg1, %c0_i32_21 : i32
    %37 = arith.extui %36 : i1 to i32
    %c0_i32_22 = arith.constant 0 : i32
    %38 = arith.cmpi ne, %37, %c0_i32_22 : i32
    scf.if %38 {
      %c0_23 = arith.constant 0 : index
      %c0_24 = arith.constant 0 : index
      %39 = vector.load %arg5[%c0_23, %c0_24] : memref<256x1xf32, #tpu.memory_space<vmem>>, vector<256x1xf32>
      %c0_25 = arith.constant 0 : index
      %c0_26 = arith.constant 0 : index
      %40 = vector.load %arg6[%c0_25, %c0_26] : memref<256x1xf32, #tpu.memory_space<vmem>>, vector<256x1xf32>
      %41 = math.log %40 : vector<256x1xf32>
      %42 = arith.addf %39, %41 : vector<256x1xf32>
      %c-100_i32 = arith.constant -100 : i32
      %43 = vector.broadcast %c-100_i32 : i32 to vector<256x1xi32>
      %44 = arith.cmpi ne, %4, %43 : vector<256x1xi32>
      %c0_27 = arith.constant 0 : index
      %c0_28 = arith.constant 0 : index
      %45 = vector.load %arg7[%c0_27, %c0_28] : memref<256x1xf32, #tpu.memory_space<vmem>>, vector<256x1xf32>
      %46 = arith.subf %42, %45 : vector<256x1xf32>
      %cst_29 = arith.constant 0.000000e+00 : f32
      %47 = vector.broadcast %cst_29 : f32 to vector<256x1xf32>
      %48 = arith.select %44, %46, %47 : vector<256x1xi1>, vector<256x1xf32>
      %cst_30 = arith.constant dense<0.000000e+00> : vector<1xf32>
      %49 = vector.multi_reduction <add>, %48, %cst_30 [0] : vector<256x1xf32> to vector<1xf32>
      %50 = vector.shape_cast %49 : vector<1xf32> to vector<1x1xf32>
      %cst_31 = arith.constant 0.000000e+00 : f32
      %51 = vector.broadcast %cst_31 : f32 to vector<1x128xf32>
      %52 = vector.broadcast %50 : vector<1x1xf32> to vector<1x128xf32>
      %53 = arith.addf %51, %52 : vector<1x128xf32>
      %c0_32 = arith.constant 0 : index
      %c0_33 = arith.constant 0 : index
      %54 = vector.load %arg4[%c0_32, %c0_33] : memref<1x128xf32, #tpu.memory_space<vmem>>, vector<1x128xf32>
      tpu.vector_store %arg4[%c0_32, %c0_33], %53 {strides = array<i32>} : memref<1x128xf32, #tpu.memory_space<vmem>>, vector<1x128xf32>,
    } else {
    }
    return
  }
  func.func @transform_0(%arg0: i32, %arg1: i32) -> (i32, i32) {
    %c0_i32 = arith.constant 0 : i32
    return %arg0, %arg1 : i32, i32
  }
  func.func @transform_1(%arg0: i32, %arg1: i32) -> (i32, i32) {
    %c0_i32 = arith.constant 0 : i32
    %c0_i32_0 = arith.constant 0 : i32
    return %arg0, %c0_i32 : i32, i32
  }
  func.func @transform_2(%arg0: i32, %arg1: i32) -> (i32, i32) {
    %c0_i32 = arith.constant 0 : i32
    %c0_i32_0 = arith.constant 0 : i32
    return %arg0, %c0_i32 : i32, i32
  }
}

</mosaic_0001>

<bundles_post_ra>
// kernel: tpu_custom_call.1
= control target key start
LH: loop header
LB: loop body
LE: loop exit
PB: predicated region body
PF: predicated region fallthrough
CT: control target
= control target key end

     0   :  { %7 = vsyncpa [#allocation6], 0  ;;  %s3883_s0 = inlined_call_operand.hbm [shape: f32[256,256], index: 0, kind: input, shape index: {}]   ;;  %s3884_s1 = inlined_call_operand.vmem [shape: s32[256,1], index: 1, kind: input, shape index: {}]   ;;  %s3885_s2 = inlined_call_operand.hbm [shape: f32[1,128], index: 2, kind: output, shape index: {}]  }
   0x1   :  { %8 = vsyncpa [#allocation7], 0  ;;  %s2302_s9 = smov [#allocation5]   ;;  %s2254_s13 = scalar_lea.hbm %s3883_s0, 8192 }
   0x2   :  { %s14_s10 = sshll.u32 %s2302_s9, 4  ;;  %p2255_p0 = scmp.ne.s32.totalorder %s3883_s0, %s2254_s13  ;;  %s15_s10 = int_to_ptr.vmem [resolvable:$true] %s14_s10 }
   0x3   :  { %p2258_p1 = scmp.lt.u32.totalorder %s2254_s13, %s3883_s0 }
   0x5   :  { %p2260_p2 = pnand %p2258_p1, %p2255_p0 }
   0x7   :  { %2263 = shalt.err (!%p2260_p2)
}
   0x8   :  { %s2264_s18 = scalar_lea.vmem %s15_s10, 8192  ;;  %p2269_p4 = scmp.lt.s32.totalorder %s15_s10, %s15_s10 }
   0x9   :  { %p2265_p3 = scmp.ne.s32.totalorder %s15_s10, %s2264_s18  ;;  %p2270_p5 = scmp.lt.s32.totalorder %s2264_s18, %s2264_s18 }
   0xb   :  { %p2271_p6 = por %p2270_p5, %p2269_p4 }
   0xd   :  { %p2272_p7 = pnand %p2271_p6, %p2265_p3 }
   0xf   :  { %2275 = shalt.err (!%p2272_p7)
}
  0x10   :  { %s2303_s19 = smov 256   ;;  %s2304_s20 = smov 16  }
  0x11   :  { %20 = dma.hbm_to_vmem [thread:$0]  %s3883_s0, 8192, %s15_s10, [#allocation6], %s2303_s19, %s2303_s19, %s2304_s20  }
  0x12   :  { %2298 = dma.done.wait [#allocation6], 8192  }
  0x13   :  { %2299 = vsyncadd [#allocation6], 4294959104  ;;  %v2305_v0 = vmov 0   ;;  %v129_v1 = vld [vmem:[#allocation5 + $0x10] sm:$0xff]  ;;  %v130_v2 = vld [vmem:[#allocation5 + $0x18] sm:$0xff]  ;;  %vm30_vm0 = vcmask 7168  }
  0x14   :  { %1900 = vset.pattern.permute.xlu1 %v2305_v0  ;;  %1901 = vset.pattern.permute.xlu0 %v2305_v0  ;;  %v127_v3 = vld [vmem:[#allocation5] sm:$0xff]  ;;  %v650_v4 = vmax.f32 %v129_v1, %v130_v2  ;;  %v2336_v5 = vld [vmem:[#allocation5 + $0x8] sm:$0xff]  ;;  %v133_v15 = vld [vmem:[#allocation5 + $0x30] sm:$0xff]  ;;  %v2306_v23 = vmov -inf   ;;  %v2307_v60 = vmov 0.0  }
  0x15   :  { %v135_v6 = vld [vmem:[#allocation5 + $0x40] sm:$0xff]  ;;  %v136_v7 = vld [vmem:[#allocation5 + $0x48] sm:$0xff]  ;;  %v647_v8 = vmax.f32 %v127_v3, %v2336_v5  ;;  %v134_v16 = vld [vmem:[#allocation5 + $0x38] sm:$0xff]  ;;  %32 = vst.msk [vmem:[#allocation2 + $0x8] sm:$0xff] %vm30_vm0, %v2306_v23 }
  0x16   :  { %v131_v9 = vld [vmem:[#allocation5 + $0x20] sm:$0xff]  ;;  %v132_v10 = vld [vmem:[#allocation5 + $0x28] sm:$0xff]  ;;  %651 = vmax.xlane.f32.xlu1 %v650_v4  ;;  %v659_v11 = vmax.f32 %v135_v6, %v136_v7  ;;  %v656_v18 = vmax.f32 %v133_v15, %v134_v16  ;;  %v137_v21 = vld [vmem:[#allocation5 + $0x50] sm:$0xff]  ;;  %31 = vst.msk [vmem:[#allocation2] sm:$0xff] %vm30_vm0, %v2306_v23 }
  0x17   :  { %648 = vmax.xlane.f32.xlu0 %v647_v8  ;;  %v653_v12 = vmax.f32 %v131_v9, %v132_v10  ;;  %v139_v13 = vld [vmem:[#allocation5 + $0x60] sm:$0xff]  ;;  %v140_v14 = vld [vmem:[#allocation5 + $0x68] sm:$0xff]  ;;  %v138_v22 = vld [vmem:[#allocation5 + $0x58] sm:$0xff]  ;;  %33 = vst.msk [vmem:[#allocation2 + $0x10] sm:$0xff] %vm30_vm0, %v2306_v23 }
  0x18   :  { %v665_v17 = vmax.f32 %v139_v13, %v140_v14  ;;  %v143_v19 = vld [vmem:[#allocation5 + $0x80] sm:$0xff]  ;;  %v144_v20 = vld [vmem:[#allocation5 + $0x88] sm:$0xff]  ;;  %34 = vst.msk [vmem:[#allocation2 + $0x18] sm:$0xff] %vm30_vm0, %v2306_v23  ;;  %35 = vst.msk [vmem:[#allocation2 + $0x20] sm:$0xff] %vm30_vm0, %v2306_v23  ;;  %v662_v25 = vmax.f32 %v137_v21, %v138_v22 }
  0x19   :  { %36 = vst.msk [vmem:[#allocation2 + $0x28] sm:$0xff] %vm30_vm0, %v2306_v23  ;;  %37 = vst.msk [vmem:[#allocation2 + $0x30] sm:$0xff] %vm30_vm0, %v2306_v23  ;;  %v671_v24 = vmax.f32 %v143_v19, %v144_v20  ;;  %v147_v26 = vld [vmem:[#allocation5 + $0xa0] sm:$0xff]  ;;  %v148_v27 = vld [vmem:[#allocation5 + $0xa8] sm:$0xff] }
  0x1a   :  { %660 = vmax.xlane.f32.xlu1 %v659_v11  ;;  %38 = vst.msk [vmem:[#allocation2 + $0x38] sm:$0xff] %vm30_vm0, %v2306_v23  ;;  %39 = vst.msk [vmem:[#allocation2 + $0x40] sm:$0xff] %vm30_vm0, %v2306_v23  ;;  %v2371_v28 = vld [vmem:[#allocation5 + $0x70] sm:$0xff]  ;;  %v2373_v29 = vld [vmem:[#allocation5 + $0x78] sm:$0xff]  ;;  %v677_v30 = vmax.f32 %v147_v26, %v148_v27 }
  0x1b   :  { %654 = vmax.xlane.f32.xlu0 %v653_v12  ;;  %40 = vst.msk [vmem:[#allocation2 + $0x48] sm:$0xff] %vm30_vm0, %v2306_v23  ;;  %41 = vst.msk [vmem:[#allocation2 + $0x50] sm:$0xff] %vm30_vm0, %v2306_v23  ;;  %v668_v31 = vmax.f32 %v2371_v28, %v2373_v29  ;;  %v151_v32 = vld [vmem:[#allocation5 + $0xc0] sm:$0xff]  ;;  %v152_v33 = vld [vmem:[#allocation5 + $0xc8] sm:$0xff] }
  0x1c   :  { %42 = vst.msk [vmem:[#allocation2 + $0x58] sm:$0xff] %vm30_vm0, %v2306_v23  ;;  %43 = vst.msk [vmem:[#allocation2 + $0x60] sm:$0xff] %vm30_vm0, %v2306_v23  ;;  %v145_v34 = vld [vmem:[#allocation5 + $0x90] sm:$0xff]  ;;  %v146_v35 = vld [vmem:[#allocation5 + $0x98] sm:$0xff]  ;;  %v683_v36 = vmax.f32 %v151_v32, %v152_v33 }
  0x1d   :  { %44 = vst.msk [vmem:[#allocation2 + $0x68] sm:$0xff] %vm30_vm0, %v2306_v23  ;;  %45 = vst.msk [vmem:[#allocation2 + $0x70] sm:$0xff] %vm30_vm0, %v2306_v23  ;;  %v674_v37 = vmax.f32 %v145_v34, %v146_v35  ;;  %v155_v38 = vld [vmem:[#allocation5 + $0xe0] sm:$0xff]  ;;  %v156_v39 = vld [vmem:[#allocation5 + $0xe8] sm:$0xff] }
  0x1e   :  { %46 = vst.msk [vmem:[#allocation2 + $0x78] sm:$0xff] %vm30_vm0, %v2306_v23  ;;  %47 = vst.msk [vmem:[#allocation2 + $0x80] sm:$0xff] %vm30_vm0, %v2306_v23  ;;  %666 = vmax.xlane.f32.xlu1 %v665_v17  ;;  %v149_v40 = vld [vmem:[#allocation5 + $0xb0] sm:$0xff]  ;;  %v150_v41 = vld [vmem:[#allocation5 + $0xb8] sm:$0xff]  ;;  %v689_v42 = vmax.f32 %v155_v38, %v156_v39 }
  0x1f   :  { %48 = vst.msk [vmem:[#allocation2 + $0x88] sm:$0xff] %vm30_vm0, %v2306_v23  ;;  %49 = vst.msk [vmem:[#allocation2 + $0x90] sm:$0xff] %vm30_vm0, %v2306_v23  ;;  %657 = vmax.xlane.f32.xlu0 %v656_v18  ;;  %v680_v43 = vmax.f32 %v149_v40, %v150_v41  ;;  %v159_v44 = vld [vmem:[#allocation5 + $0x100] sm:$0xff]  ;;  %v160_v45 = vld [vmem:[#allocation5 + $0x108] sm:$0xff] }
  0x20   :  { %50 = vst.msk [vmem:[#allocation2 + $0x98] sm:$0xff] %vm30_vm0, %v2306_v23  ;;  %51 = vst.msk [vmem:[#allocation2 + $0xa0] sm:$0xff] %vm30_vm0, %v2306_v23  ;;  %v153_v46 = vld [vmem:[#allocation5 + $0xd0] sm:$0xff]  ;;  %v154_v47 = vld [vmem:[#allocation5 + $0xd8] sm:$0xff]  ;;  %v695_v48 = vmax.f32 %v159_v44, %v160_v45 }
  0x21   :  { %52 = vst.msk [vmem:[#allocation2 + $0xa8] sm:$0xff] %vm30_vm0, %v2306_v23  ;;  %53 = vst.msk [vmem:[#allocation2 + $0xb0] sm:$0xff] %vm30_vm0, %v2306_v23  ;;  %v686_v49 = vmax.f32 %v153_v46, %v154_v47  ;;  %v2377_v50 = vld [vmem:[#allocation5 + $0x120] sm:$0xff]  ;;  %v2379_v51 = vld [vmem:[#allocation5 + $0x128] sm:$0xff] }
  0x22   :  { %54 = vst.msk [vmem:[#allocation2 + $0xb8] sm:$0xff] %vm30_vm0, %v2306_v23  ;;  %55 = vst.msk [vmem:[#allocation2 + $0xc0] sm:$0xff] %vm30_vm0, %v2306_v23  ;;  %672 = vmax.xlane.f32.xlu1 %v671_v24  ;;  %v2381_v52 = vld [vmem:[#allocation5 + $0xf0] sm:$0xff]  ;;  %v2383_v53 = vld [vmem:[#allocation5 + $0xf8] sm:$0xff]  ;;  %v701_v54 = vmax.f32 %v2377_v50, %v2379_v51 }
  0x23   :  { %56 = vst.msk [vmem:[#allocation2 + $0xc8] sm:$0xff] %vm30_vm0, %v2306_v23  ;;  %57 = vst.msk [vmem:[#allocation2 + $0xd0] sm:$0xff] %vm30_vm0, %v2306_v23  ;;  %663 = vmax.xlane.f32.xlu0 %v662_v25  ;;  %v692_v55 = vmax.f32 %v2381_v52, %v2383_v53  ;;  %v2389_v56 = vld [vmem:[#allocation5 + $0x140] sm:$0xff]  ;;  %v2391_v57 = vld [vmem:[#allocation5 + $0x148] sm:$0xff] }
  0x24   :  { %58 = vst.msk [vmem:[#allocation2 + $0xd8] sm:$0xff] %vm30_vm0, %v2306_v23  ;;  %59 = vst.msk [vmem:[#allocation2 + $0xe0] sm:$0xff] %vm30_vm0, %v2306_v23  ;;  %v2393_v58 = vld [vmem:[#allocation5 + $0x110] sm:$0xff]  ;;  %v2395_v59 = vld [vmem:[#allocation5 + $0x118] sm:$0xff]  ;;  %v707_v61 = vmax.f32 %v2389_v56, %v2391_v57 }
  0x25   :  { %60 = vst.msk [vmem:[#allocation2 + $0xe8] sm:$0xff] %vm30_vm0, %v2306_v23  ;;  %61 = vst.msk [vmem:[#allocation2 + $0xf0] sm:$0xff] %vm30_vm0, %v2306_v23  ;;  %v698_v62 = vmax.f32 %v2393_v58, %v2395_v59  ;;  %v171_v63 = vld [vmem:[#allocation5 + $0x160] sm:$0xff]  ;;  %v172_v0 = vld [vmem:[#allocation5 + $0x168] sm:$0xff] }
  0x26   :  { %62 = vst.msk [vmem:[#allocation2 + $0xf8] sm:$0xff] %vm30_vm0, %v2306_v23  ;;  %678 = vmax.xlane.f32.xlu1 %v677_v30  ;;  %63 = vst.msk [vmem:[#allocation3] sm:$0xff] %vm30_vm0, %v2307_v60  ;;  %v165_v1 = vld [vmem:[#allocation5 + $0x130] sm:$0xff]  ;;  %v166_v2 = vld [vmem:[#allocation5 + $0x138] sm:$0xff]  ;;  %v713_v3 = vmax.f32 %v171_v63, %v172_v0 }
  0x27   :  { %669 = vmax.xlane.f32.xlu0 %v668_v31  ;;  %64 = vst.msk [vmem:[#allocation3 + $0x8] sm:$0xff] %vm30_vm0, %v2307_v60  ;;  %65 = vst.msk [vmem:[#allocation3 + $0x10] sm:$0xff] %vm30_vm0, %v2307_v60  ;;  %v704_v4 = vmax.f32 %v165_v1, %v166_v2  ;;  %v175_v6 = vld [vmem:[#allocation5 + $0x180] sm:$0xff]  ;;  %v176_v7 = vld [vmem:[#allocation5 + $0x188] sm:$0xff] }
  0x28   :  { %66 = vst.msk [vmem:[#allocation3 + $0x18] sm:$0xff] %vm30_vm0, %v2307_v60  ;;  %67 = vst.msk [vmem:[#allocation3 + $0x20] sm:$0xff] %vm30_vm0, %v2307_v60  ;;  %v169_v8 = vld [vmem:[#allocation5 + $0x150] sm:$0xff]  ;;  %v170_v9 = vld [vmem:[#allocation5 + $0x158] sm:$0xff]  ;;  %v719_v10 = vmax.f32 %v175_v6, %v176_v7 }
  0x29   :  { %68 = vst.msk [vmem:[#allocation3 + $0x28] sm:$0xff] %vm30_vm0, %v2307_v60  ;;  %69 = vst.msk [vmem:[#allocation3 + $0x30] sm:$0xff] %vm30_vm0, %v2307_v60  ;;  %v710_v11 = vmax.f32 %v169_v8, %v170_v9  ;;  %v179_v12 = vld [vmem:[#allocation5 + $0x1a0] sm:$0xff]  ;;  %v180_v13 = vld [vmem:[#allocation5 + $0x1a8] sm:$0xff] }
  0x2a   :  { %684 = vmax.xlane.f32.xlu1 %v683_v36  ;;  %70 = vst.msk [vmem:[#allocation3 + $0x38] sm:$0xff] %vm30_vm0, %v2307_v60  ;;  %71 = vst.msk [vmem:[#allocation3 + $0x40] sm:$0xff] %vm30_vm0, %v2307_v60  ;;  %v173_v14 = vld [vmem:[#allocation5 + $0x170] sm:$0xff]  ;;  %v174_v15 = vld [vmem:[#allocation5 + $0x178] sm:$0xff]  ;;  %v725_v16 = vmax.f32 %v179_v12, %v180_v13 }
  0x2b   :  { %675 = vmax.xlane.f32.xlu0 %v674_v37  ;;  %72 = vst.msk [vmem:[#allocation3 + $0x48] sm:$0xff] %vm30_vm0, %v2307_v60  ;;  %73 = vst.msk [vmem:[#allocation3 + $0x50] sm:$0xff] %vm30_vm0, %v2307_v60  ;;  %v716_v17 = vmax.f32 %v173_v14, %v174_v15  ;;  %v183_v18 = vld [vmem:[#allocation5 + $0x1c0] sm:$0xff]  ;;  %v184_v19 = vld [vmem:[#allocation5 + $0x1c8] sm:$0xff] }
  0x2c   :  { %74 = vst.msk [vmem:[#allocation3 + $0x58] sm:$0xff] %vm30_vm0, %v2307_v60  ;;  %75 = vst.msk [vmem:[#allocation3 + $0x60] sm:$0xff] %vm30_vm0, %v2307_v60  ;;  %v177_v20 = vld [vmem:[#allocation5 + $0x190] sm:$0xff]  ;;  %v178_v21 = vld [vmem:[#allocation5 + $0x198] sm:$0xff]  ;;  %v731_v22 = vmax.f32 %v183_v18, %v184_v19 }
  0x2d   :  { %76 = vst.msk [vmem:[#allocation3 + $0x68] sm:$0xff] %vm30_vm0, %v2307_v60  ;;  %77 = vst.msk [vmem:[#allocation3 + $0x70] sm:$0xff] %vm30_vm0, %v2307_v60  ;;  %v722_v23 = vmax.f32 %v177_v20, %v178_v21  ;;  %v187_v24 = vld [vmem:[#allocation5 + $0x1e0] sm:$0xff]  ;;  %v188_v25 = vld [vmem:[#allocation5 + $0x1e8] sm:$0xff] }
  0x2e   :  { %690 = vmax.xlane.f32.xlu1 %v689_v42  ;;  %78 = vst.msk [vmem:[#allocation3 + $0x78] sm:$0xff] %vm30_vm0, %v2307_v60  ;;  %79 = vst.msk [vmem:[#allocation3 + $0x80] sm:$0xff] %vm30_vm0, %v2307_v60  ;;  %v181_v26 = vld [vmem:[#allocation5 + $0x1b0] sm:$0xff]  ;;  %v182_v27 = vld [vmem:[#allocation5 + $0x1b8] sm:$0xff]  ;;  %v737_v30 = vmax.f32 %v187_v24, %v188_v25 }
  0x2f   :  { %681 = vmax.xlane.f32.xlu0 %v680_v43  ;;  %80 = vst.msk [vmem:[#allocation3 + $0x88] sm:$0xff] %vm30_vm0, %v2307_v60  ;;  %81 = vst.msk [vmem:[#allocation3 + $0x90] sm:$0xff] %vm30_vm0, %v2307_v60  ;;  %v728_v31 = vmax.f32 %v181_v26, %v182_v27  ;;  %v185_v32 = vld [vmem:[#allocation5 + $0x1d0] sm:$0xff]  ;;  %v186_v33 = vld [vmem:[#allocation5 + $0x1d8] sm:$0xff] }
  0x30   :  { %82 = vst.msk [vmem:[#allocation3 + $0x98] sm:$0xff] %vm30_vm0, %v2307_v60  ;;  %83 = vst.msk [vmem:[#allocation3 + $0xa0] sm:$0xff] %vm30_vm0, %v2307_v60  ;;  %v734_v34 = vmax.f32 %v185_v32, %v186_v33  ;;  %v189_v35 = vld [vmem:[#allocation5 + $0x1f0] sm:$0xff]  ;;  %v190_v36 = vld [vmem:[#allocation5 + $0x1f8] sm:$0xff] }
  0x31   :  { %84 = vst.msk [vmem:[#allocation3 + $0xa8] sm:$0xff] %vm30_vm0, %v2307_v60  ;;  %85 = vst.msk [vmem:[#allocation3 + $0xb0] sm:$0xff] %vm30_vm0, %v2307_v60  ;;  %v740_v37 = vmax.f32 %v189_v35, %v190_v36  ;;  %v193_v38 = vld [vmem:[%s3884_s1 + $0x10] sm:$0xff]  ;;  %v194_v39 = vld [vmem:[%s3884_s1 + $0x18] sm:$0xff] }
  0x32   :  { %696 = vmax.xlane.f32.xlu1 %v695_v48  ;;  %86 = vst.msk [vmem:[#allocation3 + $0xb8] sm:$0xff] %vm30_vm0, %v2307_v60  ;;  %87 = vst.msk [vmem:[#allocation3 + $0xc0] sm:$0xff] %vm30_vm0, %v2307_v60  ;;  %v196_v40 = vld [vmem:[%s3884_s1 + $0x28] sm:$0xff]  ;;  %v198_v41 = vld [vmem:[%s3884_s1 + $0x38] sm:$0xff] }
  0x33   :  { %687 = vmax.xlane.f32.xlu0 %v686_v49  ;;  %88 = vst.msk [vmem:[#allocation3 + $0xc8] sm:$0xff] %vm30_vm0, %v2307_v60  ;;  %89 = vst.msk [vmem:[#allocation3 + $0xd0] sm:$0xff] %vm30_vm0, %v2307_v60  ;;  %v191_v42 = vld [vmem:[%s3884_s1] sm:$0xff]  ;;  %v200_v43 = vld [vmem:[%s3884_s1 + $0x48] sm:$0xff] }
  0x34   :  { %90 = vst.msk [vmem:[#allocation3 + $0xd8] sm:$0xff] %vm30_vm0, %v2307_v60  ;;  %91 = vst.msk [vmem:[#allocation3 + $0xe0] sm:$0xff] %vm30_vm0, %v2307_v60  ;;  %v192_v44 = vld [vmem:[%s3884_s1 + $0x8] sm:$0xff]  ;;  %v202_v45 = vld [vmem:[%s3884_s1 + $0x58] sm:$0xff] }
  0x35   :  { %92 = vst.msk [vmem:[#allocation3 + $0xe8] sm:$0xff] %vm30_vm0, %v2307_v60  ;;  %93 = vst.msk [vmem:[#allocation3 + $0xf0] sm:$0xff] %vm30_vm0, %v2307_v60  ;;  %v195_v46 = vld [vmem:[%s3884_s1 + $0x20] sm:$0xff]  ;;  %v204_v47 = vld [vmem:[%s3884_s1 + $0x68] sm:$0xff] }
  0x36   :  { %94 = vst.msk [vmem:[#allocation3 + $0xf8] sm:$0xff] %vm30_vm0, %v2307_v60  ;;  %95 = vst.msk [vmem:[#allocation4] sm:$0xff] %vm30_vm0, %v2307_v60  ;;  %702 = vmax.xlane.f32.xlu1 %v701_v54  ;;  %v197_v48 = vld [vmem:[%s3884_s1 + $0x30] sm:$0xff]  ;;  %v206_v49 = vld [vmem:[%s3884_s1 + $0x78] sm:$0xff] }
  0x37   :  { %96 = vst.msk [vmem:[#allocation4 + $0x8] sm:$0xff] %vm30_vm0, %v2307_v60  ;;  %97 = vst.msk [vmem:[#allocation4 + $0x10] sm:$0xff] %vm30_vm0, %v2307_v60  ;;  %693 = vmax.xlane.f32.xlu0 %v692_v55  ;;  %v199_v50 = vld [vmem:[%s3884_s1 + $0x40] sm:$0xff]  ;;  %v208_v51 = vld [vmem:[%s3884_s1 + $0x88] sm:$0xff] }
  0x38   :  { %98 = vst.msk [vmem:[#allocation4 + $0x18] sm:$0xff] %vm30_vm0, %v2307_v60  ;;  %99 = vst.msk [vmem:[#allocation4 + $0x20] sm:$0xff] %vm30_vm0, %v2307_v60  ;;  %v201_v52 = vld [vmem:[%s3884_s1 + $0x50] sm:$0xff]  ;;  %v210_v53 = vld [vmem:[%s3884_s1 + $0x98] sm:$0xff] }
  0x39   :  { %100 = vst.msk [vmem:[#allocation4 + $0x28] sm:$0xff] %vm30_vm0, %v2307_v60  ;;  %101 = vst.msk [vmem:[#allocation4 + $0x30] sm:$0xff] %vm30_vm0, %v2307_v60  ;;  %v203_v54 = vld [vmem:[%s3884_s1 + $0x60] sm:$0xff]  ;;  %v212_v55 = vld [vmem:[%s3884_s1 + $0xa8] sm:$0xff] }
  0x3a   :  { %102 = vst.msk [vmem:[#allocation4 + $0x38] sm:$0xff] %vm30_vm0, %v2307_v60  ;;  %103 = vst.msk [vmem:[#allocation4 + $0x40] sm:$0xff] %vm30_vm0, %v2307_v60  ;;  %708 = vmax.xlane.f32.xlu1 %v707_v61  ;;  %v205_v56 = vld [vmem:[%s3884_s1 + $0x70] sm:$0xff]  ;;  %v214_v57 = vld [vmem:[%s3884_s1 + $0xb8] sm:$0xff] }
  0x3b   :  { %104 = vst.msk [vmem:[#allocation4 + $0x48] sm:$0xff] %vm30_vm0, %v2307_v60  ;;  %105 = vst.msk [vmem:[#allocation4 + $0x50] sm:$0xff] %vm30_vm0, %v2307_v60  ;;  %699 = vmax.xlane.f32.xlu0 %v698_v62  ;;  %v207_v58 = vld [vmem:[%s3884_s1 + $0x80] sm:$0xff]  ;;  %v216_v59 = vld [vmem:[%s3884_s1 + $0xc8] sm:$0xff] }
  0x3c   :  { %106 = vst.msk [vmem:[#allocation4 + $0x58] sm:$0xff] %vm30_vm0, %v2307_v60  ;;  %107 = vst.msk [vmem:[#allocation4 + $0x60] sm:$0xff] %vm30_vm0, %v2307_v60  ;;  %v218_v61 = vld [vmem:[%s3884_s1 + $0xd8] sm:$0xff]  ;;  %v211_v62 = vld [vmem:[%s3884_s1 + $0xa0] sm:$0xff] }
  0x3d   :  { %108 = vst.msk [vmem:[#allocation4 + $0x68] sm:$0xff] %vm30_vm0, %v2307_v60  ;;  %109 = vst.msk [vmem:[#allocation4 + $0x70] sm:$0xff] %vm30_vm0, %v2307_v60  ;;  %v220_v63 = vld [vmem:[%s3884_s1 + $0xe8] sm:$0xff]  ;;  %v213_v0 = vld [vmem:[%s3884_s1 + $0xb0] sm:$0xff] }
  0x3e   :  { %110 = vst.msk [vmem:[#allocation4 + $0x78] sm:$0xff] %vm30_vm0, %v2307_v60  ;;  %111 = vst.msk [vmem:[#allocation4 + $0x80] sm:$0xff] %vm30_vm0, %v2307_v60  ;;  %714 = vmax.xlane.f32.xlu1 %v713_v3  ;;  %v215_v1 = vld [vmem:[%s3884_s1 + $0xc0] sm:$0xff]  ;;  %v217_v2 = vld [vmem:[%s3884_s1 + $0xd0] sm:$0xff] }
  0x3f   :  { %112 = vst.msk [vmem:[#allocation4 + $0x88] sm:$0xff] %vm30_vm0, %v2307_v60  ;;  %113 = vst.msk [vmem:[#allocation4 + $0x90] sm:$0xff] %vm30_vm0, %v2307_v60  ;;  %705 = vmax.xlane.f32.xlu0 %v704_v4  ;;  %v2622_v3 = vld [vmem:[#allocation2 + $0x8] sm:$0xff]  ;;  %v2624_v4 = vld [vmem:[#allocation2] sm:$0xff] }
  0x40   :  { %114 = vst.msk [vmem:[#allocation4 + $0x98] sm:$0xff] %vm30_vm0, %v2307_v60  ;;  %115 = vst.msk [vmem:[#allocation4 + $0xa0] sm:$0xff] %vm30_vm0, %v2307_v60  ;;  %v219_v6 = vld [vmem:[%s3884_s1 + $0xe0] sm:$0xff]  ;;  %v2641_v13 = vld [vmem:[#allocation2 + $0x10] sm:$0xff] }
  0x41   :  { %116 = vst.msk [vmem:[#allocation4 + $0xa8] sm:$0xff] %vm30_vm0, %v2307_v60  ;;  %117 = vst.msk [vmem:[#allocation4 + $0xb0] sm:$0xff] %vm30_vm0, %v2307_v60  ;;  %v2655_v19 = vld [vmem:[#allocation2 + $0x30] sm:$0xff]  ;;  %v2661_v21 = vld [vmem:[#allocation2 + $0x18] sm:$0xff] }
  0x42   :  { %118 = vst.msk [vmem:[#allocation4 + $0xb8] sm:$0xff] %vm30_vm0, %v2307_v60  ;;  %119 = vst.msk [vmem:[#allocation4 + $0xc0] sm:$0xff] %vm30_vm0, %v2307_v60  ;;  %720 = vmax.xlane.f32.xlu1 %v719_v10  ;;  %v2675_v27 = vld [vmem:[#allocation2 + $0x40] sm:$0xff]  ;;  %v2881_v32 = vld [vmem:[#allocation2 + $0xc8] sm:$0xff] }
  0x43   :  { %120 = vst.msk [vmem:[#allocation4 + $0xc8] sm:$0xff] %vm30_vm0, %v2307_v60  ;;  %121 = vst.msk [vmem:[#allocation4 + $0xd0] sm:$0xff] %vm30_vm0, %v2307_v60  ;;  %711 = vmax.xlane.f32.xlu0 %v710_v11  ;;  %v2635_v11 = vld [vmem:[#allocation2 + $0x20] sm:$0xff]  ;;  %v2895_v12 = vld [vmem:[#allocation2 + $0xf0] sm:$0xff] }
  0x44   :  { %122 = vst.msk [vmem:[#allocation4 + $0xd8] sm:$0xff] %vm30_vm0, %v2307_v60  ;;  %123 = vst.msk [vmem:[#allocation4 + $0xe0] sm:$0xff] %vm30_vm0, %v2307_v60  ;;  %v2901_v14 = vld [vmem:[#allocation2 + $0xd8] sm:$0xff] }
  0x45   :  { %124 = vst.msk [vmem:[#allocation4 + $0xe8] sm:$0xff] %vm30_vm0, %v2307_v60  ;;  %125 = vst.msk [vmem:[#allocation4 + $0xf0] sm:$0xff] %vm30_vm0, %v2307_v60 }
  0x46   :  { %126 = vst.msk [vmem:[#allocation4 + $0xf8] sm:$0xff] %vm30_vm0, %v2307_v60  ;;  %726 = vmax.xlane.f32.xlu1 %v725_v16  ;;  %v209_v60 = vld [vmem:[%s3884_s1 + $0x90] sm:$0xff]  ;;  %3959 = vst [vmem:[#allocation11_spill] sm:$0xff] %v2622_v3 }
  0x47   :  { %717 = vmax.xlane.f32.xlu0 %v716_v17  ;;  %3960 = vst [vmem:[#allocation12_spill] sm:$0xff] %v2624_v4  ;;  %3963 = vst [vmem:[#allocation15_spill] sm:$0xff] %v2635_v11 }
  0x48   :  { %3964 = vst [vmem:[#allocation16_spill] sm:$0xff] %v2641_v13  ;;  %3967 = vst [vmem:[#allocation19_spill] sm:$0xff] %v2655_v19 }
  0x49   :  { %3968 = vst [vmem:[#allocation20_spill] sm:$0xff] %v2661_v21  ;;  %3971 = vst [vmem:[#allocation23_spill] sm:$0xff] %v2675_v27 }
  0x4a   :  { %732 = vmax.xlane.f32.xlu1 %v731_v22  ;;  %4012 = vst [vmem:[#allocation64_spill] sm:$0xff] %v2881_v32  ;;  %4015 = vst [vmem:[#allocation67_spill] sm:$0xff] %v2895_v12 }
  0x4b   :  { %723 = vmax.xlane.f32.xlu0 %v722_v23  ;;  %4016 = vst [vmem:[#allocation68_spill] sm:$0xff] %v2901_v14 }
  0x4e   :  { %738 = vmax.xlane.f32.xlu1 %v737_v30  ;;  %v2875_v30 = vld [vmem:[#allocation2 + $0xe0] sm:$0xff] }
  0x4f   :  { %729 = vmax.xlane.f32.xlu0 %v728_v31  ;;  %v2681_v31 = vld [vmem:[#allocation2 + $0x28] sm:$0xff]  ;;  %4011 = vst [vmem:[#allocation63_spill] sm:$0xff] %v2875_v30 }
  0x50   :  { %3972 = vst [vmem:[#allocation24_spill] sm:$0xff] %v2681_v31 }
  0x53   :  { %735 = vmax.xlane.f32.xlu0 %v734_v34 }
  0x57   :  { %741 = vmax.xlane.f32.xlu0 %v740_v37  ;;  %v2695_v37 = vld [vmem:[#allocation2 + $0x50] sm:$0xff] }
  0x58   :  { %3975 = vst [vmem:[#allocation27_spill] sm:$0xff] %v2695_v37 }
  0x5f   :  { %237 = vperm.xlu1 %1900, %v193_v38  }
  0x63   :  { %240 = vperm.xlu1 %1900, %v194_v39   ;;  %v2701_v39 = vld [vmem:[#allocation2 + $0x38] sm:$0xff] }
  0x64   :  { %3976 = vst [vmem:[#allocation28_spill] sm:$0xff] %v2701_v39 }
  0x67   :  { %246 = vperm.xlu1 %1900, %v196_v40  }
  0x6b   :  { %252 = vperm.xlu1 %1900, %v198_v41  }
  0x6d   :  { %231 = vperm.xlu0 %1901, %v191_v42  }
  0x6f   :  { %258 = vperm.xlu1 %1900, %v200_v43  }
  0x71   :  { %234 = vperm.xlu0 %1901, %v192_v44  }
  0x73   :  { %264 = vperm.xlu1 %1900, %v202_v45   ;;  %v2715_v45 = vld [vmem:[#allocation2 + $0x60] sm:$0xff] }
  0x74   :  { %3979 = vst [vmem:[#allocation31_spill] sm:$0xff] %v2715_v45 }
  0x75   :  { %243 = vperm.xlu0 %1901, %v195_v46  }
  0x77   :  { %270 = vperm.xlu1 %1900, %v204_v47   ;;  %v2721_v47 = vld [vmem:[#allocation2 + $0x48] sm:$0xff] }
  0x78   :  { %3980 = vst [vmem:[#allocation32_spill] sm:$0xff] %v2721_v47 }
  0x79   :  { %249 = vperm.xlu0 %1901, %v197_v48   ;;  %v2861_v48 = vld [vmem:[#allocation2 + $0xb8] sm:$0xff] }
  0x7a   :  { %4008 = vst [vmem:[#allocation60_spill] sm:$0xff] %v2861_v48 }
  0x7b   :  { %276 = vperm.xlu1 %1900, %v206_v49  }
  0x7d   :  { %255 = vperm.xlu0 %1901, %v199_v50  }
  0x7f   :  { %282 = vperm.xlu1 %1900, %v208_v51  }
  0x81   :  { %261 = vperm.xlu0 %1901, %v201_v52  }
  0x83   :  { %288 = vperm.xlu1 %1900, %v210_v53   ;;  %v2735_v53 = vld [vmem:[#allocation2 + $0x70] sm:$0xff] }
  0x84   :  { %3983 = vst [vmem:[#allocation35_spill] sm:$0xff] %v2735_v53 }
  0x85   :  { %267 = vperm.xlu0 %1901, %v203_v54   ;;  %v2841_v54 = vld [vmem:[#allocation2 + $0xa8] sm:$0xff] }
  0x86   :  { %4004 = vst [vmem:[#allocation56_spill] sm:$0xff] %v2841_v54 }
  0x87   :  { %294 = vperm.xlu1 %1900, %v212_v55   ;;  %v2741_v55 = vld [vmem:[#allocation2 + $0x58] sm:$0xff] }
  0x88   :  { %3984 = vst [vmem:[#allocation36_spill] sm:$0xff] %v2741_v55 }
  0x89   :  { %273 = vperm.xlu0 %1901, %v205_v56   ;;  %v2855_v56 = vld [vmem:[#allocation2 + $0xd0] sm:$0xff] }
  0x8a   :  { %4007 = vst [vmem:[#allocation59_spill] sm:$0xff] %v2855_v56 }
  0x8b   :  { %300 = vperm.xlu1 %1900, %v214_v57  }
  0x8d   :  { %279 = vperm.xlu0 %1901, %v207_v58  }
  0x8f   :  { %306 = vperm.xlu1 %1900, %v216_v59  }
  0x91   :  { %285 = vperm.xlu0 %1901, %v209_v60  }
  0x93   :  { %312 = vperm.xlu1 %1900, %v218_v61   ;;  %v2755_v61 = vld [vmem:[#allocation2 + $0x80] sm:$0xff] }
  0x94   :  { %3987 = vst [vmem:[#allocation39_spill] sm:$0xff] %v2755_v61 }
  0x95   :  { %291 = vperm.xlu0 %1901, %v211_v62  }
  0x97   :  { %318 = vperm.xlu1 %1900, %v220_v63   ;;  %v2761_v63 = vld [vmem:[#allocation2 + $0x68] sm:$0xff] }
  0x98   :  { %3988 = vst [vmem:[#allocation40_spill] sm:$0xff] %v2761_v63 }
  0x99   :  { %297 = vperm.xlu0 %1901, %v213_v0  }
  0x9d   :  { %303 = vperm.xlu0 %1901, %v215_v1  }
  0xa1   :  { %309 = vperm.xlu0 %1901, %v217_v2  }
  0xa3   :  { %v652_v7 = vpop.xlane.xlu1 %651 }
  0xa4   :  { %v2630_v8 = vmax.f32 %v2622_v3, %v652_v7  ;;  %v649_v9 = vpop.xlane.xlu0 %648 }
  0xa5   :  { %v2633_v10 = vmax.f32 %v2624_v4, %v649_v9  ;;  %315 = vperm.xlu0 %1901, %v219_v6   ;;  %v2775_v9 = vld [vmem:[#allocation2 + $0x90] sm:$0xff] }
  0xa6   :  { %3961 = vst [vmem:[#allocation13_spill] sm:$0xff] %v2630_v8  ;;  %1480 = vst.msk [vmem:[#allocation2 + $0x8] sm:$0xff] %vm30_vm0, %v2630_v8 }
  0xa7   :  { %3962 = vst [vmem:[#allocation14_spill] sm:$0xff] %v2633_v10  ;;  %1479 = vst.msk [vmem:[#allocation2] sm:$0xff] %vm30_vm0, %v2633_v10  ;;  %969 = vperm.xlu1 %1900, %v2633_v10   ;;  %v661_v15 = vpop.xlane.xlu1 %660 }
  0xa8   :  { %v2649_v16 = vmax.f32 %v2635_v11, %v661_v15  ;;  %v655_v17 = vpop.xlane.xlu0 %654  ;;  %3991 = vst [vmem:[#allocation43_spill] sm:$0xff] %v2775_v9  ;;  %v2821_v15 = vld [vmem:[#allocation2 + $0x98] sm:$0xff] }
  0xa9   :  { %v2652_v18 = vmax.f32 %v2641_v13, %v655_v17  ;;  %974 = vperm.xlu0 %1901, %v2630_v8   ;;  %v2781_v17 = vld [vmem:[#allocation2 + $0x78] sm:$0xff]  ;;  %4000 = vst [vmem:[#allocation52_spill] sm:$0xff] %v2821_v15 }
  0xaa   :  { %3965 = vst [vmem:[#allocation17_spill] sm:$0xff] %v2649_v16  ;;  %1483 = vst.msk [vmem:[#allocation2 + $0x20] sm:$0xff] %vm30_vm0, %v2649_v16 }
  0xab   :  { %3966 = vst [vmem:[#allocation18_spill] sm:$0xff] %v2652_v18  ;;  %1481 = vst.msk [vmem:[#allocation2 + $0x10] sm:$0xff] %vm30_vm0, %v2652_v18  ;;  %979 = vperm.xlu1 %1900, %v2652_v18   ;;  %v667_v23 = vpop.xlane.xlu1 %666 }
  0xac   :  { %v2669_v24 = vmax.f32 %v2655_v19, %v667_v23  ;;  %v658_v25 = vpop.xlane.xlu0 %657  ;;  %3992 = vst [vmem:[#allocation44_spill] sm:$0xff] %v2781_v17  ;;  %v2835_v23 = vld [vmem:[#allocation2 + $0xc0] sm:$0xff] }
  0xad   :  { %v2672_v26 = vmax.f32 %v2661_v21, %v658_v25  ;;  %989 = vperm.xlu0 %1901, %v2649_v16   ;;  %4003 = vst [vmem:[#allocation55_spill] sm:$0xff] %v2835_v23  ;;  %v3039_v21 = vld [vmem:[#allocation5 + $0x60] sm:$0xff]  ;;  %v3045_v16 = vld [vmem:[#allocation5 + $0x50] sm:$0xff] }
  0xae   :  { %3969 = vst [vmem:[#allocation21_spill] sm:$0xff] %v2669_v24  ;;  %1485 = vst.msk [vmem:[#allocation2 + $0x30] sm:$0xff] %vm30_vm0, %v2669_v24 }
  0xaf   :  { %3970 = vst [vmem:[#allocation22_spill] sm:$0xff] %v2672_v26  ;;  %1482 = vst.msk [vmem:[#allocation2 + $0x18] sm:$0xff] %vm30_vm0, %v2672_v26  ;;  %984 = vperm.xlu1 %1900, %v2672_v26   ;;  %v673_v33 = vpop.xlane.xlu1 %672 }
  0xb0   :  { %v2689_v34 = vmax.f32 %v2675_v27, %v673_v33  ;;  %v664_v35 = vpop.xlane.xlu0 %663  ;;  %v3027_v27 = vld [vmem:[#allocation5 + $0x40] sm:$0xff] }
  0xb1   :  { %v2692_v36 = vmax.f32 %v2681_v31, %v664_v35  ;;  %999 = vperm.xlu0 %1901, %v2669_v24   ;;  %v3033_v24 = vld [vmem:[#allocation5 + $0x30] sm:$0xff] }
  0xb2   :  { %3973 = vst [vmem:[#allocation25_spill] sm:$0xff] %v2689_v34  ;;  %1487 = vst.msk [vmem:[#allocation2 + $0x40] sm:$0xff] %vm30_vm0, %v2689_v34 }
  0xb3   :  { %3974 = vst [vmem:[#allocation26_spill] sm:$0xff] %v2692_v36  ;;  %1484 = vst.msk [vmem:[#allocation2 + $0x28] sm:$0xff] %vm30_vm0, %v2692_v36  ;;  %994 = vperm.xlu1 %1900, %v2692_v36   ;;  %v679_v41 = vpop.xlane.xlu1 %678  ;;  %v3030_v36 = vld [vmem:[#allocation5 + $0x48] sm:$0xff] }
  0xb4   :  { %v2709_v42 = vmax.f32 %v2695_v37, %v679_v41  ;;  %v670_v43 = vpop.xlane.xlu0 %669 }
  0xb5   :  { %v2712_v44 = vmax.f32 %v2701_v39, %v670_v43  ;;  %1009 = vperm.xlu0 %1901, %v2689_v34   ;;  %v2795_v43 = vld [vmem:[#allocation2 + $0xa0] sm:$0xff] }
  0xb6   :  { %3977 = vst [vmem:[#allocation29_spill] sm:$0xff] %v2709_v42  ;;  %1489 = vst.msk [vmem:[#allocation2 + $0x50] sm:$0xff] %vm30_vm0, %v2709_v42  ;;  %v3021_v39 = vld [vmem:[#allocation5 + $0x20] sm:$0xff] }
  0xb7   :  { %3978 = vst [vmem:[#allocation30_spill] sm:$0xff] %v2712_v44  ;;  %1486 = vst.msk [vmem:[#allocation2 + $0x38] sm:$0xff] %vm30_vm0, %v2712_v44  ;;  %1004 = vperm.xlu1 %1900, %v2712_v44   ;;  %v685_v49 = vpop.xlane.xlu1 %684 }
  0xb8   :  { %v2729_v50 = vmax.f32 %v2715_v45, %v685_v49  ;;  %v676_v51 = vpop.xlane.xlu0 %675  ;;  %3995 = vst [vmem:[#allocation47_spill] sm:$0xff] %v2795_v43 }
  0xb9   :  { %v2732_v52 = vmax.f32 %v2721_v47, %v676_v51  ;;  %1019 = vperm.xlu0 %1901, %v2709_v42   ;;  %v2801_v51 = vld [vmem:[#allocation2 + $0x88] sm:$0xff]  ;;  %v3018_v42 = vld [vmem:[#allocation5 + $0x18] sm:$0xff] }
  0xba   :  { %3981 = vst [vmem:[#allocation33_spill] sm:$0xff] %v2729_v50  ;;  %1491 = vst.msk [vmem:[#allocation2 + $0x60] sm:$0xff] %vm30_vm0, %v2729_v50 }
  0xbb   :  { %3982 = vst [vmem:[#allocation34_spill] sm:$0xff] %v2732_v52  ;;  %1488 = vst.msk [vmem:[#allocation2 + $0x48] sm:$0xff] %vm30_vm0, %v2732_v52  ;;  %1014 = vperm.xlu1 %1900, %v2732_v52   ;;  %v691_v57 = vpop.xlane.xlu1 %690 }
  0xbc   :  { %v2749_v58 = vmax.f32 %v2735_v53, %v691_v57  ;;  %v682_v59 = vpop.xlane.xlu0 %681  ;;  %3996 = vst [vmem:[#allocation48_spill] sm:$0xff] %v2801_v51 }
  0xbd   :  { %v2752_v60 = vmax.f32 %v2741_v55, %v682_v59  ;;  %1029 = vperm.xlu0 %1901, %v2729_v50  }
  0xbe   :  { %3985 = vst [vmem:[#allocation37_spill] sm:$0xff] %v2749_v58  ;;  %1493 = vst.msk [vmem:[#allocation2 + $0x70] sm:$0xff] %vm30_vm0, %v2749_v58 }
  0xbf   :  { %3986 = vst [vmem:[#allocation38_spill] sm:$0xff] %v2752_v60  ;;  %1490 = vst.msk [vmem:[#allocation2 + $0x58] sm:$0xff] %vm30_vm0, %v2752_v60  ;;  %1024 = vperm.xlu1 %1900, %v2752_v60   ;;  %v697_v1 = vpop.xlane.xlu1 %696  ;;  %v3015_v60 = vld [vmem:[#allocation5 + $0x10] sm:$0xff] }
  0xc0   :  { %v2769_v2 = vmax.f32 %v2755_v61, %v697_v1  ;;  %v688_v6 = vpop.xlane.xlu0 %687 }
  0xc1   :  { %v2772_v7 = vmax.f32 %v2761_v63, %v688_v6  ;;  %1039 = vperm.xlu0 %1901, %v2749_v58   ;;  %v3011_v58 = vld [vmem:[#allocation5] sm:$0xff] }
  0xc2   :  { %3989 = vst [vmem:[#allocation41_spill] sm:$0xff] %v2769_v2  ;;  %1495 = vst.msk [vmem:[#allocation2 + $0x80] sm:$0xff] %vm30_vm0, %v2769_v2 }
  0xc3   :  { %3990 = vst [vmem:[#allocation42_spill] sm:$0xff] %v2772_v7  ;;  %1492 = vst.msk [vmem:[#allocation2 + $0x68] sm:$0xff] %vm30_vm0, %v2772_v7  ;;  %1034 = vperm.xlu1 %1900, %v2772_v7   ;;  %v703_v25 = vpop.xlane.xlu1 %702 }
  0xc4   :  { %v2789_v33 = vmax.f32 %v2775_v9, %v703_v25  ;;  %v694_v35 = vpop.xlane.xlu0 %693 }
  0xc5   :  { %v2792_v41 = vmax.f32 %v2781_v17, %v694_v35  ;;  %1049 = vperm.xlu0 %1901, %v2769_v2   ;;  %v2815_v35 = vld [vmem:[#allocation2 + $0xb0] sm:$0xff] }
  0xc6   :  { %3993 = vst [vmem:[#allocation45_spill] sm:$0xff] %v2789_v33  ;;  %1497 = vst.msk [vmem:[#allocation2 + $0x90] sm:$0xff] %vm30_vm0, %v2789_v33 }
  0xc7   :  { %3994 = vst [vmem:[#allocation46_spill] sm:$0xff] %v2792_v41  ;;  %1494 = vst.msk [vmem:[#allocation2 + $0x78] sm:$0xff] %vm30_vm0, %v2792_v41  ;;  %1044 = vperm.xlu1 %1900, %v2792_v41   ;;  %v709_v59 = vpop.xlane.xlu1 %708 }
  0xc8   :  { %v2809_v1 = vmax.f32 %v2795_v43, %v709_v59  ;;  %v700_v6 = vpop.xlane.xlu0 %699  ;;  %3999 = vst [vmem:[#allocation51_spill] sm:$0xff] %v2815_v35 }
  0xc9   :  { %v2812_v25 = vmax.f32 %v2801_v51, %v700_v6  ;;  %1059 = vperm.xlu0 %1901, %v2789_v33  }
  0xca   :  { %3997 = vst [vmem:[#allocation49_spill] sm:$0xff] %v2809_v1  ;;  %1499 = vst.msk [vmem:[#allocation2 + $0xa0] sm:$0xff] %vm30_vm0, %v2809_v1 }
  0xcb   :  { %3998 = vst [vmem:[#allocation50_spill] sm:$0xff] %v2812_v25  ;;  %1496 = vst.msk [vmem:[#allocation2 + $0x88] sm:$0xff] %vm30_vm0, %v2812_v25  ;;  %1054 = vperm.xlu1 %1900, %v2812_v25   ;;  %v715_v6 = vpop.xlane.xlu1 %714 }
  0xcc   :  { %v2829_v57 = vmax.f32 %v2815_v35, %v715_v6  ;;  %v706_v62 = vpop.xlane.xlu0 %705 }
  0xcd   :  { %v2832_v49 = vmax.f32 %v2821_v15, %v706_v62  ;;  %1069 = vperm.xlu0 %1901, %v2809_v1  }
  0xce   :  { %4001 = vst [vmem:[#allocation53_spill] sm:$0xff] %v2829_v57  ;;  %1501 = vst.msk [vmem:[#allocation2 + $0xb0] sm:$0xff] %vm30_vm0, %v2829_v57 }
  0xcf   :  { %4002 = vst [vmem:[#allocation54_spill] sm:$0xff] %v2832_v49  ;;  %1498 = vst.msk [vmem:[#allocation2 + $0x98] sm:$0xff] %vm30_vm0, %v2832_v49  ;;  %1064 = vperm.xlu1 %1900, %v2832_v49   ;;  %v721_v62 = vpop.xlane.xlu1 %720 }
  0xd0   :  { %v2849_v0 = vmax.f32 %v2835_v23, %v721_v62  ;;  %v712_v46 = vpop.xlane.xlu0 %711 }
  0xd1   :  { %v2852_v59 = vmax.f32 %v2841_v54, %v712_v46  ;;  %1079 = vperm.xlu0 %1901, %v2829_v57  }
  0xd2   :  { %4005 = vst [vmem:[#allocation57_spill] sm:$0xff] %v2849_v0  ;;  %1503 = vst.msk [vmem:[#allocation2 + $0xc0] sm:$0xff] %vm30_vm0, %v2849_v0 }
  0xd3   :  { %4006 = vst [vmem:[#allocation58_spill] sm:$0xff] %v2852_v59  ;;  %1500 = vst.msk [vmem:[#allocation2 + $0xa8] sm:$0xff] %vm30_vm0, %v2852_v59  ;;  %1074 = vperm.xlu1 %1900, %v2852_v59   ;;  %v727_v46 = vpop.xlane.xlu1 %726 }
  0xd4   :  { %v2869_v38 = vmax.f32 %v2855_v56, %v727_v46  ;;  %v718_v40 = vpop.xlane.xlu0 %717 }
  0xd5   :  { %v2872_v6 = vmax.f32 %v2861_v48, %v718_v40  ;;  %1089 = vperm.xlu0 %1901, %v2849_v0  }
  0xd6   :  { %4009 = vst [vmem:[#allocation61_spill] sm:$0xff] %v2869_v38  ;;  %1505 = vst.msk [vmem:[#allocation2 + $0xd0] sm:$0xff] %vm30_vm0, %v2869_v38 }
  0xd7   :  { %4010 = vst [vmem:[#allocation62_spill] sm:$0xff] %v2872_v6  ;;  %1502 = vst.msk [vmem:[#allocation2 + $0xb8] sm:$0xff] %vm30_vm0, %v2872_v6  ;;  %1084 = vperm.xlu1 %1900, %v2872_v6   ;;  %v733_v40 = vpop.xlane.xlu1 %732 }
  0xd8   :  { %v2889_v20 = vmax.f32 %v2875_v30, %v733_v40  ;;  %v724_v22 = vpop.xlane.xlu0 %723  ;;  %v2919_v40 = vld [vmem:[#allocation2 + $0xe8] sm:$0xff]  ;;  %v2932_v30 = vld [vmem:[#allocation2 + $0xf8] sm:$0xff] }
  0xd9   :  { %v2892_v62 = vmax.f32 %v2881_v32, %v724_v22  ;;  %1099 = vperm.xlu0 %1901, %v2869_v38   ;;  %4019 = vst [vmem:[#allocation71_spill] sm:$0xff] %v2919_v40  ;;  %4021 = vst [vmem:[#allocation73_spill] sm:$0xff] %v2932_v30 }
  0xda   :  { %4013 = vst [vmem:[#allocation65_spill] sm:$0xff] %v2889_v20  ;;  %1507 = vst.msk [vmem:[#allocation2 + $0xe0] sm:$0xff] %vm30_vm0, %v2889_v20 }
  0xdb   :  { %4014 = vst [vmem:[#allocation66_spill] sm:$0xff] %v2892_v62  ;;  %1504 = vst.msk [vmem:[#allocation2 + $0xc8] sm:$0xff] %vm30_vm0, %v2892_v62  ;;  %1094 = vperm.xlu1 %1900, %v2892_v62   ;;  %v739_v22 = vpop.xlane.xlu1 %738 }
  0xdc   :  { %v2909_v38 = vmax.f32 %v2895_v12, %v739_v22  ;;  %v730_v56 = vpop.xlane.xlu0 %729  ;;  %v221_v12 = vld [vmem:[%s3884_s1 + $0xf0] sm:$0xff] }
  0xdd   :  { %v2912_v46 = vmax.f32 %v2901_v14, %v730_v56  ;;  %1109 = vperm.xlu0 %1901, %v2889_v20  }
  0xde   :  { %4017 = vst [vmem:[#allocation69_spill] sm:$0xff] %v2909_v38  ;;  %1509 = vst.msk [vmem:[#allocation2 + $0xf0] sm:$0xff] %vm30_vm0, %v2909_v38 }
  0xdf   :  { %4018 = vst [vmem:[#allocation70_spill] sm:$0xff] %v2912_v46  ;;  %1506 = vst.msk [vmem:[#allocation2 + $0xd8] sm:$0xff] %vm30_vm0, %v2912_v46  ;;  %1104 = vperm.xlu1 %1900, %v2912_v46   ;;  %v2926_v56 = vpop.permute.xlu1 %237 }
  0xe0   :  { %v736_v22 = vpop.xlane.xlu0 %735 }
  0xe1   :  { %v2929_v20 = vmax.f32 %v2919_v40, %v736_v22  ;;  %1119 = vperm.xlu0 %1901, %v2909_v38  }
  0xe3   :  { %4020 = vst [vmem:[#allocation72_spill] sm:$0xff] %v2929_v20  ;;  %1508 = vst.msk [vmem:[#allocation2 + $0xe8] sm:$0xff] %vm30_vm0, %v2929_v20  ;;  %1114 = vperm.xlu1 %1900, %v2929_v20   ;;  %v2942_v46 = vpop.permute.xlu1 %240  ;;  %v222_v20 = vld [vmem:[%s3884_s1 + $0xf8] sm:$0xff] }
  0xe4   :  { %v742_v22 = vpop.xlane.xlu0 %741 }
  0xe5   :  { %v2945_v14 = vmax.f32 %v2932_v30, %v742_v22  ;;  %321 = vperm.xlu0 %1901, %v221_v12  }
  0xe7   :  { %4022 = vst [vmem:[#allocation74_spill] sm:$0xff] %v2945_v14  ;;  %1510 = vst.msk [vmem:[#allocation2 + $0xf8] sm:$0xff] %vm30_vm0, %v2945_v14  ;;  %1124 = vperm.xlu1 %1900, %v2945_v14   ;;  %v2952_v62 = vpop.permute.xlu1 %246 }
  0xeb   :  { %324 = vperm.xlu1 %1900, %v222_v20   ;;  %v2957_v40 = vpop.permute.xlu1 %252 }
  0xec   :  { %v2959_v22 = vpop.permute.xlu0 %231 }
  0xef   :  { %v2961_v12 = vpop.permute.xlu1 %258 }
  0xf0   :  { %v2963_v32 = vpop.permute.xlu0 %234 }
  0xf3   :  { %v2965_v38 = vpop.permute.xlu1 %264 }
  0xf4   :  { %v2967_v30 = vpop.permute.xlu0 %243 }
  0xf7   :  { %v2969_v14 = vpop.permute.xlu1 %270 }
  0xf8   :  { %v2971_v0 = vpop.permute.xlu0 %249 }
  0xfb   :  { %v2973_v23 = vpop.permute.xlu1 %276 }
  0xfc   :  { %v2975_v6 = vpop.permute.xlu0 %255 }
  0xff   :  { %v2977_v20 = vpop.permute.xlu1 %282 }
 0x100   :  { %v2979_v48 = vpop.permute.xlu0 %261 }
 0x103   :  { %v2981_v57 = vpop.permute.xlu1 %288 }
 0x104   :  { %v2983_v35 = vpop.permute.xlu0 %267 }
 0x107   :  { %v2987_v54 = vpop.permute.xlu1 %294 }
 0x108   :  { %v2985_v59 = vpop.permute.xlu0 %273  ;;  %4023 = vst [vmem:[#allocation75_spill] sm:$0xff] %v2987_v54  ;;  %v3079_v54 = vld [vmem:[#allocation5 + $0xb8] sm:$0xff] }
 0x10b   :  { %v2991_v43 = vpop.permute.xlu1 %300 }
 0x10c   :  { %v2989_v1 = vpop.permute.xlu0 %279  ;;  %4024 = vst [vmem:[#allocation76_spill] sm:$0xff] %v2991_v43 }
 0x10f   :  { %v2997_v33 = vpop.permute.xlu1 %306 }
 0x110   :  { %v2993_v49 = vpop.permute.xlu0 %285  ;;  %4025 = vst [vmem:[#allocation77_spill] sm:$0xff] %v2997_v33 }
 0x113   :  { %v3001_v25 = vpop.permute.xlu1 %312 }
 0x114   :  { %v2995_v15 = vpop.permute.xlu0 %291  ;;  %4027 = vst [vmem:[#allocation79_spill] sm:$0xff] %v3001_v25 }
 0x117   :  { %v3007_v61 = vpop.permute.xlu1 %318 }
 0x118   :  { %v2999_v9 = vpop.permute.xlu0 %297  ;;  %4030 = vst [vmem:[#allocation82_spill] sm:$0xff] %v3007_v61 }
 0x119   :  { %4026 = vst [vmem:[#allocation78_spill] sm:$0xff] %v2999_v9  ;;  %v3073_v9 = vld [vmem:[#allocation5 + $0xb0] sm:$0xff] }
 0x11c   :  { %v3003_v51 = vpop.permute.xlu0 %303 }
 0x11d   :  { %4028 = vst [vmem:[#allocation80_spill] sm:$0xff] %v3003_v51 }
 0x120   :  { %v3005_v2 = vpop.permute.xlu0 %309 }
 0x121   :  { %4029 = vst [vmem:[#allocation81_spill] sm:$0xff] %v3005_v2 }
 0x124   :  { %v3009_v41 = vpop.permute.xlu0 %315 }
 0x125   :  { %4031 = vst [vmem:[#allocation83_spill] sm:$0xff] %v3009_v41 }
 0x126   :  { %v970_v17 = vpop.permute.xlu1 %969 }
 0x127   :  { %v1127_v53 = vsub.f32 %v3011_v58, %v970_v17  ;;  %v1128_v7 = vsub.f32 %v2336_v5, %v970_v17  ;;  %v3024_v5 = vld [vmem:[#allocation5 + $0x28] sm:$0xff] }
 0x128   :  { %v975_v63 = vpop.permute.xlu0 %974 }
 0x129   :  { %v1191_v50 = vmul.f32 1.442695, %v1127_v53  ;;  %v1193_v45 = vmul.f32 1.442695, %v1128_v7  ;;  %v1129_v55 = vsub.f32 %v3015_v60, %v975_v63  ;;  %v1130_v37 = vsub.f32 %v3018_v42, %v975_v63 }
 0x12a   :  { %v980_v52 = vpop.permute.xlu1 %979 }
 0x12b   :  { %1902 = vpow2.f32 %v1191_v50  ;;  %v1195_v47 = vmul.f32 1.442695, %v1129_v55  ;;  %v1197_v44 = vmul.f32 1.442695, %v1130_v37  ;;  %v1131_v34 = vsub.f32 %v3021_v39, %v980_v52 }
 0x12c   :  { %1904 = vpow2.f32 %v1193_v45  ;;  %v1132_v53 = vsub.f32 %v3024_v5, %v980_v52  ;;  %v990_v7 = vpop.permute.xlu0 %989 }
 0x12d   :  { %1906 = vpow2.f32 %v1195_v47  ;;  %v1199_v17 = vmul.f32 1.442695, %v1131_v34  ;;  %v1135_v63 = vsub.f32 %v3027_v27, %v990_v7  ;;  %v1136_v37 = vsub.f32 %v3030_v36, %v990_v7  ;;  %v3036_v34 = vld [vmem:[#allocation5 + $0x38] sm:$0xff] }
 0x12e   :  { %1908 = vpow2.f32 %v1197_v44  ;;  %v1201_v50 = vmul.f32 1.442695, %v1132_v53  ;;  %v985_v55 = vpop.permute.xlu1 %984  ;;  %v3042_v53 = vld [vmem:[#allocation5 + $0x68] sm:$0xff] }
 0x12f   :  { %1910 = vpow2.f32 %v1199_v17  ;;  %v1207_v45 = vmul.f32 1.442695, %v1135_v63  ;;  %v1209_v31 = vmul.f32 1.442695, %v1136_v37  ;;  %v1133_v52 = vsub.f32 %v3033_v24, %v985_v55 }
 0x130   :  { %1912 = vpow2.f32 %v1201_v50  ;;  %v1134_v47 = vsub.f32 %v3036_v34, %v985_v55  ;;  %v1000_v19 = vpop.permute.xlu0 %999 }
 0x131   :  { %1914 = vpow2.f32 %v1207_v45  ;;  %v1203_v26 = vmul.f32 1.442695, %v1133_v52  ;;  %v1139_v44 = vsub.f32 %v3039_v21, %v1000_v19  ;;  %v1140_v7 = vsub.f32 %v3042_v53, %v1000_v19  ;;  %v3048_v45 = vld [vmem:[#allocation5 + $0x58] sm:$0xff]  ;;  %v3051_v19 = vld [vmem:[#allocation5 + $0x80] sm:$0xff] }
 0x132   :  { %1916 = vpow2.f32 %v1209_v31  ;;  %v1205_v17 = vmul.f32 1.442695, %v1134_v47  ;;  %v995_v63 = vpop.permute.xlu1 %994 }
 0x133   :  { %1918 = vpow2.f32 %v1203_v26  ;;  %v1215_v37 = vmul.f32 1.442695, %v1139_v44  ;;  %v1217_v50 = vmul.f32 1.442695, %v1140_v7  ;;  %v1137_v55 = vsub.f32 %v3045_v16, %v995_v63  ;;  %v3054_v26 = vld [vmem:[#allocation5 + $0x88] sm:$0xff] }
 0x134   :  { %1920 = vpow2.f32 %v1205_v17  ;;  %v1138_v52 = vsub.f32 %v3048_v45, %v995_v63  ;;  %v1010_v11 = vpop.permute.xlu0 %1009 }
 0x135   :  { %v1903_v18 = vpop.eup %1902  ;;  %1922 = vpow2.f32 %v1215_v37  ;;  %v1211_v13 = vmul.f32 1.442695, %v1137_v55  ;;  %v1143_v31 = vsub.f32 %v3051_v19, %v1010_v11  ;;  %v1144_v47 = vsub.f32 %v3054_v26, %v1010_v11 }
 0x136   :  { %v1905_v44 = vpop.eup %1904  ;;  %1924 = vpow2.f32 %v1217_v50  ;;  %v1213_v7 = vmul.f32 1.442695, %v1138_v52  ;;  %v1005_v17 = vpop.permute.xlu1 %1004 }
 0x137   :  { %v1907_v8 = vpop.eup %1906  ;;  %1926 = vpow2.f32 %v1211_v13  ;;  %v1223_v3 = vmul.f32 1.442695, %v1143_v31  ;;  %v1225_v63 = vmul.f32 1.442695, %v1144_v47  ;;  %v1141_v10 = vsub.f32 %v2371_v28, %v1005_v17  ;;  %v3059_v47 = vld [vmem:[#allocation5 + $0x90] sm:$0xff] }
 0x138   :  { %v1909_v37 = vpop.eup %1908  ;;  %1928 = vpow2.f32 %v1213_v7  ;;  %v1142_v55 = vsub.f32 %v2373_v29, %v1005_v17  ;;  %v1319_v4 = vadd.f32 %v1905_v44, %v1903_v18  ;;  %v223_v13 = vlaneseq  ;;  %v1020_v31 = vpop.permute.xlu0 %1019  ;;  %v3062_v29 = vld [vmem:[#allocation5 + $0x98] sm:$0xff] }
 0x139   :  { %v1911_v61 = vpop.eup %1910  ;;  %1930 = vpow2.f32 %v1223_v3  ;;  %v1219_v41 = vmul.f32 1.442695, %v1141_v10  ;;  %v1322_v50 = vadd.f32 %v1909_v37, %v1907_v8  ;;  %v3065_v8 = vld [vmem:[#allocation5 + $0xa0] sm:$0xff]  ;;  %v3070_v37 = vld [vmem:[#allocation5 + $0xa8] sm:$0xff] }
 0x13a   :  { %v1913_v25 = vpop.eup %1912  ;;  %1932 = vpow2.f32 %v1225_v63  ;;  %v1221_v11 = vmul.f32 1.442695, %v1142_v55  ;;  %1320 = vadd.xlane.f32.xlu0 %v1319_v4  ;;  %v1015_v52 = vpop.permute.xlu1 %1014  ;;  %v1147_v44 = vsub.f32 %v3065_v8, %v1020_v31  ;;  %v3068_v63 = vand.u32 127, %v223_v13 }
 0x13b   :  { %v1915_v2 = vpop.eup %1914  ;;  %1934 = vpow2.f32 %v1219_v41  ;;  %v1145_v28 = vsub.f32 %v3059_v47, %v1015_v52  ;;  %1323 = vadd.xlane.f32.xlu1 %v1322_v50  ;;  %v1146_v3 = vsub.f32 %v3062_v29, %v1015_v52  ;;  %v1325_v10 = vadd.f32 %v1913_v25, %v1911_v61 }
 0x13c   :  { %v1917_v7 = vpop.eup %1916  ;;  %1936 = vpow2.f32 %v1221_v11  ;;  %v1148_v55 = vsub.f32 %v3070_v37, %v1020_v31  ;;  %v1231_v43 = vmul.f32 1.442695, %v1147_v44  ;;  %vm326_vm1 = vcmp.eq.s32.totalorder %v3068_v63, %v2959_v22 }
 0x13d   :  { %v1919_v18 = vpop.eup %1918  ;;  %v1227_v41 = vmul.f32 1.442695, %v1145_v28  ;;  %v1229_v11 = vmul.f32 1.442695, %v1146_v3  ;;  %v1331_v52 = vadd.f32 %v1917_v7, %v1915_v2  ;;  %v1030_v3 = vpop.permute.xlu0 %1029  ;;  %vm328_vm3 = vcmp.eq.s32.totalorder %v3068_v63, %v2963_v32 }
 0x13e   :  { %v1921_v4 = vpop.eup %1920  ;;  %1326 = vadd.xlane.f32.xlu0 %v1325_v10  ;;  %v1025_v50 = vpop.permute.xlu1 %1024  ;;  %v3077_v10 = vadd.s32 128, %v3068_v63  ;;  %v1233_v31 = vmul.f32 1.442695, %v1148_v55  ;;  %v3090_v55 = vld [vmem:[#allocation5 + $0xc0] sm:$0xff]  ;;  %vm330_vm5 = vcmp.eq.s32.totalorder %v3068_v63, %v2926_v56  ;;  %vm332_vm7 = vcmp.eq.s32.totalorder %v3068_v63, %v2942_v46 }
 0x13f   :  { %v1923_v17 = vpop.eup %1922  ;;  %v1328_v61 = vadd.f32 %v1921_v4, %v1919_v18  ;;  %1938 = vpow2.f32 %v1227_v41  ;;  %v1149_v28 = vsub.f32 %v3073_v9, %v1025_v50  ;;  %v1150_v2 = vsub.f32 %v3079_v54, %v1025_v50 }
 0x140   :  { %v1925_v33 = vpop.eup %1924  ;;  %1940 = vpow2.f32 %v1229_v11  ;;  %vm327_vm2 = vcmp.eq.s32.totalorder %v3077_v10, %v2959_v22  ;;  %vm329_vm4 = vcmp.eq.s32.totalorder %v3077_v10, %v2963_v32  ;;  %vm331_vm6 = vcmp.eq.s32.totalorder %v3077_v10, %v2926_v56 }
 0x141   :  { %v1927_v25 = vpop.eup %1926  ;;  %1329 = vadd.xlane.f32.xlu1 %v1328_v61  ;;  %v1337_v18 = vadd.f32 %v1925_v33, %v1923_v17  ;;  %1942 = vpow2.f32 %v1231_v43  ;;  %v1151_v33 = vsub.f32 %v3090_v55, %v1030_v3  ;;  %v3093_v17 = vld [vmem:[#allocation5 + $0xc8] sm:$0xff]  ;;  %v1237_v50 = vmul.f32 1.442695, %v1150_v2 }
 0x142   :  { %v1929_v51 = vpop.eup %1928  ;;  %1332 = vadd.xlane.f32.xlu0 %v1331_v52  ;;  %1944 = vpow2.f32 %v1233_v31  ;;  %v1152_v11 = vsub.f32 %v3093_v17, %v1030_v3  ;;  %v1035_v52 = vpop.permute.xlu1 %1034  ;;  %v390_v43 = vsel %vm326_vm1, %v3011_v58, 0.0  ;;  %v392_v3 = vsel %vm328_vm3, %v3015_v60, 0.0  ;;  %v3115_v58 = vld [vmem:[#allocation5 + $0xd0] sm:$0xff]  ;;  %v3118_v60 = vld [vmem:[#allocation5 + $0xd8] sm:$0xff] }
 0x143   :  { %v1931_v13 = vpop.eup %1930  ;;  %v1334_v4 = vadd.f32 %v1929_v51, %v1927_v25  ;;  %v1235_v51 = vmul.f32 1.442695, %v1149_v28  ;;  %v2181_v28 = vld [vmem:[#allocation5 + $0x8] sm:$0xff]  ;;  %v1239_v2 = vmul.f32 1.442695, %v1151_v33  ;;  %v1153_v22 = vsub.f32 %v3115_v58, %v1035_v52 }
 0x144   :  { %v1933_v7 = vpop.eup %1932  ;;  %v391_v31 = vsel %vm327_vm2, %v2181_v28, 0.0  ;;  %v394_v33 = vsel %vm330_vm5, %v3021_v39, 0.0  ;;  %vm333_vm8 = vcmp.eq.s32.totalorder %v3077_v10, %v2942_v46  ;;  %v3136_v39 = vld [vmem:[#allocation5 + $0xe8] sm:$0xff]  ;;  %vm334_vm9 = vcmp.eq.s32.totalorder %v3068_v63, %v2967_v30 }
 0x145   :  { %v1935_v44 = vpop.eup %1934  ;;  %1335 = vadd.xlane.f32.xlu1 %v1334_v4  ;;  %v1343_v61 = vadd.f32 %v1933_v7, %v1931_v13  ;;  %v393_v13 = vsel %vm329_vm4, %v3018_v42, 0.0  ;;  %1946 = vpow2.f32 %v1235_v51  ;;  %v1241_v7 = vmul.f32 1.442695, %v1152_v11  ;;  %v3133_v11 = vld [vmem:[#allocation5 + $0xe0] sm:$0xff] }
 0x146   :  { %v1937_v41 = vpop.eup %1936  ;;  %1338 = vadd.xlane.f32.xlu0 %v1337_v18  ;;  %1948 = vpow2.f32 %v1237_v50  ;;  %v1040_v18 = vpop.permute.xlu0 %1039  ;;  %v1154_v4 = vsub.f32 %v3118_v60, %v1035_v52  ;;  %v457_v42 = vadd.f32 %v393_v13, %v392_v3  ;;  %v395_v51 = vsel %vm331_vm6, %v3024_v5, 0.0 }
 0x147   :  { %v1340_v25 = vadd.f32 %v1937_v41, %v1935_v44  ;;  %v454_v44 = vadd.f32 %v391_v31, %v390_v43  ;;  %1950 = vpow2.f32 %v1239_v2  ;;  %v1155_v50 = vsub.f32 %v3133_v11, %v1040_v18 }
 0x148   :  { %v1243_v52 = vmul.f32 1.442695, %v1153_v22  ;;  %1952 = vpow2.f32 %v1241_v7  ;;  %v1156_v56 = vsub.f32 %v3136_v39, %v1040_v18  ;;  %v1245_v5 = vmul.f32 1.442695, %v1154_v4  ;;  %v3151_v22 = vld [vmem:[#allocation5 + $0xf0] sm:$0xff]  ;;  %v3154_v4 = vld [vmem:[#allocation5 + $0xf8] sm:$0xff] }
 0x149   :  { %1344 = vadd.xlane.f32.xlu1 %v1343_v61  ;;  %v1939_v32 = vpop.eup %1938  ;;  %v1045_v61 = vpop.permute.xlu1 %1044  ;;  %v460_v43 = vadd.f32 %v395_v51, %v394_v33  ;;  %v396_v3 = vsel %vm332_vm7, %v3033_v24, 0.0  ;;  %v397_v13 = vsel %vm333_vm8, %v3036_v34, 0.0  ;;  %vm335_vm10 = vcmp.eq.s32.totalorder %v3077_v10, %v2967_v30  ;;  %v3169_v51 = vld [vmem:[#allocation5 + $0x100] sm:$0xff] }
 0x14a   :  { %1341 = vadd.xlane.f32.xlu0 %v1340_v25  ;;  %v1941_v41 = vpop.eup %1940  ;;  %v1247_v2 = vmul.f32 1.442695, %v1155_v50  ;;  %1954 = vpow2.f32 %v1243_v52  ;;  %v1157_v7 = vsub.f32 %v3151_v22, %v1045_v61  ;;  %v1249_v24 = vmul.f32 1.442695, %v1156_v56  ;;  %v1050_v18 = vpop.permute.xlu0 %1049  ;;  %v3172_v56 = vld [vmem:[#allocation5 + $0x108] sm:$0xff] }
 0x14b   :  { %v1943_v25 = vpop.eup %1942  ;;  %v1346_v28 = vadd.f32 %v1941_v41, %v1939_v32  ;;  %1956 = vpow2.f32 %v1245_v5  ;;  %v1158_v46 = vsub.f32 %v3154_v4, %v1045_v61  ;;  %v463_v32 = vadd.f32 %v397_v13, %v396_v3  ;;  %v3187_v13 = vld [vmem:[#allocation5 + $0x110] sm:$0xff] }
 0x14c   :  { %v1945_v31 = vpop.eup %1944  ;;  %vm336_vm11 = vcmp.eq.s32.totalorder %v3068_v63, %v2952_v62  ;;  %v398_v41 = vsel %vm334_vm9, %v3027_v27, 0.0  ;;  %v399_v33 = vsel %vm335_vm10, %v3030_v36, 0.0  ;;  %vm337_vm12 = vcmp.eq.s32.totalorder %v3077_v10, %v2952_v62 }
 0x14d   :  { %458 = vadd.xlane.f32.xlu1 %v457_v42  ;;  %v1349_v42 = vadd.f32 %v1945_v31, %v1943_v25  ;;  %1958 = vpow2.f32 %v1247_v2  ;;  %v1159_v50 = vsub.f32 %v3169_v51, %v1050_v18  ;;  %v1251_v52 = vmul.f32 1.442695, %v1157_v7  ;;  %v1055_v61 = vpop.permute.xlu1 %1054 }
 0x14e   :  { %455 = vadd.xlane.f32.xlu0 %v454_v44  ;;  %1960 = vpow2.f32 %v1249_v24  ;;  %v1160_v27 = vsub.f32 %v3172_v56, %v1050_v18  ;;  %v1253_v5 = vmul.f32 1.442695, %v1158_v46  ;;  %v466_v36 = vadd.f32 %v399_v33, %v398_v41  ;;  %v1060_v7 = vpop.permute.xlu0 %1059  ;;  %v3190_v24 = vld [vmem:[#allocation5 + $0x118] sm:$0xff] }
 0x14f   :  { %v1947_v34 = vpop.eup %1946  ;;  %v401_v31 = vsel %vm337_vm12, %v3048_v45, 0.0  ;;  %vm338_vm13 = vcmp.eq.s32.totalorder %v3068_v63, %v2971_v0  ;;  %vm339_vm14 = vcmp.eq.s32.totalorder %v3077_v10, %v2971_v0  ;;  %v1255_v3 = vmul.f32 1.442695, %v1159_v50  ;;  %v3208_v50 = vld [vmem:[#allocation5 + $0x128] sm:$0xff] }
 0x150   :  { %v1949_v44 = vpop.eup %1948  ;;  %1962 = vpow2.f32 %v1251_v52  ;;  %v1161_v2 = vsub.f32 %v3187_v13, %v1055_v61  ;;  %v1162_v62 = vsub.f32 %v3190_v24, %v1055_v61  ;;  %vm340_vm15 = vcmp.eq.s32.totalorder %v3068_v63, %v2957_v40 }
 0x151   :  { %461 = vadd.xlane.f32.xlu1 %v460_v43  ;;  %v1951_v30 = vpop.eup %1950  ;;  %v1352_v25 = vadd.f32 %v1949_v44, %v1947_v34  ;;  %1964 = vpow2.f32 %v1253_v5  ;;  %vm341_vm1 = vcmp.eq.s32.totalorder %v3077_v10, %v2957_v40  ;;  %v3205_v44 = vld [vmem:[#allocation5 + $0x120] sm:$0xff]  ;;  %vm342_vm2 = vcmp.eq.s32.totalorder %v3068_v63, %v2975_v6 }
 0x152   :  { %1347 = vadd.xlane.f32.xlu0 %v1346_v28  ;;  %v1953_v43 = vpop.eup %1952  ;;  %v400_v28 = vsel %vm336_vm11, %v3045_v16, 0.0  ;;  %v1257_v16 = vmul.f32 1.442695, %v1160_v27  ;;  %1966 = vpow2.f32 %v1255_v3  ;;  %v1163_v41 = vsub.f32 %v3205_v44, %v1060_v7  ;;  %v1065_v27 = vpop.permute.xlu1 %1064 }
 0x153   :  { %v469_v18 = vadd.f32 %v401_v31, %v400_v28  ;;  %v1355_v46 = vadd.f32 %v1953_v43, %v1951_v30  ;;  %v1259_v33 = vmul.f32 1.442695, %v1161_v2  ;;  %v1261_v52 = vmul.f32 1.442695, %v1162_v62  ;;  %v2194_v30 = vld [vmem:[#allocation5 + $0x70] sm:$0xff] }
 0x154   :  { %v1955_v45 = vpop.eup %1954  ;;  %1968 = vpow2.f32 %v1257_v16  ;;  %vm343_vm3 = vcmp.eq.s32.totalorder %v3077_v10, %v2975_v6  ;;  %v1263_v28 = vmul.f32 1.442695, %v1163_v41  ;;  %v3221_v31 = vld [vmem:[#allocation5 + $0x130] sm:$0xff]  ;;  %v1070_v16 = vpop.permute.xlu0 %1069  ;;  %vm344_vm4 = vcmp.eq.s32.totalorder %v3068_v63, %v2961_v12 }
 0x155   :  { %464 = vadd.xlane.f32.xlu1 %v463_v32  ;;  %v1957_v34 = vpop.eup %1956  ;;  %v402_v32 = vsel %vm338_vm13, %v3039_v21, 0.0  ;;  %v1164_v21 = vsub.f32 %v3208_v50, %v1060_v7  ;;  %1970 = vpow2.f32 %v1259_v33  ;;  %v1165_v3 = vsub.f32 %v3221_v31, %v1065_v27  ;;  %v3224_v7 = vld [vmem:[#allocation5 + $0x138] sm:$0xff] }
 0x156   :  { %1350 = vadd.xlane.f32.xlu0 %v1349_v42  ;;  %v403_v42 = vsel %vm339_vm14, %v3042_v53, 0.0  ;;  %v1358_v5 = vadd.f32 %v1957_v34, %v1955_v45  ;;  %1972 = vpow2.f32 %v1261_v52  ;;  %v1166_v40 = vsub.f32 %v3224_v7, %v1065_v27  ;;  %v1075_v27 = vpop.permute.xlu1 %1074 }
 0x157   :  { %v1959_v0 = vpop.eup %1958  ;;  %v472_v53 = vadd.f32 %v403_v42, %v402_v32  ;;  %v1265_v2 = vmul.f32 1.442695, %v1164_v21  ;;  %v406_v34 = vsel %vm342_vm2, %v3051_v19, 0.0  ;;  %v407_v32 = vsel %vm343_vm3, %v3054_v26, 0.0  ;;  %v3239_v42 = vld [vmem:[#allocation5 + $0x140] sm:$0xff]  ;;  %v3242_v21 = vld [vmem:[#allocation5 + $0x148] sm:$0xff] }
 0x158   :  { %v1961_v61 = vpop.eup %1960  ;;  %vm345_vm5 = vcmp.eq.s32.totalorder %v3077_v10, %v2961_v12  ;;  %1974 = vpow2.f32 %v1263_v28  ;;  %v1167_v41 = vsub.f32 %v3239_v42, %v1070_v16  ;;  %v1267_v33 = vmul.f32 1.442695, %v1165_v3  ;;  %v3260_v28 = vld [vmem:[#allocation5 + $0x158] sm:$0xff] }
 0x159   :  { %467 = vadd.xlane.f32.xlu1 %v466_v36  ;;  %v404_v36 = vsel %vm340_vm15, %v2194_v30, 0.0  ;;  %1976 = vpow2.f32 %v1265_v2  ;;  %v1168_v19 = vsub.f32 %v3242_v21, %v1070_v16  ;;  %v1269_v52 = vmul.f32 1.442695, %v1166_v40 }
 0x15a   :  { %1353 = vadd.xlane.f32.xlu0 %v1352_v25  ;;  %v2195_v25 = vld [vmem:[#allocation5 + $0x78] sm:$0xff]  ;;  %v1963_v62 = vpop.eup %1962  ;;  %v478_v26 = vadd.f32 %v407_v32, %v406_v34  ;;  %vm346_vm6 = vcmp.eq.s32.totalorder %v3068_v63, %v2979_v48  ;;  %vm347_vm7 = vcmp.eq.s32.totalorder %v3077_v10, %v2979_v48  ;;  %v1271_v30 = vmul.f32 1.442695, %v1167_v41  ;;  %v3278_v34 = vld [vmem:[#allocation5 + $0x168] sm:$0xff]  ;;  %v1085_v41 = vpop.permute.xlu1 %1084 }
 0x15b   :  { %v405_v43 = vsel %vm341_vm1, %v2195_v25, 0.0  ;;  %1978 = vpow2.f32 %v1267_v33  ;;  %v1170_v12 = vsub.f32 %v3260_v28, %v1075_v27  ;;  %vm348_vm8 = vcmp.eq.s32.totalorder %v3068_v63, %v2965_v38 }
 0x15c   :  { %v475_v45 = vadd.f32 %v405_v43, %v404_v36  ;;  %v3257_v36 = vld [vmem:[#allocation5 + $0x150] sm:$0xff]  ;;  %1980 = vpow2.f32 %v1269_v52  ;;  %v1080_v43 = vpop.permute.xlu0 %1079  ;;  %v410_v40 = vsel %vm346_vm6, %v3065_v8, 0.0  ;;  %vm349_vm9 = vcmp.eq.s32.totalorder %v3077_v10, %v2965_v38 }
 0x15d   :  { %470 = vadd.xlane.f32.xlu1 %v469_v18  ;;  %v1361_v18 = vadd.f32 %v1961_v61, %v1959_v0  ;;  %v409_v61 = vsel %vm345_vm5, %v3062_v29, 0.0  ;;  %v1169_v25 = vsub.f32 %v3257_v36, %v1075_v27  ;;  %1982 = vpow2.f32 %v1271_v30 }
 0x15e   :  { %1356 = vadd.xlane.f32.xlu0 %v1355_v46  ;;  %v1965_v46 = vpop.eup %1964  ;;  %v1172_v8 = vsub.f32 %v3278_v34, %v1080_v43  ;;  %v1277_v32 = vmul.f32 1.442695, %v1170_v12  ;;  %v412_v52 = vsel %vm348_vm8, %v3073_v9, 0.0  ;;  %v413_v27 = vsel %vm349_vm9, %v3079_v54, 0.0  ;;  %v3311_v12 = vld [vmem:[#allocation5 + $0x180] sm:$0xff] }
 0x15f   :  { %v1967_v6 = vpop.eup %1966  ;;  %v1364_v0 = vadd.f32 %v1965_v46, %v1963_v62  ;;  %v411_v62 = vsel %vm347_vm7, %v3070_v37, 0.0  ;;  %v1275_v46 = vmul.f32 1.442695, %v1169_v25  ;;  %vm350_vm10 = vcmp.eq.s32.totalorder %v3068_v63, %v2983_v35 }
 0x160   :  { %v484_v37 = vadd.f32 %v411_v62, %v410_v40  ;;  %vm351_vm11 = vcmp.eq.s32.totalorder %v3077_v10, %v2983_v35  ;;  %v1281_v9 = vmul.f32 1.442695, %v1172_v8  ;;  %vm352_vm12 = vcmp.eq.s32.totalorder %v3068_v63, %v2969_v14  ;;  %v1095_v40 = vpop.permute.xlu1 %1094 }
 0x161   :  { %473 = vadd.xlane.f32.xlu1 %v472_v53  ;;  %v1969_v53 = vpop.eup %1968  ;;  %vm353_vm13 = vcmp.eq.s32.totalorder %v3077_v10, %v2969_v14  ;;  %vm354_vm14 = vcmp.eq.s32.totalorder %v3068_v63, %v2985_v59  ;;  %vm355_vm15 = vcmp.eq.s32.totalorder %v3077_v10, %v2985_v59  ;;  %vm356_vm1 = vcmp.eq.s32.totalorder %v3068_v63, %v2973_v23 }
 0x162   :  { %1359 = vadd.xlane.f32.xlu0 %v1358_v5  ;;  %v408_v5 = vsel %vm344_vm4, %v3059_v47, 0.0  ;;  %v1273_v47 = vmul.f32 1.442695, %v1168_v19  ;;  %v1971_v29 = vpop.eup %1970  ;;  %v1367_v2 = vadd.f32 %v1969_v53, %v1967_v6  ;;  %v1090_v53 = vpop.permute.xlu0 %1089  ;;  %v417_v8 = vsel %vm353_vm13, %v3118_v60, 0.0 }
 0x163   :  { %v481_v3 = vadd.f32 %v409_v61, %v408_v5  ;;  %v1973_v16 = vpop.eup %1972  ;;  %v3296_v5 = vld [vmem:[#allocation5 + $0x178] sm:$0xff]  ;;  %v487_v61 = vadd.f32 %v413_v27, %v412_v52  ;;  %vm357_vm2 = vcmp.eq.s32.totalorder %v3077_v10, %v2973_v23  ;;  %vm358_vm3 = vcmp.eq.s32.totalorder %v3068_v63, %v2989_v1 }
 0x164   :  { %1984 = vpow2.f32 %v1273_v47  ;;  %v1975_v48 = vpop.eup %1974  ;;  %v1370_v33 = vadd.f32 %v1973_v16, %v1971_v29  ;;  %v1174_v38 = vsub.f32 %v3296_v5, %v1085_v41  ;;  %v414_v47 = vsel %vm350_vm10, %v3090_v55, 0.0 }
 0x165   :  { %476 = vadd.xlane.f32.xlu1 %v475_v45  ;;  %v3275_v45 = vld [vmem:[#allocation5 + $0x160] sm:$0xff]  ;;  %v1977_v19 = vpop.eup %1976  ;;  %1986 = vpow2.f32 %v1275_v46  ;;  %v1175_v29 = vsub.f32 %v3311_v12, %v1090_v53  ;;  %v416_v46 = vsel %vm352_vm12, %v3115_v58, 0.0  ;;  %vm359_vm4 = vcmp.eq.s32.totalorder %v3077_v10, %v2989_v1 }
 0x166   :  { %1362 = vadd.xlane.f32.xlu0 %v1361_v18  ;;  %v1171_v18 = vsub.f32 %v3275_v45, %v1080_v43  ;;  %1988 = vpow2.f32 %v1277_v32  ;;  %v1979_v54 = vpop.eup %1978  ;;  %v1373_v30 = vadd.f32 %v1977_v19, %v1975_v48  ;;  %v415_v43 = vsel %vm351_vm11, %v3093_v17, 0.0 }
 0x167   :  { %v1981_v25 = vpop.eup %1980  ;;  %v1285_v16 = vmul.f32 1.442695, %v1174_v38  ;;  %v490_v17 = vadd.f32 %v415_v43, %v414_v47  ;;  %v1287_v32 = vmul.f32 1.442695, %v1175_v29  ;;  %v493_v19 = vadd.f32 %v417_v8, %v416_v46 }
 0x168   :  { %v1279_v6 = vmul.f32 1.442695, %v1171_v18  ;;  %v1983_v35 = vpop.eup %1982  ;;  %v1376_v62 = vadd.f32 %v1981_v25, %v1979_v54  ;;  %v3350_v54 = vld [vmem:[#allocation5 + $0x1a8] sm:$0xff]  ;;  %v420_v43 = vsel %vm356_vm1, %v3151_v22, 0.0  ;;  %v421_v29 = vsel %vm357_vm2, %v3154_v4, 0.0 }
 0x169   :  { %479 = vadd.xlane.f32.xlu1 %v478_v26  ;;  %v3293_v26 = vld [vmem:[#allocation5 + $0x170] sm:$0xff]  ;;  %vm360_vm5 = vcmp.eq.s32.totalorder %v3068_v63, %v2977_v20  ;;  %v422_v46 = vsel %vm358_vm3, %v3169_v51, 0.0  ;;  %v423_v8 = vsel %vm359_vm4, %v3172_v56, 0.0  ;;  %vm361_vm6 = vcmp.eq.s32.totalorder %v3077_v10, %v2977_v20 }
 0x16a   :  { %1365 = vadd.xlane.f32.xlu0 %v1364_v0  ;;  %v1173_v0 = vsub.f32 %v3293_v26, %v1085_v41  ;;  %1990 = vpow2.f32 %v1279_v6  ;;  %v3329_v41 = vld [vmem:[#allocation5 + $0x190] sm:$0xff]  ;;  %v418_v6 = vsel %vm354_vm14, %v3133_v11, 0.0  ;;  %v502_v56 = vadd.f32 %v423_v8, %v422_v46 }
 0x16b   :  { %1992 = vpow2.f32 %v1281_v9  ;;  %v1177_v48 = vsub.f32 %v3329_v41, %v1095_v40  ;;  %v3347_v9 = vld [vmem:[#allocation5 + $0x1a0] sm:$0xff]  ;;  %vm362_vm7 = vcmp.eq.s32.totalorder %v3068_v63, %v2993_v49  ;;  %vm363_vm8 = vcmp.eq.s32.totalorder %v3077_v10, %v2993_v49  ;;  %v3437_v46 = vld [vmem:[#allocation5 + $0x1f0] sm:$0xff] }
 0x16c   :  { %vm364_vm9 = vcmp.eq.s32.totalorder %v3068_v63, %v2981_v57  ;;  %vm365_vm10 = vcmp.eq.s32.totalorder %v3077_v10, %v2981_v57  ;;  %vm366_vm11 = vcmp.eq.s32.totalorder %v3068_v63, %v2995_v15  ;;  %vm367_vm12 = vcmp.eq.s32.totalorder %v3077_v10, %v2995_v15 }
 0x16d   :  { %482 = vadd.xlane.f32.xlu1 %v481_v3  ;;  %v1283_v3 = vmul.f32 1.442695, %v1173_v0  ;;  %v419_v0 = vsel %vm355_vm15, %v3136_v39, 0.0  ;;  %v1291_v38 = vmul.f32 1.442695, %v1177_v48 }
 0x16e   :  { %1368 = vadd.xlane.f32.xlu0 %v1367_v2  ;;  %v3314_v2 = vld [vmem:[#allocation5 + $0x188] sm:$0xff]  ;;  %v1985_v18 = vpop.eup %1984  ;;  %v496_v39 = vadd.f32 %v419_v0, %v418_v6  ;;  %v425_v6 = vsel %vm361_vm6, %v3190_v24, 0.0 }
 0x16f   :  { %v1176_v55 = vsub.f32 %v3314_v2, %v1090_v53  ;;  %1994 = vpow2.f32 %v1283_v3  ;;  %v1987_v60 = vpop.eup %1986  ;;  %v1379_v52 = vadd.f32 %v1985_v18, %v1983_v35  ;;  %v3368_v35 = vld [vmem:[#allocation5 + $0x1b8] sm:$0xff] }
 0x170   :  { %1996 = vpow2.f32 %v1285_v16  ;;  %v1989_v27 = vpop.eup %1988 }
 0x171   :  { %485 = vadd.xlane.f32.xlu1 %v484_v37  ;;  %v1289_v58 = vmul.f32 1.442695, %v1176_v55  ;;  %v1100_v37 = vpop.permute.xlu0 %1099  ;;  %1998 = vpow2.f32 %v1287_v32  ;;  %v1382_v25 = vadd.f32 %v1989_v27, %v1987_v60  ;;  %v3365_v55 = vld [vmem:[#allocation5 + $0x1b0] sm:$0xff]  ;;  %v3383_v32 = vld [vmem:[#allocation5 + $0x1c0] sm:$0xff]  ;;  %v424_v27 = vsel %vm360_vm5, %v3187_v13, 0.0 }
 0x172   :  { %1371 = vadd.xlane.f32.xlu0 %v1370_v33  ;;  %v3332_v33 = vld [vmem:[#allocation5 + $0x198] sm:$0xff]  ;;  %v1179_v53 = vsub.f32 %v3347_v9, %v1100_v37  ;;  %v1180_v11 = vsub.f32 %v3350_v54, %v1100_v37  ;;  %v3386_v37 = vld [vmem:[#allocation5 + $0x1c8] sm:$0xff] }
 0x173   :  { %v1178_v14 = vsub.f32 %v3332_v33, %v1095_v40  ;;  %2000 = vpow2.f32 %v1289_v58 }
 0x174   :  { %v1991_v59 = vpop.eup %1990  ;;  %v1295_v3 = vmul.f32 1.442695, %v1179_v53  ;;  %2002 = vpow2.f32 %v1291_v38  ;;  %v1297_v22 = vmul.f32 1.442695, %v1180_v11  ;;  %v3401_v53 = vld [vmem:[#allocation5 + $0x1d0] sm:$0xff] }
 0x175   :  { %488 = vadd.xlane.f32.xlu1 %v487_v61  ;;  %v1293_v61 = vmul.f32 1.442695, %v1178_v14  ;;  %v1993_v47 = vpop.eup %1992  ;;  %v1110_v40 = vpop.permute.xlu0 %1109 }
 0x176   :  { %1374 = vadd.xlane.f32.xlu0 %v1373_v30  ;;  %v1105_v30 = vpop.permute.xlu1 %1104  ;;  %v1183_v48 = vsub.f32 %v3383_v32, %v1110_v40  ;;  %v1184_v51 = vsub.f32 %v3386_v37, %v1110_v40 }
 0x177   :  { %v1181_v16 = vsub.f32 %v3365_v55, %v1105_v30  ;;  %2004 = vpow2.f32 %v1293_v61  ;;  %v1182_v23 = vsub.f32 %v3368_v35, %v1105_v30  ;;  %v3404_v61 = vld [vmem:[#allocation5 + $0x1d8] sm:$0xff]  ;;  %v505_v30 = vadd.f32 %v425_v6, %v424_v27 }
 0x178   :  { %2006 = vpow2.f32 %v1295_v3  ;;  %v1303_v0 = vmul.f32 1.442695, %v1183_v48  ;;  %v1305_v13 = vmul.f32 1.442695, %v1184_v51  ;;  %v3440_v48 = vld [vmem:[#allocation5 + $0x1f8] sm:$0xff] }
 0x179   :  { %491 = vadd.xlane.f32.xlu1 %v490_v17  ;;  %v1995_v4 = vpop.eup %1994  ;;  %v499_v17 = vadd.f32 %v421_v29, %v420_v43  ;;  %v1299_v58 = vmul.f32 1.442695, %v1181_v16  ;;  %2008 = vpow2.f32 %v1297_v22  ;;  %v1301_v14 = vmul.f32 1.442695, %v1182_v23  ;;  %v1120_v11 = vpop.permute.xlu0 %1119  ;;  %v3419_v43 = vld [vmem:[#allocation5 + $0x1e0] sm:$0xff]  ;;  %v3422_v16 = vld [vmem:[#allocation5 + $0x1e8] sm:$0xff] }
 0x17a   :  { %1377 = vadd.xlane.f32.xlu0 %v1376_v62  ;;  %v1385_v62 = vadd.f32 %v1993_v47, %v1991_v59  ;;  %v1997_v18 = vpop.eup %1996  ;;  %v1115_v60 = vpop.permute.xlu1 %1114  ;;  %v427_v47 = vsel %vm363_vm8, %v3208_v50, 0.0  ;;  %v1187_v29 = vsub.f32 %v3419_v43, %v1120_v11 }
 0x17b   :  { %v1999_v1 = vpop.eup %1998  ;;  %2010 = vpow2.f32 %v1299_v58  ;;  %v1185_v38 = vsub.f32 %v3401_v53, %v1115_v60  ;;  %v1186_v20 = vsub.f32 %v3404_v61, %v1115_v60  ;;  %v430_v60 = vsel %vm366_vm11, %v3239_v42, 0.0 }
 0x17c   :  { %2012 = vpow2.f32 %v1301_v14 }
 0x17d   :  { %494 = vadd.xlane.f32.xlu1 %v493_v19  ;;  %v1388_v19 = vadd.f32 %v1997_v18, %v1995_v4  ;;  %2014 = vpow2.f32 %v1303_v0  ;;  %v1307_v3 = vmul.f32 1.442695, %v1185_v38  ;;  %v1309_v22 = vmul.f32 1.442695, %v1186_v20 }
 0x17e   :  { %1380 = vadd.xlane.f32.xlu0 %v1379_v52  ;;  %v2001_v52 = vpop.eup %2000  ;;  %2016 = vpow2.f32 %v1305_v13  ;;  %v1125_v40 = vpop.permute.xlu1 %1124  ;;  %v1311_v18 = vmul.f32 1.442695, %v1187_v29 }
 0x17f   :  { %v2003_v24 = vpop.eup %2002  ;;  %v1391_v59 = vadd.f32 %v2001_v52, %v1999_v1  ;;  %2018 = vpow2.f32 %v1307_v3  ;;  %v1189_v8 = vsub.f32 %v3437_v46, %v1125_v40  ;;  %v1190_v57 = vsub.f32 %v3440_v48, %v1125_v40 }
 0x180   :  { %2020 = vpow2.f32 %v1309_v22  ;;  %v431_v1 = vsel %vm367_vm12, %v3242_v21, 0.0  ;;  %v4033_v21 = vld [vmem:[#allocation78_spill] sm:$0xff] }
 0x181   :  { %497 = vadd.xlane.f32.xlu1 %v496_v39  ;;  %v2005_v39 = vpop.eup %2004  ;;  %2022 = vpow2.f32 %v1311_v18  ;;  %v1317_v52 = vmul.f32 1.442695, %v1190_v57  ;;  %v514_v6 = vadd.f32 %v431_v1, %v430_v60  ;;  %vm370_vm15 = vcmp.eq.s32.totalorder %v3068_v63, %v4033_v21 }
 0x182   :  { %1383 = vadd.xlane.f32.xlu0 %v1382_v25  ;;  %v426_v25 = vsel %vm362_vm7, %v3205_v44, 0.0  ;;  %v1188_v44 = vsub.f32 %v3422_v16, %v1120_v11  ;;  %v2007_v49 = vpop.eup %2006  ;;  %v1394_v23 = vadd.f32 %v2005_v39, %v2003_v24  ;;  %vm371_vm1 = vcmp.eq.s32.totalorder %v3077_v10, %v4033_v21 }
 0x183   :  { %v508_v50 = vadd.f32 %v427_v47, %v426_v25  ;;  %v2009_v4 = vpop.eup %2008 }
 0x184   :  { %v1397_v51 = vadd.f32 %v2009_v4, %v2007_v49  ;;  %v4036_v49 = vld [vmem:[#allocation77_spill] sm:$0xff] }
 0x185   :  { %500 = vadd.xlane.f32.xlu1 %v499_v17  ;;  %v428_v17 = vsel %vm364_vm9, %v3221_v31, 0.0  ;;  %v1313_v31 = vmul.f32 1.442695, %v1188_v44  ;;  %v4035_v44 = vld [vmem:[#allocation80_spill] sm:$0xff]  ;;  %vm376_vm6 = vcmp.eq.s32.totalorder %v3068_v63, %v4036_v49  ;;  %vm377_vm7 = vcmp.eq.s32.totalorder %v3077_v10, %v4036_v49 }
 0x186   :  { %1386 = vadd.xlane.f32.xlu0 %v1385_v62  ;;  %v429_v62 = vsel %vm365_vm10, %v3224_v7, 0.0  ;;  %v2011_v7 = vpop.eup %2010  ;;  %vm374_vm4 = vcmp.eq.s32.totalorder %v3068_v63, %v4035_v44  ;;  %vm375_vm5 = vcmp.eq.s32.totalorder %v3077_v10, %v4035_v44 }
 0x187   :  { %v511_v58 = vadd.f32 %v429_v62, %v428_v17  ;;  %v2013_v14 = vpop.eup %2012  ;;  %2024 = vpow2.f32 %v1313_v31  ;;  %v441_v62 = vsel %vm377_vm7, %v3332_v33, 0.0 }
 0x188   :  { %v2015_v27 = vpop.eup %2014  ;;  %v1400_v42 = vadd.f32 %v2013_v14, %v2011_v7  ;;  %v4040_v7 = vld [vmem:[#allocation82_spill] sm:$0xff] }
 0x189   :  { %503 = vadd.xlane.f32.xlu1 %v502_v56  ;;  %v4032_v56 = vld [vmem:[#allocation75_spill] sm:$0xff]  ;;  %v2017_v0 = vpop.eup %2016 }
 0x18a   :  { %1389 = vadd.xlane.f32.xlu0 %v1388_v19  ;;  %vm368_vm13 = vcmp.eq.s32.totalorder %v3068_v63, %v4032_v56  ;;  %vm369_vm14 = vcmp.eq.s32.totalorder %v3077_v10, %v4032_v56  ;;  %v1315_v19 = vmul.f32 1.442695, %v1189_v8  ;;  %v2019_v13 = vpop.eup %2018  ;;  %v1403_v20 = vadd.f32 %v2017_v0, %v2015_v27  ;;  %v4039_v8 = vld [vmem:[#allocation83_spill] sm:$0xff] }
 0x18b   :  { %v432_v38 = vsel %vm368_vm13, %v3257_v36, 0.0  ;;  %v433_v15 = vsel %vm369_vm14, %v3260_v28, 0.0  ;;  %v2021_v24 = vpop.eup %2020  ;;  %v435_v36 = vsel %vm371_vm1, %v3278_v34, 0.0  ;;  %vm382_vm12 = vcmp.eq.s32.totalorder %v3068_v63, %v4039_v8 }
 0x18c   :  { %2026 = vpow2.f32 %v1315_v19  ;;  %v517_v11 = vadd.f32 %v433_v15, %v432_v38  ;;  %v2023_v28 = vpop.eup %2022  ;;  %v1406_v25 = vadd.f32 %v2021_v24, %v2019_v13  ;;  %vm383_vm13 = vcmp.eq.s32.totalorder %v3077_v10, %v4039_v8  ;;  %v4041_v19 = vld [vmem:[#allocation12_spill] sm:$0xff]  ;;  %v4048_v38 = vld [vmem:[#allocation18_spill] sm:$0xff]  ;;  %v4050_v13 = vld [vmem:[#allocation15_spill] sm:$0xff] }
 0x18d   :  { %506 = vadd.xlane.f32.xlu1 %v505_v30  ;;  %2028 = vpow2.f32 %v1317_v52  ;;  %v434_v30 = vsel %vm370_vm15, %v3275_v45, 0.0  ;;  %vm384_vm14 = vcmp.eq.s32.totalorder %v3068_v63, %v4040_v7  ;;  %vm385_vm15 = vcmp.eq.s32.totalorder %v3077_v10, %v4040_v7  ;;  %v4042_v52 = vld [vmem:[#allocation14_spill] sm:$0xff]  ;;  %v905_v8 = vld [vmem:[#allocation3 + $0x10] sm:$0xff] }
 0x18e   :  { %1392 = vadd.xlane.f32.xlu0 %v1391_v59  ;;  %v4034_v59 = vld [vmem:[#allocation76_spill] sm:$0xff]  ;;  %v520_v39 = vadd.f32 %v435_v36, %v434_v30  ;;  %v449_v60 = vsel %vm385_vm15, %v3404_v61, 0.0  ;;  %v4043_v27 = vsub.f32 %v4041_v19, %v4042_v52  ;;  %v4054_v24 = vld [vmem:[#allocation22_spill] sm:$0xff] }
 0x18f   :  { %vm372_vm2 = vcmp.eq.s32.totalorder %v3068_v63, %v4034_v59  ;;  %vm373_vm3 = vcmp.eq.s32.totalorder %v3077_v10, %v4034_v59  ;;  %v4056_v59 = vld [vmem:[#allocation19_spill] sm:$0xff] }
 0x190   :  { %v436_v29 = vsel %vm372_vm2, %v3293_v26, 0.0  ;;  %v437_v3 = vsel %vm373_vm3, %v3296_v5, 0.0  ;;  %v439_v26 = vsel %vm375_vm5, %v3314_v2, 0.0  ;;  %v4037_v5 = vld [vmem:[#allocation81_spill] sm:$0xff] }
 0x191   :  { %509 = vadd.xlane.f32.xlu1 %v508_v50  ;;  %v2025_v47 = vpop.eup %2024  ;;  %v523_v34 = vadd.f32 %v437_v3, %v436_v29  ;;  %v438_v50 = vsel %vm374_vm4, %v3311_v12, 0.0  ;;  %vm378_vm8 = vcmp.eq.s32.totalorder %v3068_v63, %v4037_v5  ;;  %vm379_vm9 = vcmp.eq.s32.totalorder %v3077_v10, %v4037_v5  ;;  %v4038_v12 = vld [vmem:[#allocation79_spill] sm:$0xff]  ;;  %v4060_v29 = vld [vmem:[#allocation26_spill] sm:$0xff]  ;;  %v4065_v5 = vld [vmem:[#allocation28_spill] sm:$0xff] }
 0x192   :  { %1395 = vadd.xlane.f32.xlu0 %v1394_v23  ;;  %v1409_v22 = vadd.f32 %v2025_v47, %v2023_v28  ;;  %v440_v23 = vsel %vm376_vm6, %v3329_v41, 0.0  ;;  %v526_v4 = vadd.f32 %v439_v26, %v438_v50  ;;  %vm380_vm10 = vcmp.eq.s32.totalorder %v3068_v63, %v4038_v12  ;;  %v322_v41 = vpop.permute.xlu0 %321  ;;  %v4057_v28 = vld [vmem:[#allocation21_spill] sm:$0xff]  ;;  %v4059_v47 = vld [vmem:[#allocation24_spill] sm:$0xff] }
 0x193   :  { %v442_v2 = vsel %vm378_vm8, %v3347_v9, 0.0  ;;  %v443_v18 = vsel %vm379_vm9, %v3350_v54, 0.0  ;;  %vm381_vm11 = vcmp.eq.s32.totalorder %v3077_v10, %v4038_v12  ;;  %v444_v33 = vsel %vm380_vm10, %v3365_v55, 0.0  ;;  %v325_v55 = vpop.permute.xlu1 %324 }
 0x194   :  { %v532_v31 = vadd.f32 %v443_v18, %v442_v2  ;;  %v529_v57 = vadd.f32 %v441_v62, %v440_v23  ;;  %v445_v9 = vsel %vm381_vm11, %v3368_v35, 0.0  ;;  %v446_v54 = vsel %vm382_vm12, %v3383_v32, 0.0  ;;  %v4066_v23 = vld [vmem:[#allocation30_spill] sm:$0xff]  ;;  %v904_v62 = vld [vmem:[#allocation3 + $0x8] sm:$0xff] }
 0x195   :  { %512 = vadd.xlane.f32.xlu1 %v511_v58  ;;  %v447_v58 = vsel %vm383_vm13, %v3386_v37, 0.0  ;;  %vm386_vm1 = vcmp.eq.s32.totalorder %v3068_v63, %v322_v41  ;;  %vm387_vm2 = vcmp.eq.s32.totalorder %v3077_v10, %v322_v41  ;;  %v535_v14 = vadd.f32 %v445_v9, %v444_v33 }
 0x196   :  { %1398 = vadd.xlane.f32.xlu0 %v1397_v51  ;;  %v2027_v45 = vpop.eup %2026  ;;  %v538_v51 = vadd.f32 %v447_v58, %v446_v54  ;;  %v448_v35 = vsel %vm384_vm14, %v3401_v53, 0.0  ;;  %v450_v32 = vsel %vm386_vm1, %v3419_v43, 0.0  ;;  %v451_v37 = vsel %vm387_vm2, %v3422_v16, 0.0  ;;  %v4044_v43 = vld [vmem:[#allocation11_spill] sm:$0xff]  ;;  %v4045_v16 = vld [vmem:[#allocation13_spill] sm:$0xff] }
 0x197   :  { %v2029_v40 = vpop.eup %2028  ;;  %vm388_vm3 = vcmp.eq.s32.totalorder %v3068_v63, %v325_v55  ;;  %vm389_vm4 = vcmp.eq.s32.totalorder %v3077_v10, %v325_v55  ;;  %v544_v1 = vadd.f32 %v451_v37, %v450_v32  ;;  %v541_v56 = vadd.f32 %v449_v60, %v448_v35  ;;  %v4047_v10 = vld [vmem:[#allocation16_spill] sm:$0xff]  ;;  %v907_v55 = vld [vmem:[#allocation3 + $0x20] sm:$0xff] }
 0x198   :  { %v1412_v17 = vadd.f32 %v2029_v40, %v2027_v45  ;;  %v452_v53 = vsel %vm388_vm3, %v3437_v46, 0.0  ;;  %v453_v61 = vsel %vm389_vm4, %v3440_v48, 0.0  ;;  %v4049_v15 = vsub.f32 %v4047_v10, %v4048_v38  ;;  %v4053_v48 = vld [vmem:[#allocation20_spill] sm:$0xff]  ;;  %v4063_v40 = vld [vmem:[#allocation25_spill] sm:$0xff]  ;;  %v4069_v60 = vld [vmem:[#allocation34_spill] sm:$0xff] }
 0x199   :  { %515 = vadd.xlane.f32.xlu1 %v514_v6  ;;  %v839_v6 = vmul.f32 1.442695, %v4043_v27  ;;  %v547_v0 = vadd.f32 %v453_v61, %v452_v53  ;;  %v4055_v30 = vsub.f32 %v4053_v48, %v4054_v24  ;;  %v4061_v3 = vsub.f32 %v4059_v47, %v4060_v29  ;;  %v4068_v35 = vld [vmem:[#allocation32_spill] sm:$0xff]  ;;  %v910_v24 = vld [vmem:[#allocation3 + $0x38] sm:$0xff] }
 0x19a   :  { %1401 = vadd.xlane.f32.xlu0 %v1400_v42  ;;  %v4046_v42 = vsub.f32 %v4044_v43, %v4045_v16  ;;  %v843_v21 = vmul.f32 1.442695, %v4049_v15  ;;  %v4070_v32 = vsub.f32 %v4068_v35, %v4069_v60  ;;  %v909_v53 = vld [vmem:[#allocation3 + $0x30] sm:$0xff]  ;;  %v908_v61 = vld [vmem:[#allocation3 + $0x28] sm:$0xff] }
 0x19b   :  { %2030 = vpow2.f32 %v839_v6  ;;  %v845_v36 = vmul.f32 1.442695, %v4055_v30  ;;  %v849_v44 = vmul.f32 1.442695, %v4061_v3  ;;  %v911_v30 = vld [vmem:[#allocation3 + $0x40] sm:$0xff] }
 0x19c   :  { %v841_v63 = vmul.f32 1.442695, %v4046_v42  ;;  %v857_v37 = vmul.f32 1.442695, %v4070_v32  ;;  %v4071_v42 = vld [vmem:[#allocation27_spill] sm:$0xff] }
 0x19d   :  { %518 = vadd.xlane.f32.xlu1 %v517_v11  ;;  %v4051_v11 = vld [vmem:[#allocation17_spill] sm:$0xff] }
 0x19e   :  { %1404 = vadd.xlane.f32.xlu0 %v1403_v20  ;;  %2032 = vpow2.f32 %v841_v63  ;;  %v4052_v20 = vsub.f32 %v4050_v13, %v4051_v11  ;;  %v4072_v63 = vld [vmem:[#allocation29_spill] sm:$0xff] }
 0x19f   :  { %2034 = vpow2.f32 %v843_v21 }
 0x1a0   :  { %v847_v46 = vmul.f32 1.442695, %v4052_v20 }
 0x1a1   :  { %521 = vadd.xlane.f32.xlu1 %v520_v39  ;;  %v4058_v39 = vsub.f32 %v4056_v59, %v4057_v28  ;;  %v4074_v28 = vld [vmem:[#allocation36_spill] sm:$0xff] }
 0x1a2   :  { %1407 = vadd.xlane.f32.xlu0 %v1406_v25  ;;  %2036 = vpow2.f32 %v847_v46 }
 0x1a3   :  { %v851_v25 = vmul.f32 1.442695, %v4058_v39  ;;  %2038 = vpow2.f32 %v845_v36  ;;  %v4075_v39 = vld [vmem:[#allocation38_spill] sm:$0xff] }
 0x1a5   :  { %524 = vadd.xlane.f32.xlu1 %v523_v34  ;;  %v2031_v45 = vpop.eup %2030  ;;  %v903_v34 = vld [vmem:[#allocation3] sm:$0xff]  ;;  %2040 = vpow2.f32 %v851_v25  ;;  %v4076_v25 = vsub.f32 %v4074_v28, %v4075_v39 }
 0x1a6   :  { %1410 = vadd.xlane.f32.xlu0 %v1409_v22  ;;  %v4062_v22 = vld [vmem:[#allocation23_spill] sm:$0xff]  ;;  %2042 = vpow2.f32 %v849_v44  ;;  %v935_v12 = vmul.f32 %v2031_v45, %v903_v34  ;;  %v4087_v28 = vld [vmem:[#allocation46_spill] sm:$0xff] }
 0x1a7   :  { %v4064_v49 = vsub.f32 %v4062_v22, %v4063_v40  ;;  %v861_v47 = vmul.f32 1.442695, %v4076_v25 }
 0x1a8   :  { %v2033_v26 = vpop.eup %2032 }
 0x1a9   :  { %527 = vadd.xlane.f32.xlu1 %v526_v4  ;;  %v855_v50 = vmul.f32 1.442695, %v4064_v49  ;;  %v4067_v4 = vsub.f32 %v4065_v5, %v4066_v23  ;;  %v2035_v2 = vpop.eup %2034  ;;  %v936_v33 = vmul.f32 %v2033_v26, %v904_v62  ;;  %v4077_v49 = vld [vmem:[#allocation31_spill] sm:$0xff] }
 0x1aa   :  { %1413 = vadd.xlane.f32.xlu0 %v1412_v17  ;;  %v937_v7 = vmul.f32 %v2035_v2, %v905_v8 }
 0x1ab   :  { %v853_v17 = vmul.f32 1.442695, %v4067_v4  ;;  %2044 = vpow2.f32 %v855_v50  ;;  %v4078_v50 = vld [vmem:[#allocation33_spill] sm:$0xff]  ;;  %v550_v4 = vld [vmem:[#allocation4] sm:$0xff] }
 0x1ac   :  { %v4079_v26 = vsub.f32 %v4077_v49, %v4078_v50 }
 0x1ad   :  { %533 = vadd.xlane.f32.xlu1 %v532_v31  ;;  %2046 = vpow2.f32 %v853_v17  ;;  %v551_v17 = vld [vmem:[#allocation4 + $0x8] sm:$0xff] }
 0x1ae   :  { %530 = vadd.xlane.f32.xlu0 %v529_v57  ;;  %v2037_v57 = vpop.eup %2036  ;;  %2048 = vpow2.f32 %v857_v37  ;;  %v863_v5 = vmul.f32 1.442695, %v4079_v26  ;;  %v913_v37 = vld [vmem:[#allocation3 + $0x50] sm:$0xff] }
 0x1af   :  { %v2039_v54 = vpop.eup %2038 }
 0x1b1   :  { %539 = vadd.xlane.f32.xlu1 %v538_v51  ;;  %v906_v51 = vld [vmem:[#allocation3 + $0x18] sm:$0xff] }
 0x1b2   :  { %536 = vadd.xlane.f32.xlu0 %v535_v14  ;;  %v938_v19 = vmul.f32 %v2039_v54, %v906_v51 }
 0x1b5   :  { %545 = vadd.xlane.f32.xlu1 %v544_v1  ;;  %v2041_v1 = vpop.eup %2040 }
 0x1b6   :  { %542 = vadd.xlane.f32.xlu0 %v541_v56  ;;  %v939_v56 = vmul.f32 %v2037_v57, %v907_v55  ;;  %v2043_v52 = vpop.eup %2042  ;;  %v941_v21 = vmul.f32 %v2041_v1, %v909_v53  ;;  %v4080_v57 = vld [vmem:[#allocation40_spill] sm:$0xff]  ;;  %v4084_v53 = vld [vmem:[#allocation37_spill] sm:$0xff] }
 0x1b7   :  { %v2045_v15 = vpop.eup %2044  ;;  %v940_v13 = vmul.f32 %v2043_v52, %v908_v61 }
 0x1b8   :  { %v2047_v11 = vpop.eup %2046  ;;  %v943_v44 = vmul.f32 %v2045_v15, %v911_v30  ;;  %v2222_v30 = vld [vmem:[%s3884_s1] sm:$0xff] }
 0x1b9   :  { %v942_v3 = vmul.f32 %v2047_v11, %v910_v24  ;;  %v2049_v62 = vpop.eup %2048  ;;  %vm1674_vm5 = vcmp.ne.s32.totalorder %v2222_v30, 4294967196 }
 0x1ba   :  { %548 = vadd.xlane.f32.xlu0 %v547_v0  ;;  %v4073_v0 = vsub.f32 %v4071_v42, %v4072_v63 }
 0x1bc   :  { %v859_v10 = vmul.f32 1.442695, %v4073_v0  ;;  %v1515_v0 = vld [vmem:[#allocation2 + $0x8] sm:$0xff] }
 0x1c7   :  { %v1321_v18 = vpop.xlane.xlu0 %1320 }
 0x1c8   :  { %v1415_v41 = vadd.f32 %v1321_v18, %v935_v12  ;;  %v1324_v31 = vpop.xlane.xlu1 %1323  ;;  %v912_v18 = vld [vmem:[#allocation3 + $0x48] sm:$0xff] }
 0x1c9   :  { %v1416_v9 = vadd.f32 %v1324_v31, %v936_v33  ;;  %v944_v51 = vmul.f32 %v2049_v62, %v912_v18  ;;  %v4089_v18 = vld [vmem:[#allocation39_spill] sm:$0xff] }
 0x1ca   :  { %1447 = vst.msk [vmem:[#allocation3] sm:$0xff] %vm30_vm0, %v1415_v41 }
 0x1cb   :  { %v1327_v58 = vpop.xlane.xlu0 %1326  ;;  %1448 = vst.msk [vmem:[#allocation3 + $0x8] sm:$0xff] %vm30_vm0, %v1416_v9  ;;  %v4081_v9 = vld [vmem:[#allocation42_spill] sm:$0xff] }
 0x1cc   :  { %v1417_v14 = vadd.f32 %v1327_v58, %v937_v7  ;;  %v4082_v7 = vsub.f32 %v4080_v57, %v4081_v9  ;;  %v552_v58 = vld [vmem:[#allocation4 + $0x10] sm:$0xff]  ;;  %v555_v9 = vld [vmem:[#allocation4 + $0x28] sm:$0xff] }
 0x1ce   :  { %1449 = vst.msk [vmem:[#allocation3 + $0x10] sm:$0xff] %vm30_vm0, %v1417_v14  ;;  %v1330_v6 = vpop.xlane.xlu1 %1329  ;;  %v865_v54 = vmul.f32 1.442695, %v4082_v7 }
 0x1cf   :  { %v1333_v27 = vpop.xlane.xlu0 %1332  ;;  %v1418_v16 = vadd.f32 %v1330_v6, %v938_v19  ;;  %v4083_v6 = vld [vmem:[#allocation35_spill] sm:$0xff] }
 0x1d0   :  { %v1419_v43 = vadd.f32 %v1333_v27, %v939_v56  ;;  %v4085_v61 = vsub.f32 %v4083_v6, %v4084_v53 }
 0x1d1   :  { %v1546_v38 = vld [vmem:[#allocation3] sm:$0xff]  ;;  %1450 = vst.msk [vmem:[#allocation3 + $0x18] sm:$0xff] %vm30_vm0, %v1418_v16  ;;  %v553_v16 = vld [vmem:[#allocation4 + $0x18] sm:$0xff] }
 0x1d2   :  { %1451 = vst.msk [vmem:[#allocation3 + $0x20] sm:$0xff] %vm30_vm0, %v1419_v43  ;;  %2050 = vlog2.f32 %v1546_v38  ;;  %v1547_v20 = vld [vmem:[#allocation3 + $0x8] sm:$0xff]  ;;  %v1336_v48 = vpop.xlane.xlu1 %1335  ;;  %v867_v43 = vmul.f32 1.442695, %v4085_v61 }
 0x1d3   :  { %v1339_v46 = vpop.xlane.xlu0 %1338  ;;  %2052 = vlog2.f32 %v1547_v20  ;;  %v1420_v59 = vadd.f32 %v1336_v48, %v940_v13  ;;  %v914_v13 = vld [vmem:[#allocation3 + $0x58] sm:$0xff] }
 0x1d4   :  { %v1421_v36 = vadd.f32 %v1339_v46, %v941_v21  ;;  %2054 = vpow2.f32 %v859_v10  ;;  %v1514_v10 = vld [vmem:[#allocation2] sm:$0xff] }
 0x1d5   :  { %v1548_v29 = vld [vmem:[#allocation3 + $0x10] sm:$0xff]  ;;  %1452 = vst.msk [vmem:[#allocation3 + $0x28] sm:$0xff] %vm30_vm0, %v1420_v59 }
 0x1d6   :  { %2056 = vlog2.f32 %v1548_v29  ;;  %1453 = vst.msk [vmem:[#allocation3 + $0x30] sm:$0xff] %vm30_vm0, %v1421_v36  ;;  %v1345_v34 = vpop.xlane.xlu1 %1344  ;;  %v2223_v36 = vld [vmem:[%s3884_s1 + $0x8] sm:$0xff] }
 0x1d7   :  { %v1342_v45 = vpop.xlane.xlu0 %1341  ;;  %v1423_v40 = vadd.f32 %v1345_v34, %v943_v44  ;;  %2058 = vpow2.f32 %v861_v47  ;;  %vm1675_vm6 = vcmp.ne.s32.totalorder %v2223_v36, 4294967196  ;;  %v4086_v59 = vld [vmem:[#allocation44_spill] sm:$0xff] }
 0x1d8   :  { %v1422_v22 = vadd.f32 %v1342_v45, %v942_v3  ;;  %v1549_v23 = vld [vmem:[#allocation3 + $0x18] sm:$0xff]  ;;  %v4088_v39 = vsub.f32 %v4086_v59, %v4087_v28  ;;  %v1516_v3 = vld [vmem:[#allocation2 + $0x10] sm:$0xff]  ;;  %v4095_v28 = vld [vmem:[#allocation43_spill] sm:$0xff] }
 0x1d9   :  { %1455 = vst.msk [vmem:[#allocation3 + $0x40] sm:$0xff] %vm30_vm0, %v1423_v40  ;;  %2060 = vlog2.f32 %v1549_v23  ;;  %v1550_v8 = vld [vmem:[#allocation3 + $0x20] sm:$0xff] }
 0x1da   :  { %1454 = vst.msk [vmem:[#allocation3 + $0x38] sm:$0xff] %vm30_vm0, %v1422_v22  ;;  %v459_v2 = vpop.xlane.xlu1 %458  ;;  %2062 = vpow2.f32 %v863_v5  ;;  %v869_v25 = vmul.f32 1.442695, %v4088_v39  ;;  %v554_v22 = vld [vmem:[#allocation4 + $0x20] sm:$0xff]  ;;  %v4096_v39 = vld [vmem:[#allocation45_spill] sm:$0xff] }
 0x1db   :  { %v456_v12 = vpop.xlane.xlu0 %455  ;;  %v583_v33 = vadd.f32 %v551_v17, %v459_v2  ;;  %2064 = vlog2.f32 %v1550_v8  ;;  %v915_v5 = vld [vmem:[#allocation3 + $0x60] sm:$0xff]  ;;  %v2224_v2 = vld [vmem:[%s3884_s1 + $0x10] sm:$0xff] }
 0x1dc   :  { %v582_v41 = vadd.f32 %v550_v4, %v456_v12  ;;  %v2051_v31 = vpop.eup %2050  ;;  %v1551_v35 = vld [vmem:[#allocation3 + $0x28] sm:$0xff]  ;;  %2066 = vpow2.f32 %v865_v54  ;;  %vm1676_vm7 = vcmp.ne.s32.totalorder %v2224_v2, 4294967196  ;;  %v4090_v8 = vld [vmem:[#allocation41_spill] sm:$0xff] }
 0x1dd   :  { %v2053_v55 = vpop.eup %2052  ;;  %616 = vst.msk [vmem:[#allocation4 + $0x8] sm:$0xff] %vm30_vm0, %v583_v33  ;;  %v1579_v56 = vmul.f32 0.6931472, %v2051_v31  ;;  %2068 = vlog2.f32 %v1551_v35  ;;  %v2227_v2 = vld [vmem:[%s3884_s1 + $0x28] sm:$0xff] }
 0x1de   :  { %615 = vst.msk [vmem:[#allocation4] sm:$0xff] %vm30_vm0, %v582_v41  ;;  %v2055_v14 = vpop.eup %2054  ;;  %v462_v32 = vpop.xlane.xlu1 %461  ;;  %v1581_v19 = vmul.f32 0.6931472, %v2053_v55  ;;  %2070 = vpow2.f32 %v867_v43  ;;  %v4091_v41 = vsub.f32 %v4089_v18, %v4090_v8  ;;  %v1517_v55 = vld [vmem:[#allocation2 + $0x18] sm:$0xff]  ;;  %vm1679_vm10 = vcmp.ne.s32.totalorder %v2227_v2, 4294967196  ;;  %v4098_v18 = vld [vmem:[#allocation52_spill] sm:$0xff] }
 0x1df   :  { %v1348_v60 = vpop.xlane.xlu0 %1347  ;;  %v584_v27 = vadd.f32 %v552_v58, %v462_v32  ;;  %v945_v42 = vmul.f32 %v2055_v14, %v913_v37  ;;  %v1642_v11 = vadd.f32 %v1579_v56, %v1514_v10  ;;  %2072 = vpow2.f32 %v869_v25  ;;  %v4093_v14 = vld [vmem:[#allocation50_spill] sm:$0xff] }
 0x1e0   :  { %v2057_v1 = vpop.eup %2056  ;;  %v1424_v52 = vadd.f32 %v1348_v60, %v944_v51  ;;  %v1643_v20 = vadd.f32 %v1581_v19, %v1515_v0  ;;  %v871_v33 = vmul.f32 1.442695, %v4091_v41  ;;  %v4092_v51 = vld [vmem:[#allocation48_spill] sm:$0xff]  ;;  %v2225_v43 = vld [vmem:[%s3884_s1 + $0x18] sm:$0xff]  ;;  %v4097_v25 = vsub.f32 %v4095_v28, %v4096_v39  ;;  %v4107_v39 = vld [vmem:[#allocation51_spill] sm:$0xff] }
 0x1e1   :  { %617 = vst.msk [vmem:[#allocation4 + $0x10] sm:$0xff] %vm30_vm0, %v584_v27  ;;  %v2059_v63 = vpop.eup %2058  ;;  %v1583_v38 = vmul.f32 0.6931472, %v2057_v1  ;;  %v4094_v35 = vsub.f32 %v4092_v51, %v4093_v14  ;;  %v916_v19 = vld [vmem:[#allocation3 + $0x68] sm:$0xff]  ;;  %vm1677_vm8 = vcmp.ne.s32.totalorder %v2225_v43, 4294967196  ;;  %v556_v0 = vld [vmem:[#allocation4 + $0x30] sm:$0xff] }
 0x1e2   :  { %1456 = vst.msk [vmem:[#allocation3 + $0x48] sm:$0xff] %vm30_vm0, %v1424_v52  ;;  %v465_v21 = vpop.xlane.xlu1 %464  ;;  %v946_v34 = vmul.f32 %v2059_v63, %v914_v13  ;;  %2074 = vpow2.f32 %v871_v33  ;;  %v4099_v8 = vld [vmem:[#allocation54_spill] sm:$0xff]  ;;  %v4101_v51 = vld [vmem:[#allocation47_spill] sm:$0xff]  ;;  %v4102_v14 = vld [vmem:[#allocation49_spill] sm:$0xff] }
 0x1e3   :  { %v1351_v15 = vpop.xlane.xlu0 %1350  ;;  %v585_v48 = vadd.f32 %v553_v16, %v465_v21  ;;  %v2061_v24 = vpop.eup %2060  ;;  %v1644_v49 = vadd.f32 %v1583_v38, %v1516_v3  ;;  %v873_v60 = vmul.f32 1.442695, %v4094_v35  ;;  %v4100_v41 = vsub.f32 %v4098_v18, %v4099_v8  ;;  %v921_v28 = vld [vmem:[#allocation3 + $0x90] sm:$0xff]  ;;  %v562_v18 = vld [vmem:[#allocation4 + $0x60] sm:$0xff] }
 0x1e4   :  { %v1425_v46 = vadd.f32 %v1351_v15, %v945_v42  ;;  %v1707_v29 = vld [vmem:[#allocation4 + $0x8] sm:$0xff]  ;;  %v2063_v40 = vpop.eup %2062  ;;  %v1585_v17 = vmul.f32 0.6931472, %v2061_v24  ;;  %v4103_v35 = vsub.f32 %v4101_v51, %v4102_v14 }
 0x1e5   :  { %v1706_v47 = vld [vmem:[#allocation4] sm:$0xff]  ;;  %v1739_v45 = vsub.f32 %v1643_v20, %v1707_v29  ;;  %618 = vst.msk [vmem:[#allocation4 + $0x18] sm:$0xff] %vm30_vm0, %v585_v48  ;;  %v2065_v12 = vpop.eup %2064  ;;  %v947_v54 = vmul.f32 %v2063_v40, %v915_v5  ;;  %2076 = vpow2.f32 %v873_v60  ;;  %v877_v33 = vmul.f32 1.442695, %v4100_v41 }
 0x1e6   :  { %v1738_v44 = vsub.f32 %v1642_v11, %v1706_v47  ;;  %1457 = vst.msk [vmem:[#allocation3 + $0x50] sm:$0xff] %vm30_vm0, %v1425_v46  ;;  %v468_v26 = vpop.xlane.xlu1 %467  ;;  %v2067_v58 = vpop.eup %2066  ;;  %v1645_v6 = vadd.f32 %v1585_v17, %v1517_v55  ;;  %v1587_v63 = vmul.f32 0.6931472, %v2065_v12  ;;  %v917_v46 = vld [vmem:[#allocation3 + $0x70] sm:$0xff]  ;;  %v1518_v48 = vld [vmem:[#allocation2 + $0x20] sm:$0xff] }
 0x1e7   :  { %v1354_v50 = vpop.xlane.xlu0 %1353  ;;  %v1771_v4 = vsel %vm1675_vm6, %v1739_v45, 0.0  ;;  %v586_v57 = vadd.f32 %v554_v22, %v468_v26  ;;  %v2069_v52 = vpop.eup %2068  ;;  %v948_v15 = vmul.f32 %v2067_v58, %v916_v19  ;;  %v875_v47 = vmul.f32 1.442695, %v4097_v25  ;;  %v2226_v45 = vld [vmem:[%s3884_s1 + $0x20] sm:$0xff]  ;;  %v4108_v25 = vld [vmem:[#allocation53_spill] sm:$0xff] }
 0x1e8   :  { %v1770_v23 = vsel %vm1674_vm5, %v1738_v44, 0.0  ;;  %v1426_v62 = vadd.f32 %v1354_v50, %v946_v34  ;;  %v1708_v31 = vld [vmem:[#allocation4 + $0x10] sm:$0xff]  ;;  %v1803_v37 = vsel %vm30_vm0, %v1771_v4, 0.0  ;;  %v2071_v21 = vpop.eup %2070  ;;  %v1589_v13 = vmul.f32 0.6931472, %v2069_v52  ;;  %v557_v44 = vld [vmem:[#allocation4 + $0x38] sm:$0xff] }
 0x1e9   :  { %v1740_v7 = vsub.f32 %v1644_v49, %v1708_v31  ;;  %v1802_v32 = vsel %vm30_vm0, %v1770_v23, 0.0  ;;  %619 = vst.msk [vmem:[#allocation4 + $0x20] sm:$0xff] %vm30_vm0, %v586_v57  ;;  %v1646_v3 = vadd.f32 %v1587_v63, %v1518_v48  ;;  %vm1678_vm9 = vcmp.ne.s32.totalorder %v2226_v45, 4294967196  ;;  %v2073_v49 = vpop.eup %2072  ;;  %v1519_v50 = vld [vmem:[#allocation2 + $0x28] sm:$0xff]  ;;  %v918_v4 = vld [vmem:[#allocation3 + $0x78] sm:$0xff] }
 0x1ea   :  { %1458 = vst.msk [vmem:[#allocation3 + $0x58] sm:$0xff] %vm30_vm0, %v1426_v62  ;;  %v471_v56 = vpop.xlane.xlu1 %470  ;;  %v1804_v10 = vadd.f32 %v1803_v37, %v1802_v32  ;;  %v949_v40 = vmul.f32 %v2071_v21, %v917_v46  ;;  %v1647_v17 = vadd.f32 %v1589_v13, %v1519_v50  ;;  %2078 = vpow2.f32 %v875_v47  ;;  %v560_v46 = vld [vmem:[#allocation4 + $0x50] sm:$0xff]  ;;  %v1553_v48 = vld [vmem:[#allocation3 + $0x38] sm:$0xff]  ;;  %v1555_v2 = vld [vmem:[#allocation3 + $0x48] sm:$0xff] }
 0x1eb   :  { %v1357_v1 = vpop.xlane.xlu0 %1356  ;;  %v1772_v27 = vsel %vm1676_vm7, %v1740_v7, 0.0  ;;  %v587_v61 = vadd.f32 %v555_v9, %v471_v56  ;;  %v558_v9 = vld [vmem:[#allocation4 + $0x40] sm:$0xff]  ;;  %v950_v58 = vmul.f32 %v2073_v49, %v918_v4  ;;  %v879_v60 = vmul.f32 1.442695, %v4103_v35  ;;  %v561_v45 = vld [vmem:[#allocation4 + $0x58] sm:$0xff]  ;;  %v4110_v49 = vld [vmem:[#allocation60_spill] sm:$0xff] }
 0x1ec   :  { %v1427_v53 = vadd.f32 %v1357_v1, %v947_v54  ;;  %v1805_v16 = vsel %vm30_vm0, %v1772_v27, 0.0  ;;  %v1709_v42 = vld [vmem:[#allocation4 + $0x18] sm:$0xff]  ;;  %v2075_v55 = vpop.eup %2074  ;;  %v919_v1 = vld [vmem:[#allocation3 + $0x80] sm:$0xff]  ;;  %2080 = vpow2.f32 %v877_v33  ;;  %v4109_v47 = vsub.f32 %v4107_v39, %v4108_v25 }
 0x1ed   :  { %v1741_v38 = vsub.f32 %v1645_v6, %v1709_v42  ;;  %620 = vst.msk [vmem:[#allocation4 + $0x28] sm:$0xff] %vm30_vm0, %v587_v61  ;;  %v1806_v24 = vadd.f32 %v1805_v16, %v1804_v10  ;;  %v1552_v61 = vld [vmem:[#allocation3 + $0x30] sm:$0xff]  ;;  %v951_v16 = vmul.f32 %v2075_v55, %v919_v1  ;;  %v920_v10 = vld [vmem:[#allocation3 + $0x88] sm:$0xff]  ;;  %2082 = vpow2.f32 %v879_v60  ;;  %v4111_v50 = vld [vmem:[#allocation62_spill] sm:$0xff] }
 0x1ee   :  { %1459 = vst.msk [vmem:[#allocation3 + $0x60] sm:$0xff] %vm30_vm0, %v1427_v53  ;;  %v474_v20 = vpop.xlane.xlu1 %473  ;;  %v559_v53 = vld [vmem:[#allocation4 + $0x48] sm:$0xff]  ;;  %2084 = vlog2.f32 %v1552_v61  ;;  %v1556_v41 = vld [vmem:[#allocation3 + $0x50] sm:$0xff] }
 0x1ef   :  { %v1360_v11 = vpop.xlane.xlu0 %1359  ;;  %v1773_v30 = vsel %vm1677_vm8, %v1741_v38, 0.0  ;;  %v588_v59 = vadd.f32 %v556_v0, %v474_v20  ;;  %v2077_v42 = vpop.eup %2076  ;;  %v4104_v38 = vld [vmem:[#allocation56_spill] sm:$0xff] }
 0x1f0   :  { %v1428_v36 = vadd.f32 %v1360_v11, %v948_v15  ;;  %v1807_v29 = vsel %vm30_vm0, %v1773_v30, 0.0  ;;  %v1710_v22 = vld [vmem:[#allocation4 + $0x20] sm:$0xff]  ;;  %v563_v60 = vld [vmem:[#allocation4 + $0x68] sm:$0xff] }
 0x1f1   :  { %v1808_v34 = vadd.f32 %v1807_v29, %v1806_v24  ;;  %621 = vst.msk [vmem:[#allocation4 + $0x30] sm:$0xff] %vm30_vm0, %v588_v59  ;;  %v1742_v26 = vsub.f32 %v1646_v3, %v1710_v22  ;;  %v4105_v15 = vld [vmem:[#allocation58_spill] sm:$0xff]  ;;  %v952_v24 = vmul.f32 %v2077_v42, %v920_v10  ;;  %v883_v29 = vmul.f32 1.442695, %v4109_v47  ;;  %v4116_v61 = vld [vmem:[#allocation64_spill] sm:$0xff] }
 0x1f2   :  { %1460 = vst.msk [vmem:[#allocation3 + $0x68] sm:$0xff] %vm30_vm0, %v1428_v36  ;;  %v477_v23 = vpop.xlane.xlu1 %476  ;;  %v4106_v21 = vsub.f32 %v4104_v38, %v4105_v15  ;;  %v1520_v38 = vld [vmem:[#allocation2 + $0x30] sm:$0xff] }
 0x1f3   :  { %v1363_v5 = vpop.xlane.xlu0 %1362  ;;  %v589_v12 = vadd.f32 %v557_v44, %v477_v23  ;;  %v1774_v31 = vsel %vm1678_vm9, %v1742_v26, 0.0  ;;  %v4112_v26 = vsub.f32 %v4110_v49, %v4111_v50  ;;  %v925_v47 = vld [vmem:[#allocation3 + $0xb0] sm:$0xff] }
 0x1f4   :  { %v1429_v62 = vadd.f32 %v1363_v5, %v949_v40  ;;  %v1711_v57 = vld [vmem:[#allocation4 + $0x28] sm:$0xff]  ;;  %v1809_v7 = vsel %vm30_vm0, %v1774_v31, 0.0  ;;  %v881_v13 = vmul.f32 1.442695, %v4106_v21  ;;  %v2079_v30 = vpop.eup %2078  ;;  %v564_v21 = vld [vmem:[#allocation4 + $0x70] sm:$0xff] }
 0x1f5   :  { %v1743_v54 = vsub.f32 %v1647_v17, %v1711_v57  ;;  %622 = vst.msk [vmem:[#allocation4 + $0x38] sm:$0xff] %vm30_vm0, %v589_v12  ;;  %v1810_v56 = vadd.f32 %v1809_v7, %v1808_v34  ;;  %v1554_v34 = vld [vmem:[#allocation3 + $0x40] sm:$0xff]  ;;  %v953_v22 = vmul.f32 %v2079_v30, %v921_v28  ;;  %v885_v5 = vmul.f32 1.442695, %v4112_v26  ;;  %v922_v17 = vld [vmem:[#allocation3 + $0x98] sm:$0xff] }
 0x1f6   :  { %1461 = vst.msk [vmem:[#allocation3 + $0x70] sm:$0xff] %vm30_vm0, %v1429_v62  ;;  %v480_v37 = vpop.xlane.xlu1 %479  ;;  %2086 = vpow2.f32 %v881_v13  ;;  %v2081_v40 = vpop.eup %2080  ;;  %v923_v7 = vld [vmem:[#allocation3 + $0xa0] sm:$0xff]  ;;  %v4120_v30 = vld [vmem:[#allocation61_spill] sm:$0xff] }
 0x1f7   :  { %v1366_v32 = vpop.xlane.xlu0 %1365  ;;  %v1775_v19 = vsel %vm1679_vm10, %v1743_v54, 0.0  ;;  %v590_v27 = vadd.f32 %v558_v9, %v480_v37  ;;  %2088 = vlog2.f32 %v1553_v48  ;;  %v2083_v8 = vpop.eup %2082  ;;  %v954_v33 = vmul.f32 %v2081_v40, %v922_v17  ;;  %v4113_v54 = vld [vmem:[#allocation55_spill] sm:$0xff]  ;;  %v1557_v37 = vld [vmem:[#allocation3 + $0x58] sm:$0xff] }
 0x1f8   :  { %v1430_v52 = vadd.f32 %v1366_v32, %v950_v58  ;;  %v1811_v6 = vsel %vm30_vm0, %v1775_v19, 0.0  ;;  %2090 = vpow2.f32 %v883_v29  ;;  %v2085_v31 = vpop.eup %2084  ;;  %v4114_v58 = vld [vmem:[#allocation57_spill] sm:$0xff]  ;;  %v4122_v40 = vld [vmem:[#allocation63_spill] sm:$0xff] }
 0x1f9   :  { %v3629_v43 = vadd.f32 %v1811_v6, %v1810_v56  ;;  %623 = vst.msk [vmem:[#allocation4 + $0x40] sm:$0xff] %vm30_vm0, %v590_v27  ;;  %2092 = vlog2.f32 %v1554_v34  ;;  %v4115_v55 = vsub.f32 %v4113_v54, %v4114_v58  ;;  %v1591_v1 = vmul.f32 0.6931472, %v2085_v31  ;;  %v1712_v15 = vld [vmem:[#allocation4 + $0x30] sm:$0xff]  ;;  %v1559_v28 = vld [vmem:[#allocation3 + $0x68] sm:$0xff]  ;;  %v926_v31 = vld [vmem:[#allocation3 + $0xb8] sm:$0xff] }
 0x1fa   :  { %1462 = vst.msk [vmem:[#allocation3 + $0x78] sm:$0xff] %vm30_vm0, %v1430_v52  ;;  %v483_v0 = vpop.xlane.xlu1 %482  ;;  %2094 = vpow2.f32 %v885_v5  ;;  %v955_v56 = vmul.f32 %v2083_v8, %v923_v7  ;;  %v1558_v52 = vld [vmem:[#allocation3 + $0x60] sm:$0xff]  ;;  %v2228_v34 = vld [vmem:[%s3884_s1 + $0x30] sm:$0xff] }
 0x1fb   :  { %v1369_v63 = vpop.xlane.xlu0 %1368  ;;  %v591_v20 = vadd.f32 %v559_v53, %v483_v0  ;;  %v887_v51 = vmul.f32 1.442695, %v4115_v55  ;;  %2096 = vlog2.f32 %v1555_v2  ;;  %v924_v53 = vld [vmem:[#allocation3 + $0xa8] sm:$0xff]  ;;  %vm1680_vm11 = vcmp.ne.s32.totalorder %v2228_v34, 4294967196  ;;  %v4123_v49 = vld [vmem:[#allocation65_spill] sm:$0xff] }
 0x1fc   :  { %v1431_v11 = vadd.f32 %v1369_v63, %v951_v16  ;;  %2098 = vlog2.f32 %v1556_v41  ;;  %v4117_v16 = vld [vmem:[#allocation66_spill] sm:$0xff]  ;;  %v4124_v50 = vsub.f32 %v4122_v40, %v4123_v49  ;;  %v928_v34 = vld [vmem:[#allocation3 + $0xc8] sm:$0xff] }
 0x1fd   :  { %624 = vst.msk [vmem:[#allocation4 + $0x48] sm:$0xff] %vm30_vm0, %v591_v20  ;;  %2100 = vpow2.f32 %v887_v51  ;;  %v4118_v42 = vsub.f32 %v4116_v61, %v4117_v16  ;;  %v1713_v5 = vld [vmem:[#allocation4 + $0x38] sm:$0xff]  ;;  %v1560_v8 = vld [vmem:[#allocation3 + $0x70] sm:$0xff] }
 0x1fe   :  { %1463 = vst.msk [vmem:[#allocation3 + $0x80] sm:$0xff] %vm30_vm0, %v1431_v11  ;;  %v486_v59 = vpop.xlane.xlu1 %485  ;;  %2102 = vlog2.f32 %v1557_v37  ;;  %v1648_v11 = vadd.f32 %v1591_v1, %v1520_v38  ;;  %v895_v26 = vmul.f32 1.442695, %v4124_v50  ;;  %v4125_v51 = vld [vmem:[#allocation68_spill] sm:$0xff]  ;;  %v566_v1 = vld [vmem:[#allocation4 + $0x80] sm:$0xff] }
 0x1ff   :  { %v1372_v36 = vpop.xlane.xlu0 %1371  ;;  %v592_v44 = vadd.f32 %v560_v46, %v486_v59  ;;  %v889_v63 = vmul.f32 1.442695, %v4118_v42  ;;  %2104 = vlog2.f32 %v1558_v52  ;;  %v1523_v38 = vld [vmem:[#allocation2 + $0x48] sm:$0xff] }
 0x200   :  { %v1432_v3 = vadd.f32 %v1372_v36, %v952_v24  ;;  %v2087_v32 = vpop.eup %2086  ;;  %v4119_v24 = vld [vmem:[#allocation59_spill] sm:$0xff]  ;;  %v1744_v29 = vsub.f32 %v1648_v11, %v1712_v15 }
 0x201   :  { %625 = vst.msk [vmem:[#allocation4 + $0x50] sm:$0xff] %vm30_vm0, %v592_v44  ;;  %v2089_v19 = vpop.eup %2088  ;;  %v956_v46 = vmul.f32 %v2087_v32, %v924_v53  ;;  %v4121_v36 = vsub.f32 %v4119_v24, %v4120_v30  ;;  %2106 = vpow2.f32 %v889_v63  ;;  %v1561_v54 = vld [vmem:[#allocation3 + $0x78] sm:$0xff]  ;;  %v1714_v32 = vld [vmem:[#allocation4 + $0x40] sm:$0xff]  ;;  %v3681_v53 = vld [vmem:[%s3884_s1 + $0x48] sm:$0xff] }
 0x202   :  { %1464 = vst.msk [vmem:[#allocation3 + $0x88] sm:$0xff] %vm30_vm0, %v1432_v3  ;;  %v489_v4 = vpop.xlane.xlu1 %488  ;;  %v2091_v13 = vpop.eup %2090  ;;  %v1593_v20 = vmul.f32 0.6931472, %v2089_v19  ;;  %2108 = vlog2.f32 %v1559_v28  ;;  %vm1683_vm13 = vcmp.ne.s32.totalorder %v3681_v53, 4294967196  ;;  %v1524_v24 = vld [vmem:[#allocation2 + $0x50] sm:$0xff]  ;;  %v4128_v30 = vld [vmem:[#allocation67_spill] sm:$0xff] }
 0x203   :  { %v1375_v23 = vpop.xlane.xlu0 %1374  ;;  %v593_v12 = vadd.f32 %v561_v45, %v489_v4  ;;  %v2093_v48 = vpop.eup %2092  ;;  %v891_v59 = vmul.f32 1.442695, %v4121_v36  ;;  %v4129_v36 = vld [vmem:[#allocation69_spill] sm:$0xff]  ;;  %v2235_v53 = vld [vmem:[%s3884_s1 + $0x60] sm:$0xff] }
 0x204   :  { %v1433_v62 = vadd.f32 %v1375_v23, %v953_v22  ;;  %v2095_v45 = vpop.eup %2094  ;;  %v1521_v22 = vld [vmem:[#allocation2 + $0x38] sm:$0xff]  ;;  %vm1686_vm3 = vcmp.ne.s32.totalorder %v2235_v53, 4294967196  ;;  %v3762_v53 = vld [vmem:[%s3884_s1 + $0x88] sm:$0xff] }
 0x205   :  { %626 = vst.msk [vmem:[#allocation4 + $0x58] sm:$0xff] %vm30_vm0, %v593_v12  ;;  %v565_v23 = vld [vmem:[#allocation4 + $0x78] sm:$0xff]  ;;  %v2097_v4 = vpop.eup %2096  ;;  %v1649_v17 = vadd.f32 %v1593_v20, %v1521_v22  ;;  %v957_v12 = vmul.f32 %v2091_v13, %v925_v47  ;;  %2110 = vpow2.f32 %v891_v59  ;;  %v1562_v16 = vld [vmem:[#allocation3 + $0x80] sm:$0xff]  ;;  %v1715_v13 = vld [vmem:[#allocation4 + $0x48] sm:$0xff]  ;;  %v4130_v59 = vsub.f32 %v4128_v30, %v4129_v36 }
 0x206   :  { %1465 = vst.msk [vmem:[#allocation3 + $0x90] sm:$0xff] %vm30_vm0, %v1433_v62  ;;  %v492_v9 = vpop.xlane.xlu1 %491  ;;  %v1595_v62 = vmul.f32 0.6931472, %v2093_v48  ;;  %v2099_v2 = vpop.eup %2098  ;;  %2112 = vpow2.f32 %v895_v26  ;;  %v1597_v37 = vmul.f32 0.6931472, %v2097_v4  ;;  %v2232_v48 = vld [vmem:[%s3884_s1 + $0x40] sm:$0xff] }
 0x207   :  { %v1378_v57 = vpop.xlane.xlu0 %1377  ;;  %v594_v35 = vadd.f32 %v562_v18, %v492_v9  ;;  %v2229_v18 = vld [vmem:[%s3884_s1 + $0x38] sm:$0xff]  ;;  %v1776_v9 = vsel %vm1680_vm11, %v1744_v29, 0.0  ;;  %v1745_v7 = vsub.f32 %v1649_v17, %v1713_v5  ;;  %2114 = vlog2.f32 %v1560_v8  ;;  %v567_v47 = vld [vmem:[#allocation4 + $0x88] sm:$0xff] }
 0x208   :  { %v1434_v14 = vadd.f32 %v1378_v57, %v954_v33  ;;  %vm1681_vm12 = vcmp.ne.s32.totalorder %v2229_v18, 4294967196  ;;  %v1522_v57 = vld [vmem:[#allocation2 + $0x40] sm:$0xff]  ;;  %v1599_v52 = vmul.f32 0.6931472, %v2099_v2  ;;  %v1813_v61 = vsel %vm30_vm0, %v1776_v9, 0.0  ;;  %v1716_v50 = vld [vmem:[#allocation4 + $0x50] sm:$0xff] }
 0x209   :  { %627 = vst.msk [vmem:[#allocation4 + $0x60] sm:$0xff] %vm30_vm0, %v594_v35  ;;  %v1650_v19 = vadd.f32 %v1595_v62, %v1522_v57  ;;  %2116 = vlog2.f32 %v1561_v54  ;;  %v1777_v15 = vsel %vm1681_vm12, %v1745_v7, 0.0  ;;  %vm1682_vm15 = vcmp.ne.s32.totalorder %v2232_v48, 4294967196  ;;  %v1525_v62 = vld [vmem:[#allocation2 + $0x58] sm:$0xff] }
 0x20a   :  { %1466 = vst.msk [vmem:[#allocation3 + $0x98] sm:$0xff] %vm30_vm0, %v1434_v14  ;;  %v495_v6 = vpop.xlane.xlu1 %494  ;;  %v4126_v14 = vld [vmem:[#allocation70_spill] sm:$0xff]  ;;  %v899_v28 = vmul.f32 1.442695, %v4130_v59  ;;  %v1814_v22 = vadd.f32 %v1813_v61, %v3629_v43  ;;  %v1815_v40 = vsel %vm30_vm0, %v1777_v15, 0.0  ;;  %v2233_v43 = vld [vmem:[%s3884_s1 + $0x50] sm:$0xff] }
 0x20b   :  { %v1381_v27 = vpop.xlane.xlu0 %1380  ;;  %v595_v10 = vadd.f32 %v563_v60, %v495_v6  ;;  %v4127_v35 = vsub.f32 %v4125_v51, %v4126_v14  ;;  %vm1684_vm1 = vcmp.ne.s32.totalorder %v2233_v43, 4294967196  ;;  %vm1691_vm6 = vcmp.ne.s32.totalorder %v3762_v53, 4294967196 }
 0x20c   :  { %v1435_v0 = vadd.f32 %v1381_v27, %v955_v56  ;;  %v2101_v56 = vpop.eup %2100  ;;  %v958_v27 = vmul.f32 %v2095_v45, %v926_v31  ;;  %v1717_v9 = vld [vmem:[#allocation4 + $0x58] sm:$0xff]  ;;  %v1816_v51 = vadd.f32 %v1815_v40, %v1814_v22 }
 0x20d   :  { %628 = vst.msk [vmem:[#allocation4 + $0x68] sm:$0xff] %vm30_vm0, %v595_v10  ;;  %v893_v60 = vmul.f32 1.442695, %v4127_v35  ;;  %v2103_v6 = vpop.eup %2102  ;;  %v1564_v26 = vld [vmem:[#allocation3 + $0x90] sm:$0xff]  ;;  %v930_v22 = vld [vmem:[#allocation3 + $0xd8] sm:$0xff] }
 0x20e   :  { %1467 = vst.msk [vmem:[#allocation3 + $0xa0] sm:$0xff] %vm30_vm0, %v1435_v0  ;;  %v498_v25 = vpop.xlane.xlu1 %497  ;;  %v927_v0 = vld [vmem:[#allocation3 + $0xc0] sm:$0xff]  ;;  %v2105_v10 = vpop.eup %2104 }
 0x20f   :  { %v1384_v39 = vpop.xlane.xlu0 %1383  ;;  %v596_v44 = vadd.f32 %v564_v21, %v498_v25  ;;  %v1746_v21 = vsub.f32 %v1650_v19, %v1714_v32  ;;  %2118 = vpow2.f32 %v893_v60  ;;  %v1563_v25 = vld [vmem:[#allocation3 + $0x88] sm:$0xff]  ;;  %v2107_v29 = vpop.eup %2106  ;;  %v959_v45 = vmul.f32 %v2101_v56, %v927_v0  ;;  %v929_v60 = vld [vmem:[#allocation3 + $0xd0] sm:$0xff] }
 0x210   :  { %v1436_v3 = vadd.f32 %v1384_v39, %v956_v46  ;;  %v3689_v46 = vld [vmem:[%s3884_s1 + $0x58] sm:$0xff]  ;;  %v1651_v39 = vadd.f32 %v1597_v37, %v1523_v38  ;;  %2120 = vlog2.f32 %v1562_v16  ;;  %v1603_v5 = vmul.f32 0.6931472, %v2105_v10  ;;  %v2109_v17 = vpop.eup %2108  ;;  %v1718_v19 = vld [vmem:[#allocation4 + $0x60] sm:$0xff]  ;;  %v3722_v38 = vld [vmem:[%s3884_s1 + $0x68] sm:$0xff] }
 0x211   :  { %629 = vst.msk [vmem:[#allocation4 + $0x70] sm:$0xff] %vm30_vm0, %v596_v44  ;;  %vm1685_vm14 = vcmp.ne.s32.totalorder %v3689_v46, 4294967196  ;;  %v1601_v44 = vmul.f32 0.6931472, %v2103_v6  ;;  %2122 = vlog2.f32 %v1563_v25  ;;  %v2111_v8 = vpop.eup %2110  ;;  %v1565_v7 = vld [vmem:[#allocation3 + $0x98] sm:$0xff]  ;;  %v960_v54 = vmul.f32 %v2107_v29, %v928_v34 }
 0x212   :  { %1468 = vst.msk [vmem:[#allocation3 + $0xa8] sm:$0xff] %vm30_vm0, %v1436_v3  ;;  %v501_v33 = vpop.xlane.xlu1 %500  ;;  %v3698_v3 = vadd.f32 %v1599_v52, %v1524_v24  ;;  %v1747_v49 = vsub.f32 %v1651_v39, %v1715_v13  ;;  %2124 = vpow2.f32 %v899_v28  ;;  %v3714_v32 = vpop.eup %2112  ;;  %v1605_v52 = vmul.f32 0.6931472, %v2109_v17  ;;  %v1527_v13 = vld [vmem:[#allocation2 + $0x68] sm:$0xff] }
 0x213   :  { %v1387_v41 = vpop.xlane.xlu0 %1386  ;;  %v597_v55 = vadd.f32 %v565_v23, %v501_v33  ;;  %v4132_v33 = vld [vmem:[#allocation72_spill] sm:$0xff]  ;;  %2126 = vlog2.f32 %v1564_v26  ;;  %v1653_v35 = vadd.f32 %v1601_v44, %v1525_v62  ;;  %v2115_v61 = vpop.eup %2114  ;;  %vm1687_vm2 = vcmp.ne.s32.totalorder %v3722_v38, 4294967196  ;;  %v570_v62 = vld [vmem:[#allocation4 + $0xa0] sm:$0xff] }
 0x214   :  { %v1437_v58 = vadd.f32 %v1387_v41, %v957_v12  ;;  %v1778_v12 = vsel %vm1682_vm15, %v1746_v21, 0.0  ;;  %v4131_v41 = vld [vmem:[#allocation71_spill] sm:$0xff]  ;;  %v1748_v14 = vsub.f32 %v3698_v3, %v1716_v50  ;;  %2128 = vlog2.f32 %v1565_v7  ;;  %v2117_v10 = vpop.eup %2116  ;;  %v569_v21 = vld [vmem:[#allocation4 + $0x98] sm:$0xff] }
 0x215   :  { %630 = vst.msk [vmem:[#allocation4 + $0x78] sm:$0xff] %vm30_vm0, %v597_v55  ;;  %v4133_v31 = vsub.f32 %v4131_v41, %v4132_v33  ;;  %v1526_v55 = vld [vmem:[#allocation2 + $0x60] sm:$0xff]  ;;  %v1817_v37 = vsel %vm30_vm0, %v1778_v12, 0.0  ;;  %v1749_v16 = vsub.f32 %v1653_v35, %v1717_v9  ;;  %v961_v15 = vmul.f32 %v2111_v8, %v929_v60  ;;  %v1719_v28 = vld [vmem:[#allocation4 + $0x68] sm:$0xff]  ;;  %v1529_v33 = vld [vmem:[#allocation2 + $0x78] sm:$0xff] }
 0x216   :  { %1469 = vst.msk [vmem:[#allocation3 + $0xb0] sm:$0xff] %vm30_vm0, %v1437_v58  ;;  %v504_v63 = vpop.xlane.xlu1 %503  ;;  %v568_v58 = vld [vmem:[#allocation4 + $0x90] sm:$0xff]  ;;  %v1654_v56 = vadd.f32 %v1603_v5, %v1526_v55  ;;  %v1818_v30 = vadd.f32 %v1817_v37, %v1816_v51  ;;  %v1780_v36 = vsel %vm1684_vm1, %v1748_v14, 0.0  ;;  %v1655_v29 = vadd.f32 %v1605_v52, %v1527_v13 }
 0x217   :  { %v1390_v42 = vpop.xlane.xlu0 %1389  ;;  %v598_v20 = vadd.f32 %v566_v1, %v504_v63  ;;  %v897_v57 = vmul.f32 1.442695, %v4133_v31  ;;  %v1779_v1 = vsel %vm1683_vm13, %v1747_v49, 0.0  ;;  %v1607_v3 = vmul.f32 0.6931472, %v2115_v61 }
 0x218   :  { %v1438_v11 = vadd.f32 %v1390_v42, %v958_v27  ;;  %v1566_v42 = vld [vmem:[#allocation3 + $0xa0] sm:$0xff]  ;;  %v1750_v59 = vsub.f32 %v1654_v56, %v1718_v19  ;;  %v1781_v49 = vsel %vm1685_vm14, %v1749_v16, 0.0  ;;  %v1609_v50 = vmul.f32 0.6931472, %v2117_v10  ;;  %v1720_v8 = vld [vmem:[#allocation4 + $0x70] sm:$0xff] }
 0x219   :  { %631 = vst.msk [vmem:[#allocation4 + $0x80] sm:$0xff] %vm30_vm0, %v598_v20  ;;  %2130 = vpow2.f32 %v897_v57  ;;  %v4135_v20 = vld [vmem:[#allocation74_spill] sm:$0xff]  ;;  %v1567_v39 = vld [vmem:[#allocation3 + $0xa8] sm:$0xff]  ;;  %v2119_v25 = vpop.eup %2118  ;;  %v1751_v17 = vsub.f32 %v1655_v29, %v1719_v28  ;;  %v1823_v31 = vsel %vm30_vm0, %v1781_v49, 0.0  ;;  %v2237_v16 = vld [vmem:[%s3884_s1 + $0x70] sm:$0xff] }
 0x21a   :  { %1470 = vst.msk [vmem:[#allocation3 + $0xb8] sm:$0xff] %vm30_vm0, %v1438_v11  ;;  %v507_v4 = vpop.xlane.xlu1 %506  ;;  %v4134_v11 = vld [vmem:[#allocation73_spill] sm:$0xff]  ;;  %2132 = vlog2.f32 %v1566_v42  ;;  %v2121_v40 = vpop.eup %2120  ;;  %v1782_v46 = vsel %vm1686_vm3, %v1750_v59, 0.0  ;;  %v962_v43 = vmul.f32 %v2119_v25, %v930_v22  ;;  %v1657_v35 = vadd.f32 %v1609_v50, %v1529_v33  ;;  %v1530_v42 = vld [vmem:[#allocation2 + $0x80] sm:$0xff] }
 0x21b   :  { %v1393_v23 = vpop.xlane.xlu0 %1392  ;;  %v599_v18 = vadd.f32 %v567_v47, %v507_v4  ;;  %v4136_v48 = vsub.f32 %v4134_v11, %v4135_v20  ;;  %v1819_v47 = vsel %vm30_vm0, %v1779_v1, 0.0  ;;  %v1821_v4 = vsel %vm30_vm0, %v1780_v36, 0.0  ;;  %v2123_v12 = vpop.eup %2122  ;;  %v2240_v22 = vld [vmem:[%s3884_s1 + $0x80] sm:$0xff]  ;;  %v1532_v49 = vld [vmem:[#allocation2 + $0x90] sm:$0xff] }
 0x21c   :  { %v1439_v2 = vadd.f32 %v1393_v23, %v959_v45  ;;  %v3740_v23 = vld [vmem:[%s3884_s1 + $0x78] sm:$0xff]  ;;  %2134 = vlog2.f32 %v1567_v39  ;;  %v3747_v41 = vpop.eup %2124  ;;  %v1611_v9 = vmul.f32 0.6931472, %v2121_v40  ;;  %v1825_v56 = vsel %vm30_vm0, %v1782_v46, 0.0  ;;  %v2241_v40 = vld [vmem:[%s3884_s1 + $0x90] sm:$0xff] }
 0x21d   :  { %632 = vst.msk [vmem:[#allocation4 + $0x88] sm:$0xff] %vm30_vm0, %v599_v18  ;;  %v901_v24 = vmul.f32 1.442695, %v4136_v48  ;;  %v1568_v44 = vld [vmem:[#allocation3 + $0xb0] sm:$0xff]  ;;  %vm1689_vm4 = vcmp.ne.s32.totalorder %v3740_v23, 4294967196  ;;  %v1820_v18 = vadd.f32 %v1819_v47, %v1818_v30  ;;  %v2127_v51 = vpop.eup %2126  ;;  %v1721_v60 = vld [vmem:[#allocation4 + $0x78] sm:$0xff] }
 0x21e   :  { %1471 = vst.msk [vmem:[#allocation3 + $0xc0] sm:$0xff] %vm30_vm0, %v1439_v2  ;;  %v510_v6 = vpop.xlane.xlu1 %509  ;;  %v1528_v2 = vld [vmem:[#allocation2 + $0x70] sm:$0xff]  ;;  %2136 = vlog2.f32 %v1568_v44  ;;  %v1783_v19 = vsel %vm1687_vm2, %v1751_v17, 0.0  ;;  %v2129_v61 = vpop.eup %2128  ;;  %vm1688_vm5 = vcmp.ne.s32.totalorder %v2237_v16, 4294967196  ;;  %v1615_v13 = vmul.f32 0.6931472, %v2127_v51 }
 0x21f   :  { %v1396_v27 = vpop.xlane.xlu0 %1395  ;;  %v600_v0 = vadd.f32 %v568_v58, %v510_v6  ;;  %2138 = vpow2.f32 %v901_v24  ;;  %v1656_v57 = vadd.f32 %v1607_v3, %v1528_v2  ;;  %v931_v58 = vld [vmem:[#allocation3 + $0xe0] sm:$0xff]  ;;  %v1822_v14 = vadd.f32 %v1821_v4, %v1820_v18  ;;  %v571_v6 = vld [vmem:[#allocation4 + $0xa8] sm:$0xff] }
 0x220   :  { %v1440_v63 = vadd.f32 %v1396_v27, %v960_v54  ;;  %v1613_v27 = vmul.f32 0.6931472, %v2123_v12  ;;  %v963_v10 = vmul.f32 %v3714_v32, %v931_v58  ;;  %v932_v48 = vld [vmem:[#allocation3 + $0xe8] sm:$0xff]  ;;  %v3768_v32 = vld [vmem:[%s3884_s1 + $0x98] sm:$0xff]  ;;  %v1827_v59 = vsel %vm30_vm0, %v1783_v19, 0.0  ;;  %v3784_v17 = vld [vmem:[%s3884_s1 + $0xa0] sm:$0xff] }
 0x221   :  { %633 = vst.msk [vmem:[#allocation4 + $0x90] sm:$0xff] %vm30_vm0, %v600_v0  ;;  %v1569_v55 = vld [vmem:[#allocation3 + $0xb8] sm:$0xff]  ;;  %v1752_v52 = vsub.f32 %v1656_v57, %v1720_v8  ;;  %v1722_v0 = vld [vmem:[#allocation4 + $0x80] sm:$0xff]  ;;  %vm1693_vm7 = vcmp.ne.s32.totalorder %v3768_v32, 4294967196  ;;  %v1531_v30 = vld [vmem:[#allocation2 + $0x88] sm:$0xff]  ;;  %vm1690_vm8 = vcmp.ne.s32.totalorder %v2240_v22, 4294967196  ;;  %v1660_v18 = vadd.f32 %v1615_v13, %v1532_v49 }
 0x222   :  { %1472 = vst.msk [vmem:[#allocation3 + $0xc8] sm:$0xff] %vm30_vm0, %v1440_v63  ;;  %v513_v34 = vpop.xlane.xlu1 %512  ;;  %v1824_v63 = vadd.f32 %v1823_v31, %v1822_v14  ;;  %2140 = vlog2.f32 %v1569_v55  ;;  %v1659_v44 = vadd.f32 %v1613_v27, %v1531_v30  ;;  %vm1692_vm9 = vcmp.ne.s32.totalorder %v2241_v40, 4294967196  ;;  %v1533_v57 = vld [vmem:[#allocation2 + $0x98] sm:$0xff]  ;;  %v1534_v27 = vld [vmem:[#allocation2 + $0xa0] sm:$0xff] }
 0x223   :  { %v1399_v45 = vpop.xlane.xlu0 %1398  ;;  %v601_v5 = vadd.f32 %v569_v21, %v513_v34  ;;  %v2131_v38 = vpop.eup %2130  ;;  %v1658_v21 = vadd.f32 %v1611_v9, %v1530_v42  ;;  %v1784_v29 = vsel %vm1688_vm5, %v1752_v52, 0.0  ;;  %v572_v34 = vld [vmem:[#allocation4 + $0xb0] sm:$0xff]  ;;  %vm1694_vm10 = vcmp.ne.s32.totalorder %v3784_v17, 4294967196 }
 0x224   :  { %v1441_v26 = vadd.f32 %v1399_v45, %v961_v15  ;;  %v1753_v15 = vsub.f32 %v1657_v35, %v1721_v60  ;;  %v1826_v36 = vadd.f32 %v1825_v56, %v1824_v63  ;;  %v1723_v28 = vld [vmem:[#allocation4 + $0x88] sm:$0xff]  ;;  %v2133_v47 = vpop.eup %2132  ;;  %v1617_v45 = vmul.f32 0.6931472, %v2129_v61  ;;  %v573_v60 = vld [vmem:[#allocation4 + $0xb8] sm:$0xff] }
 0x225   :  { %634 = vst.msk [vmem:[#allocation4 + $0x98] sm:$0xff] %vm30_vm0, %v601_v5  ;;  %v1570_v24 = vld [vmem:[#allocation3 + $0xc0] sm:$0xff]  ;;  %v1754_v3 = vsub.f32 %v1658_v21, %v1722_v0  ;;  %v1755_v2 = vsub.f32 %v1659_v44, %v1723_v28  ;;  %v1829_v9 = vsel %vm30_vm0, %v1784_v29, 0.0  ;;  %v1619_v55 = vmul.f32 0.6931472, %v2133_v47  ;;  %v934_v56 = vld [vmem:[#allocation3 + $0xf8] sm:$0xff] }
 0x226   :  { %1473 = vst.msk [vmem:[#allocation3 + $0xd0] sm:$0xff] %vm30_vm0, %v1441_v26  ;;  %v516_v54 = vpop.xlane.xlu1 %515  ;;  %v964_v26 = vmul.f32 %v2131_v38, %v932_v48  ;;  %2142 = vlog2.f32 %v1570_v24  ;;  %v2135_v4 = vpop.eup %2134  ;;  %v1785_v12 = vsel %vm1689_vm4, %v1753_v15, 0.0  ;;  %v1661_v23 = vadd.f32 %v1617_v45, %v1533_v57  ;;  %v574_v24 = vld [vmem:[#allocation4 + $0xc0] sm:$0xff] }
 0x227   :  { %v1402_v7 = vpop.xlane.xlu0 %1401  ;;  %v602_v1 = vadd.f32 %v570_v62, %v516_v54  ;;  %v1828_v62 = vadd.f32 %v1827_v59, %v1826_v36  ;;  %v1786_v14 = vsel %vm1690_vm8, %v1754_v3, 0.0  ;;  %v1621_v52 = vmul.f32 0.6931472, %v2135_v4  ;;  %v1536_v59 = vld [vmem:[#allocation2 + $0xb0] sm:$0xff]  ;;  %v2243_v4 = vld [vmem:[%s3884_s1 + $0xa8] sm:$0xff] }
 0x228   :  { %v1442_v37 = vadd.f32 %v1402_v7, %v962_v43  ;;  %v1724_v50 = vld [vmem:[#allocation4 + $0x90] sm:$0xff]  ;;  %v2137_v31 = vpop.eup %2136  ;;  %v1787_v61 = vsel %vm1691_vm6, %v1755_v2, 0.0  ;;  %v1833_v15 = vsel %vm30_vm0, %v1786_v14, 0.0  ;;  %vm1695_vm11 = vcmp.ne.s32.totalorder %v2243_v4, 4294967196  ;;  %v577_v14 = vld [vmem:[#allocation4 + $0xd8] sm:$0xff]  ;;  %v2247_v4 = vld [vmem:[%s3884_s1 + $0xc8] sm:$0xff] }
 0x229   :  { %635 = vst.msk [vmem:[#allocation4 + $0xa0] sm:$0xff] %vm30_vm0, %v602_v1  ;;  %v1571_v5 = vld [vmem:[#allocation3 + $0xc8] sm:$0xff]  ;;  %v933_v43 = vld [vmem:[#allocation3 + $0xf0] sm:$0xff]  ;;  %v2139_v51 = vpop.eup %2138  ;;  %v1756_v35 = vsub.f32 %v1660_v18, %v1724_v50  ;;  %vm1699_vm15 = vcmp.ne.s32.totalorder %v2247_v4, 4294967196 }
 0x22a   :  { %1474 = vst.msk [vmem:[#allocation3 + $0xd8] sm:$0xff] %vm30_vm0, %v1442_v37  ;;  %v519_v20 = vpop.xlane.xlu1 %518  ;;  %2144 = vlog2.f32 %v1571_v5  ;;  %v1831_v37 = vsel %vm30_vm0, %v1785_v12, 0.0  ;;  %v965_v1 = vmul.f32 %v3747_v41, %v933_v43  ;;  %v1535_v41 = vld [vmem:[#allocation2 + $0xa8] sm:$0xff]  ;;  %v966_v48 = vmul.f32 %v2139_v51, %v934_v56 }
 0x22b   :  { %v1405_v11 = vpop.xlane.xlu0 %1404  ;;  %v603_v25 = vadd.f32 %v571_v6, %v519_v20  ;;  %v1830_v6 = vadd.f32 %v1829_v9, %v1828_v62  ;;  %v1788_v53 = vsel %vm1692_vm9, %v1756_v35, 0.0  ;;  %v1663_v28 = vadd.f32 %v1621_v52, %v1535_v41  ;;  %v575_v50 = vld [vmem:[#allocation4 + $0xc8] sm:$0xff]  ;;  %v576_v62 = vld [vmem:[#allocation4 + $0xd0] sm:$0xff]  ;;  %v1537_v9 = vld [vmem:[#allocation2 + $0xb8] sm:$0xff] }
 0x22c   :  { %v1443_v39 = vadd.f32 %v1405_v11, %v963_v10  ;;  %v1725_v7 = vld [vmem:[#allocation4 + $0x98] sm:$0xff]  ;;  %v1623_v10 = vmul.f32 0.6931472, %v2137_v31  ;;  %v2141_v38 = vpop.eup %2140  ;;  %v1662_v11 = vadd.f32 %v1619_v55, %v1534_v27  ;;  %v1837_v5 = vsel %vm30_vm0, %v1788_v53, 0.0  ;;  %v1538_v52 = vld [vmem:[#allocation2 + $0xc0] sm:$0xff]  ;;  %v579_v41 = vld [vmem:[#allocation4 + $0xe8] sm:$0xff] }
 0x22d   :  { %636 = vst.msk [vmem:[#allocation4 + $0xa8] sm:$0xff] %vm30_vm0, %v603_v25  ;;  %v1572_v33 = vld [vmem:[#allocation3 + $0xd0] sm:$0xff]  ;;  %v1757_v16 = vsub.f32 %v1661_v23, %v1725_v7  ;;  %v1832_v20 = vadd.f32 %v1831_v37, %v1830_v6  ;;  %v1835_v25 = vsel %vm30_vm0, %v1787_v61, 0.0  ;;  %v1625_v3 = vmul.f32 0.6931472, %v2141_v38  ;;  %v2245_v23 = vld [vmem:[%s3884_s1 + $0xb8] sm:$0xff] }
 0x22e   :  { %1475 = vst.msk [vmem:[#allocation3 + $0xe0] sm:$0xff] %vm30_vm0, %v1443_v39  ;;  %v522_v8 = vpop.xlane.xlu1 %521  ;;  %2146 = vlog2.f32 %v1572_v33  ;;  %v1664_v44 = vadd.f32 %v1623_v10, %v1536_v59  ;;  %v2244_v33 = vld [vmem:[%s3884_s1 + $0xb0] sm:$0xff]  ;;  %vm1697_vm13 = vcmp.ne.s32.totalorder %v2245_v23, 4294967196  ;;  %v2250_v23 = vld [vmem:[%s3884_s1 + $0xe0] sm:$0xff] }
 0x22f   :  { %v1408_v46 = vpop.xlane.xlu0 %1407  ;;  %v604_v58 = vadd.f32 %v572_v34, %v522_v8  ;;  %v1789_v45 = vsel %vm1693_vm7, %v1757_v16, 0.0  ;;  %v1834_v34 = vadd.f32 %v1833_v15, %v1832_v20  ;;  %vm1696_vm12 = vcmp.ne.s32.totalorder %v2244_v33, 4294967196 }
 0x230   :  { %v1444_v54 = vadd.f32 %v1408_v46, %v964_v26  ;;  %v1726_v42 = vld [vmem:[#allocation4 + $0xa0] sm:$0xff]  ;;  %v2143_v22 = vpop.eup %2142  ;;  %v1839_v8 = vsel %vm30_vm0, %v1789_v45, 0.0  ;;  %v1665_v35 = vadd.f32 %v1625_v3, %v1537_v9  ;;  %vm1702_vm3 = vcmp.ne.s32.totalorder %v2250_v23, 4294967196 }
 0x231   :  { %637 = vst.msk [vmem:[#allocation4 + $0xb0] sm:$0xff] %vm30_vm0, %v604_v58  ;;  %v1573_v19 = vld [vmem:[#allocation3 + $0xd8] sm:$0xff]  ;;  %v1758_v39 = vsub.f32 %v1662_v11, %v1726_v42  ;;  %v1836_v18 = vadd.f32 %v1835_v25, %v1834_v34  ;;  %v1627_v7 = vmul.f32 0.6931472, %v2143_v22  ;;  %v1539_v11 = vld [vmem:[#allocation2 + $0xc8] sm:$0xff] }
 0x232   :  { %1476 = vst.msk [vmem:[#allocation3 + $0xe8] sm:$0xff] %vm30_vm0, %v1444_v54  ;;  %v525_v0 = vpop.xlane.xlu1 %524  ;;  %2148 = vlog2.f32 %v1573_v19 }
 0x233   :  { %v1411_v63 = vpop.xlane.xlu0 %1410  ;;  %v605_v13 = vadd.f32 %v573_v60, %v525_v0  ;;  %v1790_v46 = vsel %vm1694_vm10, %v1758_v39, 0.0  ;;  %v1838_v54 = vadd.f32 %v1837_v5, %v1836_v18  ;;  %v578_v60 = vld [vmem:[#allocation4 + $0xe0] sm:$0xff]  ;;  %v1666_v10 = vadd.f32 %v1627_v7, %v1538_v52 }
 0x234   :  { %v1445_v21 = vadd.f32 %v1411_v63, %v965_v1  ;;  %v1727_v36 = vld [vmem:[#allocation4 + $0xa8] sm:$0xff]  ;;  %v2145_v43 = vpop.eup %2144  ;;  %v1841_v19 = vsel %vm30_vm0, %v1790_v46, 0.0  ;;  %v1541_v46 = vld [vmem:[#allocation2 + $0xd8] sm:$0xff] }
 0x235   :  { %v1574_v30 = vld [vmem:[#allocation3 + $0xe0] sm:$0xff]  ;;  %638 = vst.msk [vmem:[#allocation4 + $0xb8] sm:$0xff] %vm30_vm0, %v605_v13  ;;  %v1759_v26 = vsub.f32 %v1663_v28, %v1727_v36  ;;  %v1840_v56 = vadd.f32 %v1839_v8, %v1838_v54  ;;  %v1629_v27 = vmul.f32 0.6931472, %v2145_v43  ;;  %v1540_v28 = vld [vmem:[#allocation2 + $0xd0] sm:$0xff] }
 0x236   :  { %1477 = vst.msk [vmem:[#allocation3 + $0xf0] sm:$0xff] %vm30_vm0, %v1445_v21  ;;  %2150 = vlog2.f32 %v1574_v30  ;;  %v528_v29 = vpop.xlane.xlu1 %527  ;;  %v580_v30 = vld [vmem:[#allocation4 + $0xf0] sm:$0xff]  ;;  %v1542_v8 = vld [vmem:[#allocation2 + $0xe0] sm:$0xff] }
 0x237   :  { %v1414_v47 = vpop.xlane.xlu0 %1413  ;;  %v606_v49 = vadd.f32 %v574_v24, %v528_v29  ;;  %v1791_v17 = vsel %vm1695_vm11, %v1759_v26, 0.0  ;;  %v2246_v24 = vld [vmem:[%s3884_s1 + $0xc0] sm:$0xff]  ;;  %v1667_v39 = vadd.f32 %v1629_v27, %v1539_v11 }
 0x238   :  { %v1446_v40 = vadd.f32 %v1414_v47, %v966_v48  ;;  %v1728_v2 = vld [vmem:[#allocation4 + $0xb0] sm:$0xff]  ;;  %v2147_v58 = vpop.eup %2146  ;;  %v1843_v38 = vsel %vm30_vm0, %v1791_v17, 0.0  ;;  %v1842_v48 = vadd.f32 %v1841_v19, %v1840_v56  ;;  %vm1698_vm14 = vcmp.ne.s32.totalorder %v2246_v24, 4294967196  ;;  %v1545_v24 = vld [vmem:[#allocation2 + $0xf8] sm:$0xff] }
 0x239   :  { %v1575_v12 = vld [vmem:[#allocation3 + $0xe8] sm:$0xff]  ;;  %639 = vst.msk [vmem:[#allocation4 + $0xc0] sm:$0xff] %vm30_vm0, %v606_v49  ;;  %v1760_v32 = vsub.f32 %v1664_v44, %v1728_v2  ;;  %v1631_v0 = vmul.f32 0.6931472, %v2147_v58  ;;  %v1544_v19 = vld [vmem:[#allocation2 + $0xf0] sm:$0xff] }
 0x23a   :  { %1478 = vst.msk [vmem:[#allocation3 + $0xf8] sm:$0xff] %vm30_vm0, %v1446_v40  ;;  %2152 = vlog2.f32 %v1575_v12  ;;  %v534_v57 = vpop.xlane.xlu1 %533  ;;  %v1844_v47 = vadd.f32 %v1843_v38, %v1842_v48  ;;  %v581_v12 = vld [vmem:[#allocation4 + $0xf8] sm:$0xff] }
 0x23b   :  { %v531_v31 = vpop.xlane.xlu0 %530  ;;  %v608_v51 = vadd.f32 %v576_v62, %v534_v57  ;;  %v1792_v61 = vsel %vm1696_vm12, %v1760_v32, 0.0  ;;  %v1668_v34 = vadd.f32 %v1631_v0, %v1540_v28  ;;  %v2248_v62 = vld [vmem:[%s3884_s1 + $0xd0] sm:$0xff]  ;;  %v2249_v57 = vld [vmem:[%s3884_s1 + $0xd8] sm:$0xff] }
 0x23c   :  { %v607_v55 = vadd.f32 %v575_v50, %v531_v31  ;;  %v1729_v1 = vld [vmem:[#allocation4 + $0xb8] sm:$0xff]  ;;  %v2149_v16 = vpop.eup %2148  ;;  %v1845_v59 = vsel %vm30_vm0, %v1792_v61, 0.0  ;;  %vm1700_vm1 = vcmp.ne.s32.totalorder %v2248_v62, 4294967196  ;;  %vm1701_vm2 = vcmp.ne.s32.totalorder %v2249_v57, 4294967196  ;;  %v2251_v61 = vld [vmem:[%s3884_s1 + $0xe8] sm:$0xff] }
 0x23d   :  { %v1576_v37 = vld [vmem:[#allocation3 + $0xf0] sm:$0xff]  ;;  %641 = vst.msk [vmem:[#allocation4 + $0xd0] sm:$0xff] %vm30_vm0, %v608_v51  ;;  %v1761_v6 = vsub.f32 %v1665_v35, %v1729_v1  ;;  %v1633_v44 = vmul.f32 0.6931472, %v2149_v16  ;;  %v1846_v5 = vadd.f32 %v1845_v59, %v1844_v47  ;;  %vm1703_vm4 = vcmp.ne.s32.totalorder %v2251_v61, 4294967196  ;;  %v1543_v16 = vld [vmem:[#allocation2 + $0xe8] sm:$0xff] }
 0x23e   :  { %640 = vst.msk [vmem:[#allocation4 + $0xc8] sm:$0xff] %vm30_vm0, %v607_v55  ;;  %2154 = vlog2.f32 %v1576_v37  ;;  %v540_v63 = vpop.xlane.xlu1 %539 }
 0x23f   :  { %v537_v42 = vpop.xlane.xlu0 %536  ;;  %v610_v13 = vadd.f32 %v578_v60, %v540_v63  ;;  %v1793_v20 = vsel %vm1697_vm13, %v1761_v6, 0.0  ;;  %v1669_v54 = vadd.f32 %v1633_v44, %v1541_v46 }
 0x240   :  { %v2151_v15 = vpop.eup %2150  ;;  %v609_v21 = vadd.f32 %v577_v14, %v537_v42  ;;  %v1730_v53 = vld [vmem:[#allocation4 + $0xc0] sm:$0xff]  ;;  %v1847_v22 = vsel %vm30_vm0, %v1793_v20, 0.0 }
 0x241   :  { %v1577_v36 = vld [vmem:[#allocation3 + $0xf8] sm:$0xff]  ;;  %643 = vst.msk [vmem:[#allocation4 + $0xe0] sm:$0xff] %vm30_vm0, %v610_v13  ;;  %v1762_v25 = vsub.f32 %v1666_v10, %v1730_v53  ;;  %v1635_v45 = vmul.f32 0.6931472, %v2151_v15  ;;  %v1848_v31 = vadd.f32 %v1847_v22, %v1846_v5  ;;  %v2252_v13 = vld [vmem:[%s3884_s1 + $0xf0] sm:$0xff] }
 0x242   :  { %642 = vst.msk [vmem:[#allocation4 + $0xd8] sm:$0xff] %vm30_vm0, %v609_v21  ;;  %2156 = vlog2.f32 %v1577_v36  ;;  %v546_v3 = vpop.xlane.xlu1 %545  ;;  %vm1704_vm5 = vcmp.ne.s32.totalorder %v2252_v13, 4294967196 }
 0x243   :  { %v543_v29 = vpop.xlane.xlu0 %542  ;;  %v612_v50 = vadd.f32 %v580_v30, %v546_v3  ;;  %v1794_v26 = vsel %vm1698_vm14, %v1762_v25, 0.0  ;;  %v1670_v58 = vadd.f32 %v1635_v45, %v1542_v8 }
 0x244   :  { %v2153_v40 = vpop.eup %2152  ;;  %v611_v49 = vadd.f32 %v579_v41, %v543_v29  ;;  %v1732_v18 = vld [vmem:[#allocation4 + $0xd0] sm:$0xff]  ;;  %v1849_v32 = vsel %vm30_vm0, %v1794_v26, 0.0  ;;  %v2253_v29 = vld [vmem:[%s3884_s1 + $0xf8] sm:$0xff]  ;;  %s2308_s1 = smov [#allocation8]  }
 0x245   :  { %v1731_v2 = vld [vmem:[#allocation4 + $0xc8] sm:$0xff]  ;;  %645 = vst.msk [vmem:[#allocation4 + $0xf0] sm:$0xff] %vm30_vm0, %v612_v50  ;;  %v1764_v33 = vsub.f32 %v1668_v34, %v1732_v18  ;;  %v1637_v7 = vmul.f32 0.6931472, %v2153_v40  ;;  %v1850_v17 = vadd.f32 %v1849_v32, %v1848_v31  ;;  %vm1705_vm6 = vcmp.ne.s32.totalorder %v2253_v29, 4294967196  ;;  %s1884_s6 = sshll.u32 %s2308_s1, 4  ;;  %s1885_s6 = int_to_ptr.vmem [resolvable:$true] %s1884_s6 }
 0x246   :  { %644 = vst.msk [vmem:[#allocation4 + $0xe8] sm:$0xff] %vm30_vm0, %v611_v49  ;;  %v1763_v43 = vsub.f32 %v1667_v39, %v1731_v2  ;;  %s2276_s7 = scalar_lea.vmem %s1885_s6, 16  ;;  %s2280_s8 = scalar_lea.vmem %s1885_s6, 32 }
 0x247   :  { %v549_v9 = vpop.xlane.xlu0 %548  ;;  %v1796_v35 = vsel %vm1700_vm1, %v1764_v33, 0.0  ;;  %v1671_v10 = vadd.f32 %v1637_v7, %v1543_v16  ;;  %p2277_p8 = scmp.ne.s32.totalorder %s1885_s6, %s2276_s7  ;;  %p2281_p9 = scmp.lt.s32.totalorder %s1885_s6, %s1885_s6 }
 0x248   :  { %v2155_v55 = vpop.eup %2154  ;;  %v613_v51 = vadd.f32 %v581_v12, %v549_v9  ;;  %v1795_v14 = vsel %vm1699_vm15, %v1763_v43, 0.0  ;;  %v1734_v1 = vld [vmem:[#allocation4 + $0xe0] sm:$0xff]  ;;  %v1853_v63 = vsel %vm30_vm0, %v1796_v35, 0.0  ;;  %p2282_p10 = scmp.lt.s32.totalorder %s2280_s8, %s2276_s7 }
 0x249   :  { %v1639_v60 = vmul.f32 0.6931472, %v2155_v55  ;;  %v1733_v37 = vld [vmem:[#allocation4 + $0xd8] sm:$0xff]  ;;  %v1851_v56 = vsel %vm30_vm0, %v1795_v14, 0.0  ;;  %v1766_v27 = vsub.f32 %v1670_v58, %v1734_v1 }
 0x24a   :  { %646 = vst.msk [vmem:[#allocation4 + $0xf8] sm:$0xff] %vm30_vm0, %v613_v51  ;;  %v1765_v52 = vsub.f32 %v1669_v54, %v1733_v37  ;;  %v1852_v6 = vadd.f32 %v1851_v56, %v1850_v17  ;;  %p2283_p11 = por %p2282_p10, %p2281_p9 }
 0x24b   :  { %v1672_v42 = vadd.f32 %v1639_v60, %v1544_v19  ;;  %v1798_v15 = vsel %vm1702_vm3, %v1766_v27, 0.0 }
 0x24c   :  { %v2157_v0 = vpop.eup %2156  ;;  %v1797_v38 = vsel %vm1701_vm2, %v1765_v52, 0.0  ;;  %v1854_v21 = vadd.f32 %v1853_v63, %v1852_v6  ;;  %v1736_v20 = vld [vmem:[#allocation4 + $0xf0] sm:$0xff]  ;;  %v1857_v28 = vsel %vm30_vm0, %v1798_v15, 0.0  ;;  %p2284_p12 = pnand %p2283_p11, %p2277_p8 }
 0x24d   :  { %v1641_v41 = vmul.f32 0.6931472, %v2157_v0  ;;  %v1735_v11 = vld [vmem:[#allocation4 + $0xe8] sm:$0xff]  ;;  %v1855_v48 = vsel %vm30_vm0, %v1797_v38, 0.0  ;;  %v1768_v36 = vsub.f32 %v1672_v42, %v1736_v20 }
 0x24e   :  { %v1767_v30 = vsub.f32 %v1671_v10, %v1735_v11  ;;  %v1856_v53 = vadd.f32 %v1855_v48, %v1854_v21 }
 0x24f   :  { %v1673_v59 = vadd.f32 %v1641_v41, %v1545_v24  ;;  %v1800_v25 = vsel %vm1704_vm5, %v1768_v36, 0.0 }
 0x250   :  { %v1799_v39 = vsel %vm1703_vm4, %v1767_v30, 0.0  ;;  %v1858_v47 = vadd.f32 %v1857_v28, %v1856_v53  ;;  %v1861_v22 = vsel %vm30_vm0, %v1800_v25, 0.0 }
 0x251   :  { %v1737_v3 = vld [vmem:[#allocation4 + $0xf8] sm:$0xff]  ;;  %v1859_v44 = vsel %vm30_vm0, %v1799_v39, 0.0 }
 0x252   :  { %v1769_v45 = vsub.f32 %v1673_v59, %v1737_v3  ;;  %v1860_v34 = vadd.f32 %v1859_v44, %v1858_v47 }
 0x254   :  { %v1801_v40 = vsel %vm1705_vm6, %v1769_v45, 0.0  ;;  %v1862_v49 = vadd.f32 %v1861_v22, %v1860_v34 }
 0x255   :  { %v1863_v50 = vsel %vm30_vm0, %v1801_v40, 0.0 }
 0x256   :  { %v1864_v26 = vadd.f32 %v1863_v50, %v1862_v49 }
 0x258   :  { %v1865_v5 = vrot.slane %v1864_v26, 4 }
 0x25a   :  { %v1866_v4 = vadd.f32 %v1865_v5, %v1864_v26 }
 0x25c   :  { %v1867_v62 = vrot.slane %v1866_v4, 2 }
 0x25e   :  { %v1868_v12 = vadd.f32 %v1867_v62, %v1866_v4 }
 0x260   :  { %v1869_v2 = vrot.slane %v1868_v12, 1 }
 0x262   :  { %v1870_v18 = vadd.f32 %v1869_v2, %v1868_v12 }
 0x264   :  { %1873 = vperm.xlu1 %1900, %v1870_v18  }
 0x2e3   :  { %v1874_v32 = vpop.permute.xlu1 %1873 }
 0x2e4   :  { %1877 = vst [vmem:[#allocation8] sm:$0x1] %v1874_v32 }
 0x2e5   :  { %2287 = shalt.err (!%p2284_p12)
}
 0x2e6   :  { %s2288_s11 = scalar_lea.hbm %s3885_s2, 16 }
 0x2e7   :  { %p2289_p13 = scmp.ne.s32.totalorder %s3885_s2, %s2288_s11  ;;  %p2292_p0 = scmp.lt.u32.totalorder %s2288_s11, %s3885_s2 }
 0x2e9   :  { %p2294_p1 = pnand %p2292_p0, %p2289_p13 }
 0x2eb   :  { %2297 = shalt.err (!%p2294_p1)
}
 0x2ec   :  { %1887 = dma.vmem_to_hbm [thread:$0]  %s1885_s6, 16, %s3885_s2, [#allocation7]  }
 0x2ed   :  { %2300 = dma.done.wait [#allocation7], 16  }
 0x2ee   :  { %2301 = vsyncadd [#allocation7], 4294967280 }
 0x2ef   :  { %1891 = vsyncpa [#allocation6], 1 }
 0x2f0   :  { %1892 = vsyncpa [#allocation7], 1 }

</bundles_post_ra>
